<compile_context>
chip_gen: v7x
topology: tpu7x:2x2x1
jax: 0.10.0
libtpu: 0.0.40
codegen_flags: <defaults>
</compile_context>

<pallas_src>
import functools

import numpy as np
import jax
import jax.numpy as jnp
from jax.experimental import pallas as pl
from jax.experimental.pallas import tpu as pltpu

V_THRESHOLD = 1.0   # spikingjelly IFNode default v_threshold
C1, C2 = 32, 64     # conv channel counts
CP = 128            # lane padding for conv2 output channels


# ---------------------------------------------------------------------------
# Static row-index map: stage-1 output rows are laid out as 4 "phase" planes
# (parity of the padded conv2-input coordinates), each an 8x8 grid padded to
# 80 rows.  Row (a*2+b)*80 + s*8 + t holds q1pad[2s+a, 2t+b, :] (zero if that
# is conv2 border padding), so every stage-2 window is a contiguous 64-row
# slab of the spike scratch at a static offset.
# ---------------------------------------------------------------------------
def _build_phase_row_index():
    idx = np.full((320,), 196, dtype=np.int32)      # 196 -> appended zero row
    for a in (0, 1):
        for b in (0, 1):
            base = (a * 2 + b) * 80
            for s in range(8):
                for t in range(8):
                    i = 2 * s + a - 1
                    j = 2 * t + b - 1
                    if 0 <= i < 14 and 0 <= j < 14:
                        idx[base + s * 8 + t] = i * 14 + j
    return idx


_ROW_IDX = _build_phase_row_index()


# ---------------------------------------------------------------------------
# Fused kernel: conv1 + IF + pool1 + conv2 + IF + pool2 (NB images per step)
# ---------------------------------------------------------------------------
def _make_fused_kernel(nb):
    def kernel(taps_ref, w1_ref, w2_ref, thr2_ref, o_ref, spk_ref):
        # taps_ref: (nb, 320, 17) f32   stage-1 window taps (+ bias column)
        # w1_ref:   (4, 17, 128)  f32   per-pool-tap conv1 weights (+ bias row)
        # w2_ref:   (9, 32, 128)  bf16  conv2 weights, (tap, cin, cout padded)
        # thr2_ref: (1, 128)      f32   v_threshold - bias2 (padded lanes = 1)
        # o_ref:    (nb, 64, 128) bf16  pooled conv2 spikes, rows = u*8+v
        # spk_ref:  (320, 128)    f32   scratch: phase-layout conv1 spike map
        thr2 = thr2_ref[...]
        w1_all = [w1_ref[t] for t in range(4)]          # hoisted weight loads
        w2_all = [w2_ref[k] for k in range(9)]

        for n in range(nb):                              # static unroll, nb small
            taps = taps_ref[n]                           # (320, 17) f32

            # ---- stage 1: conv1 + IF + pool1 (MXU, running max over taps) ----
            m1 = None
            for t in range(4):
                d = jnp.dot(taps, w1_all[t], preferred_element_type=jnp.float32)
                m1 = d if m1 is None else jnp.maximum(m1, d)
            # bias is the 17th tap column, so threshold is exactly 1.0; padded
            # channels / padding rows accumulate 0 -> no spike.
            spk_ref[...] = jnp.where(m1 >= V_THRESHOLD, 1.0, 0.0)

            # ---- stage 2: conv2 + IF + pool2 (9 dots, M=256 merged pool taps) ----
            acc = jnp.zeros((256, 128), jnp.float32)
            for dy in range(3):
                for dx in range(3):
                    slabs = []
                    for p in (0, 1):
                        for q in (0, 1):
                            a, ya = (p + dy) & 1, (p + dy) >> 1
                            b, xb = (q + dx) & 1, (q + dx) >> 1
                            s0 = (a * 2 + b) * 80 + ya * 8 + xb
                            slabs.append(spk_ref[s0:s0 + 64, 0:C1])
                    lhs = jnp.concatenate(slabs, axis=0).astype(jnp.bfloat16)
                    acc = acc + jnp.dot(lhs, w2_all[dy * 3 + dx],
                                        preferred_element_type=jnp.float32)
            # max over the 4 pool taps (sublane-aligned 64-row slabs), then IF.
            m2 = jnp.maximum(jnp.maximum(acc[0:64], acc[64:128]),
                             jnp.maximum(acc[128:192], acc[192:256]))
            o_ref[n] = jnp.where(m2 >= thr2, 1.0, 0.0).astype(o_ref.dtype)

    return kernel


def fused_conv_if_pool(taps, w1m, w2m, thr2, *, nb):
    B = taps.shape[0]
    assert B % nb == 0
    return pl.pallas_call(
        _make_fused_kernel(nb),
        out_shape=jax.ShapeDtypeStruct((B, 64, CP), jnp.bfloat16),
        grid=(B // nb,),
        in_specs=[pl.BlockSpec((nb, 320, 17), lambda i: (i, 0, 0)),
                  pl.BlockSpec((4, 17, CP), lambda i: (0, 0, 0)),
                  pl.BlockSpec((9, C1, CP), lambda i: (0, 0, 0)),
                  pl.BlockSpec((1, CP), lambda i: (0, 0))],
        out_specs=pl.BlockSpec((nb, 64, CP), lambda i: (i, 0, 0)),
        scratch_shapes=[pltpu.VMEM((320, CP), jnp.float32)],
        compiler_params=pltpu.CompilerParams(
            dimension_semantics=("parallel",)),
    )(taps, w1m, w2m, thr2)


# ---------------------------------------------------------------------------
# Final linear (tiny; whole-array single call, bf16 operands, f32 accumulate)
# ---------------------------------------------------------------------------
def linear_kernel(x_ref, w_ref, o_ref):
    o_ref[...] = jnp.dot(x_ref[...], w_ref[...],
                         preferred_element_type=jnp.float32)


def linear_mm(x2d, w_mat):
    M, K = x2d.shape
    N = w_mat.shape[1]
    return pl.pallas_call(
        linear_kernel,
        out_shape=jax.ShapeDtypeStruct((M, N), jnp.float32),
        in_specs=[pl.BlockSpec((M, K), lambda *_: (0, 0)),
                  pl.BlockSpec((K, N), lambda *_: (0, 0))],
        out_specs=pl.BlockSpec((M, N), lambda *_: (0, 0)),
    )(x2d, w_mat)


# ---------------------------------------------------------------------------
# One-time parameter preparation (hoisted out of the hot forward)
# ---------------------------------------------------------------------------
def prepare_params(w1, b1, w2, b2, wl):
    w1 = w1.astype(jnp.float32)
    b1 = b1.astype(jnp.float32)
    # stage 1: (4, 17, 128); block t=(p,q); row oy*4+ox holds W1[oy-p, ox-q];
    # row 16 holds the bias (paired with the constant-1 tap column).
    w1_t = jnp.transpose(w1[:, 0, :, :], (1, 2, 0))          # (3,3,C1) [dy,dx,co]
    blocks = []
    for p in (0, 1):
        for q in (0, 1):
            wm = jnp.zeros((17, C1), jnp.float32)
            for dy in range(3):
                for dx in range(3):
                    wm = wm.at[(p + dy) * 4 + (q + dx)].set(w1_t[dy, dx])
            wm = wm.at[16].set(b1)
            blocks.append(jnp.pad(wm, ((0, 0), (0, CP - C1))))
    w1m = jnp.stack(blocks, axis=0)                           # (4, 17, 128)

    # stage 2: (9, 32, 128) bf16, (tap, real cin, padded cout); bias folded
    # into the threshold (spike = acc >= v_th - b2); padded lanes -> thr 1.0.
    w2m = jnp.transpose(w2, (2, 3, 1, 0)).reshape(9, C1, C2)
    w2m = jnp.pad(w2m, ((0, 0), (0, 0), (0, CP - C2))).astype(jnp.bfloat16)
    thr2 = (V_THRESHOLD - jnp.pad(b2.astype(jnp.float32), (0, CP - C2)))
    thr2 = thr2.reshape(1, CP).astype(jnp.float32)

    # linear: (3136, 10) bf16; rows in (h, w, c) order to match the kernel's
    # output flatten and the module's NCHW-flatten resolution.
    wlm = wl.reshape(10, C2, 7, 7)
    wlm = jnp.transpose(wlm, (2, 3, 1, 0)).reshape(7 * 7 * C2, 10)
    wlm = wlm.astype(jnp.bfloat16)
    return w1m, w2m, thr2, wlm


def pick_batch_block(B, nb_max=8):
    # Batch-block the grid, but keep >= 2 grid steps when possible so the
    # "parallel" axis can shard across v7x's two TensorCores.  Per-step VMEM
    # at nb_max=8 is only a few MB, safely under the v7x scoped limit.
    target = max(1, min(nb_max, B // 2))
    for nb in range(target, 0, -1):
        if B % nb == 0:
            return nb
    return 1


# ---------------------------------------------------------------------------
# Forward pass (host glue is only the tiny stage-1 tap gather, ~22 KB/image)
# ---------------------------------------------------------------------------
def snn_stdp_forward(x_nchw, prepped, *, nb):
    w1m, w2m, thr2, wlm = prepped
    B = x_nchw.shape[0]

    # stage-1 window taps: taps[b, i*14+j, oy*4+ox] = xpad[b, 2i+oy, 2j+ox]
    x = x_nchw[:, 0, :, :].astype(jnp.float32)                       # (B,28,28)
    xp = jnp.pad(x, ((0, 0), (1, 1), (1, 1)))                        # (B,30,30)
    taps = jnp.stack(
        [xp[:, oy:oy + 28:2, ox:ox + 28:2].reshape(B, 196)
         for oy in range(4) for ox in range(4)], axis=-1)            # (B,196,16)
    taps = jnp.concatenate(
        [taps, jnp.ones((B, 196, 1), jnp.float32)], axis=-1)         # + bias col
    taps = jnp.concatenate(
        [taps, jnp.zeros((B, 1, 17), jnp.float32)], axis=1)          # zero row
    taps = jnp.take(taps, jnp.asarray(_ROW_IDX), axis=1)             # (B,320,17)

    # fused conv1+IF+pool1+conv2+IF+pool2
    q2 = fused_conv_if_pool(taps, w1m, w2m, thr2, nb=nb)             # (B,64,128)

    # slice padding away, flatten (h, w, c), bf16 activations into the linear
    feat = q2.reshape(B, 8, 8, CP)[:, :7, :7, :C2].reshape(B, 7 * 7 * C2)
    return linear_mm(feat, wlm)                                      # (B,10) f32


# ---------------------------------------------------------------------------
# Main
# ---------------------------------------------------------------------------
if __name__ == "__main__":
    key = jax.random.PRNGKey(0)
    k1, k2, k3, k4, k5, kx = jax.random.split(key, 6)

    # Deterministic synthetic parameters (shapes from the module's __init__).
    w1 = jax.random.normal(k1, (32, 1, 3, 3), jnp.float32) * (2.0 / 3.0)
    b1 = jax.random.normal(k2, (32,), jnp.float32) * 0.1
    w2 = jax.random.normal(k3, (64, 32, 3, 3), jnp.float32) * (1.0 / jnp.sqrt(288.0))
    b2 = jax.random.normal(k4, (64,), jnp.float32) * 0.1
    wl = jax.random.normal(k5, (10, 7 * 7 * 64), jnp.float32) * (1.0 / jnp.sqrt(3136.0))

    prepped = prepare_params(w1, b1, w2, b2, wl)     # hoisted, one-time

    # MNIST-like input: batch=2, 1 channel, 28x28 (required by the 7*7*64 linear).
    x = jax.random.uniform(kx, (2, 1, 28, 28), jnp.float32)
    nb = pick_batch_block(x.shape[0])                # -> 1 here, grid=(2,)

    fwd = jax.jit(snn_stdp_forward, static_argnames=("nb",))
    y = fwd(x, prepped, nb=nb)
    y = jax.block_until_ready(y)
    assert y.shape == (2, 10) and y.dtype == jnp.float32
    print("KERNEL_OK")
</pallas_src>

<mosaic_0001>
module attributes {stable_mosaic.version = 11 : i64} {
  func.func @kernel(%arg0: i32, %arg1: memref<1x320x17xf32, #tpu.memory_space<vmem>>, %arg2: memref<4x17x128xf32, #tpu.memory_space<vmem>>, %arg3: memref<9x32x128xbf16, #tpu.memory_space<vmem>>, %arg4: memref<1x128xf32, #tpu.memory_space<vmem>>, %arg5: memref<1x64x128xbf16, #tpu.memory_space<vmem>>, %arg6: memref<320x128xf32, #tpu.memory_space<vmem>>) attributes {dimension_semantics = [#tpu.dimension_semantics<parallel>], iteration_bounds = array<i64: 2>, scalar_prefetch = 0 : i64, scratch_operands = 1 : i64, tpu.core_type = #tpu.core_type<tc>, window_params = [{transform_indices = @transform_0, window_bounds = array<i64: 1, 320, 17>}, {pipeline_mode = #tpu.pipeline_mode<synchronous>, transform_indices = @transform_1, window_bounds = array<i64: 4, 17, 128>}, {pipeline_mode = #tpu.pipeline_mode<synchronous>, transform_indices = @transform_2, window_bounds = array<i64: 9, 32, 128>}, {pipeline_mode = #tpu.pipeline_mode<synchronous>, transform_indices = @transform_3, window_bounds = array<i64: 1, 128>}, {transform_indices = @transform_4, window_bounds = array<i64: 1, 64, 128>}]} {
    %c0 = arith.constant 0 : index
    %c0_0 = arith.constant 0 : index
    %0 = vector.load %arg4[%c0, %c0_0] : memref<1x128xf32, #tpu.memory_space<vmem>>, vector<1x128xf32>
    %c0_1 = arith.constant 0 : index
    %c0_2 = arith.constant 0 : index
    %c0_3 = arith.constant 0 : index
    %1 = vector.load %arg2[%c0_1, %c0_2, %c0_3] : memref<4x17x128xf32, #tpu.memory_space<vmem>>, vector<1x17x128xf32>
    %2 = vector.shape_cast %1 : vector<1x17x128xf32> to vector<17x128xf32>
    %c1 = arith.constant 1 : index
    %c0_4 = arith.constant 0 : index
    %c0_5 = arith.constant 0 : index
    %3 = vector.load %arg2[%c1, %c0_4, %c0_5] : memref<4x17x128xf32, #tpu.memory_space<vmem>>, vector<1x17x128xf32>
    %4 = vector.shape_cast %3 : vector<1x17x128xf32> to vector<17x128xf32>
    %c2 = arith.constant 2 : index
    %c0_6 = arith.constant 0 : index
    %c0_7 = arith.constant 0 : index
    %5 = vector.load %arg2[%c2, %c0_6, %c0_7] : memref<4x17x128xf32, #tpu.memory_space<vmem>>, vector<1x17x128xf32>
    %6 = vector.shape_cast %5 : vector<1x17x128xf32> to vector<17x128xf32>
    %c3 = arith.constant 3 : index
    %c0_8 = arith.constant 0 : index
    %c0_9 = arith.constant 0 : index
    %7 = vector.load %arg2[%c3, %c0_8, %c0_9] : memref<4x17x128xf32, #tpu.memory_space<vmem>>, vector<1x17x128xf32>
    %8 = vector.shape_cast %7 : vector<1x17x128xf32> to vector<17x128xf32>
    %c0_10 = arith.constant 0 : index
    %c0_11 = arith.constant 0 : index
    %c0_12 = arith.constant 0 : index
    %9 = vector.load %arg3[%c0_10, %c0_11, %c0_12] : memref<9x32x128xbf16, #tpu.memory_space<vmem>>, vector<1x32x128xbf16>
    %10 = vector.shape_cast %9 : vector<1x32x128xbf16> to vector<32x128xbf16>
    %c1_13 = arith.constant 1 : index
    %c0_14 = arith.constant 0 : index
    %c0_15 = arith.constant 0 : index
    %11 = vector.load %arg3[%c1_13, %c0_14, %c0_15] : memref<9x32x128xbf16, #tpu.memory_space<vmem>>, vector<1x32x128xbf16>
    %12 = vector.shape_cast %11 : vector<1x32x128xbf16> to vector<32x128xbf16>
    %c2_16 = arith.constant 2 : index
    %c0_17 = arith.constant 0 : index
    %c0_18 = arith.constant 0 : index
    %13 = vector.load %arg3[%c2_16, %c0_17, %c0_18] : memref<9x32x128xbf16, #tpu.memory_space<vmem>>, vector<1x32x128xbf16>
    %14 = vector.shape_cast %13 : vector<1x32x128xbf16> to vector<32x128xbf16>
    %c3_19 = arith.constant 3 : index
    %c0_20 = arith.constant 0 : index
    %c0_21 = arith.constant 0 : index
    %15 = vector.load %arg3[%c3_19, %c0_20, %c0_21] : memref<9x32x128xbf16, #tpu.memory_space<vmem>>, vector<1x32x128xbf16>
    %16 = vector.shape_cast %15 : vector<1x32x128xbf16> to vector<32x128xbf16>
    %c4 = arith.constant 4 : index
    %c0_22 = arith.constant 0 : index
    %c0_23 = arith.constant 0 : index
    %17 = vector.load %arg3[%c4, %c0_22, %c0_23] : memref<9x32x128xbf16, #tpu.memory_space<vmem>>, vector<1x32x128xbf16>
    %18 = vector.shape_cast %17 : vector<1x32x128xbf16> to vector<32x128xbf16>
    %c5 = arith.constant 5 : index
    %c0_24 = arith.constant 0 : index
    %c0_25 = arith.constant 0 : index
    %19 = vector.load %arg3[%c5, %c0_24, %c0_25] : memref<9x32x128xbf16, #tpu.memory_space<vmem>>, vector<1x32x128xbf16>
    %20 = vector.shape_cast %19 : vector<1x32x128xbf16> to vector<32x128xbf16>
    %c6 = arith.constant 6 : index
    %c0_26 = arith.constant 0 : index
    %c0_27 = arith.constant 0 : index
    %21 = vector.load %arg3[%c6, %c0_26, %c0_27] : memref<9x32x128xbf16, #tpu.memory_space<vmem>>, vector<1x32x128xbf16>
    %22 = vector.shape_cast %21 : vector<1x32x128xbf16> to vector<32x128xbf16>
    %c7 = arith.constant 7 : index
    %c0_28 = arith.constant 0 : index
    %c0_29 = arith.constant 0 : index
    %23 = vector.load %arg3[%c7, %c0_28, %c0_29] : memref<9x32x128xbf16, #tpu.memory_space<vmem>>, vector<1x32x128xbf16>
    %24 = vector.shape_cast %23 : vector<1x32x128xbf16> to vector<32x128xbf16>
    %c8 = arith.constant 8 : index
    %c0_30 = arith.constant 0 : index
    %c0_31 = arith.constant 0 : index
    %25 = vector.load %arg3[%c8, %c0_30, %c0_31] : memref<9x32x128xbf16, #tpu.memory_space<vmem>>, vector<1x32x128xbf16>
    %26 = vector.shape_cast %25 : vector<1x32x128xbf16> to vector<32x128xbf16>
    %c0_32 = arith.constant 0 : index
    %c0_33 = arith.constant 0 : index
    %c0_34 = arith.constant 0 : index
    %27 = vector.load %arg1[%c0_32, %c0_33, %c0_34] : memref<1x320x17xf32, #tpu.memory_space<vmem>>, vector<1x320x17xf32>
    %28 = vector.shape_cast %27 : vector<1x320x17xf32> to vector<320x17xf32>
    %cst = arith.constant dense<0.000000e+00> : vector<320x128xf32>
    %29 = tpu.matmul %28, %2, %cst {dimension_numbers = #tpu.dot_dimension_numbers<[1], [0], [0], [1], [0, 0, 1, 1], [], []>} : vector<320x17xf32>, vector<17x128xf32>, vector<320x128xf32> -> vector<320x128xf32>
    %cst_35 = arith.constant dense<0.000000e+00> : vector<320x128xf32>
    %30 = tpu.matmul %28, %4, %cst_35 {dimension_numbers = #tpu.dot_dimension_numbers<[1], [0], [0], [1], [0, 0, 1, 1], [], []>} : vector<320x17xf32>, vector<17x128xf32>, vector<320x128xf32> -> vector<320x128xf32>
    %31 = arith.maximumf %29, %30 : vector<320x128xf32>
    %cst_36 = arith.constant dense<0.000000e+00> : vector<320x128xf32>
    %32 = tpu.matmul %28, %6, %cst_36 {dimension_numbers = #tpu.dot_dimension_numbers<[1], [0], [0], [1], [0, 0, 1, 1], [], []>} : vector<320x17xf32>, vector<17x128xf32>, vector<320x128xf32> -> vector<320x128xf32>
    %33 = arith.maximumf %31, %32 : vector<320x128xf32>
    %cst_37 = arith.constant dense<0.000000e+00> : vector<320x128xf32>
    %34 = tpu.matmul %28, %8, %cst_37 {dimension_numbers = #tpu.dot_dimension_numbers<[1], [0], [0], [1], [0, 0, 1, 1], [], []>} : vector<320x17xf32>, vector<17x128xf32>, vector<320x128xf32> -> vector<320x128xf32>
    %35 = arith.maximumf %33, %34 : vector<320x128xf32>
    %cst_38 = arith.constant 1.000000e+00 : f32
    %36 = vector.broadcast %cst_38 : f32 to vector<320x128xf32>
    %37 = arith.cmpf oge, %35, %36 : vector<320x128xf32>
    %cst_39 = arith.constant 1.000000e+00 : f32
    %cst_40 = arith.constant 0.000000e+00 : f32
    %38 = vector.broadcast %cst_39 : f32 to vector<320x128xf32>
    %39 = vector.broadcast %cst_40 : f32 to vector<320x128xf32>
    %40 = arith.select %37, %38, %39 : vector<320x128xi1>, vector<320x128xf32>
    %c0_41 = arith.constant 0 : index
    %c0_42 = arith.constant 0 : index
    %41 = vector.load %arg6[%c0_41, %c0_42] : memref<320x128xf32, #tpu.memory_space<vmem>>, vector<320x128xf32>
    tpu.vector_store %arg6[%c0_41, %c0_42], %40 {strides = array<i32>} : memref<320x128xf32, #tpu.memory_space<vmem>>, vector<320x128xf32>,
    %cst_43 = arith.constant 0.000000e+00 : f32
    %42 = vector.broadcast %cst_43 : f32 to vector<256x128xf32>
    %c0_44 = arith.constant 0 : index
    %c0_45 = arith.constant 0 : index
    %43 = vector.load %arg6[%c0_44, %c0_45] : memref<320x128xf32, #tpu.memory_space<vmem>>, vector<64x32xf32>
    %c80 = arith.constant 80 : index
    %c0_46 = arith.constant 0 : index
    %44 = vector.load %arg6[%c80, %c0_46] : memref<320x128xf32, #tpu.memory_space<vmem>>, vector<64x32xf32>
    %c160 = arith.constant 160 : index
    %c0_47 = arith.constant 0 : index
    %45 = vector.load %arg6[%c160, %c0_47] : memref<320x128xf32, #tpu.memory_space<vmem>>, vector<64x32xf32>
    %c240 = arith.constant 240 : index
    %c0_48 = arith.constant 0 : index
    %46 = vector.load %arg6[%c240, %c0_48] : memref<320x128xf32, #tpu.memory_space<vmem>>, vector<64x32xf32>
    %47 = tpu.concatenate %43, %44, %45, %46 in 0 : vector<64x32xf32>, vector<64x32xf32>, vector<64x32xf32>, vector<64x32xf32> -> vector<256x32xf32>
    %48 = arith.truncf %47 : vector<256x32xf32> to vector<256x32xbf16>
    %cst_49 = arith.constant dense<0.000000e+00> : vector<256x128xf32>
    %49 = tpu.matmul %48, %10, %cst_49 {dimension_numbers = #tpu.dot_dimension_numbers<[1], [0], [0], [1], [0, 0, 1, 1], [], []>} : vector<256x32xbf16>, vector<32x128xbf16>, vector<256x128xf32> -> vector<256x128xf32>
    %50 = arith.addf %42, %49 : vector<256x128xf32>
    %c80_50 = arith.constant 80 : index
    %c0_51 = arith.constant 0 : index
    %51 = vector.load %arg6[%c80_50, %c0_51] : memref<320x128xf32, #tpu.memory_space<vmem>>, vector<64x32xf32>
    %c1_52 = arith.constant 1 : index
    %c0_53 = arith.constant 0 : index
    %52 = vector.load %arg6[%c1_52, %c0_53] : memref<320x128xf32, #tpu.memory_space<vmem>>, vector<64x32xf32>
    %c240_54 = arith.constant 240 : index
    %c0_55 = arith.constant 0 : index
    %53 = vector.load %arg6[%c240_54, %c0_55] : memref<320x128xf32, #tpu.memory_space<vmem>>, vector<64x32xf32>
    %c161 = arith.constant 161 : index
    %c0_56 = arith.constant 0 : index
    %54 = vector.load %arg6[%c161, %c0_56] : memref<320x128xf32, #tpu.memory_space<vmem>>, vector<64x32xf32>
    %55 = tpu.concatenate %51, %52, %53, %54 in 0 : vector<64x32xf32>, vector<64x32xf32>, vector<64x32xf32>, vector<64x32xf32> -> vector<256x32xf32>
    %56 = arith.truncf %55 : vector<256x32xf32> to vector<256x32xbf16>
    %cst_57 = arith.constant dense<0.000000e+00> : vector<256x128xf32>
    %57 = tpu.matmul %56, %12, %cst_57 {dimension_numbers = #tpu.dot_dimension_numbers<[1], [0], [0], [1], [0, 0, 1, 1], [], []>} : vector<256x32xbf16>, vector<32x128xbf16>, vector<256x128xf32> -> vector<256x128xf32>
    %58 = arith.addf %50, %57 : vector<256x128xf32>
    %c1_58 = arith.constant 1 : index
    %c0_59 = arith.constant 0 : index
    %59 = vector.load %arg6[%c1_58, %c0_59] : memref<320x128xf32, #tpu.memory_space<vmem>>, vector<64x32xf32>
    %c81 = arith.constant 81 : index
    %c0_60 = arith.constant 0 : index
    %60 = vector.load %arg6[%c81, %c0_60] : memref<320x128xf32, #tpu.memory_space<vmem>>, vector<64x32xf32>
    %c161_61 = arith.constant 161 : index
    %c0_62 = arith.constant 0 : index
    %61 = vector.load %arg6[%c161_61, %c0_62] : memref<320x128xf32, #tpu.memory_space<vmem>>, vector<64x32xf32>
    %c241 = arith.constant 241 : index
    %c0_63 = arith.constant 0 : index
    %62 = vector.load %arg6[%c241, %c0_63] : memref<320x128xf32, #tpu.memory_space<vmem>>, vector<64x32xf32>
    %63 = tpu.concatenate %59, %60, %61, %62 in 0 : vector<64x32xf32>, vector<64x32xf32>, vector<64x32xf32>, vector<64x32xf32> -> vector<256x32xf32>
    %64 = arith.truncf %63 : vector<256x32xf32> to vector<256x32xbf16>
    %cst_64 = arith.constant dense<0.000000e+00> : vector<256x128xf32>
    %65 = tpu.matmul %64, %14, %cst_64 {dimension_numbers = #tpu.dot_dimension_numbers<[1], [0], [0], [1], [0, 0, 1, 1], [], []>} : vector<256x32xbf16>, vector<32x128xbf16>, vector<256x128xf32> -> vector<256x128xf32>
    %66 = arith.addf %58, %65 : vector<256x128xf32>
    %c160_65 = arith.constant 160 : index
    %c0_66 = arith.constant 0 : index
    %67 = vector.load %arg6[%c160_65, %c0_66] : memref<320x128xf32, #tpu.memory_space<vmem>>, vector<64x32xf32>
    %c240_67 = arith.constant 240 : index
    %c0_68 = arith.constant 0 : index
    %68 = vector.load %arg6[%c240_67, %c0_68] : memref<320x128xf32, #tpu.memory_space<vmem>>, vector<64x32xf32>
    %c8_69 = arith.constant 8 : index
    %c0_70 = arith.constant 0 : index
    %69 = vector.load %arg6[%c8_69, %c0_70] : memref<320x128xf32, #tpu.memory_space<vmem>>, vector<64x32xf32>
    %c88 = arith.constant 88 : index
    %c0_71 = arith.constant 0 : index
    %70 = vector.load %arg6[%c88, %c0_71] : memref<320x128xf32, #tpu.memory_space<vmem>>, vector<64x32xf32>
    %71 = tpu.concatenate %67, %68, %69, %70 in 0 : vector<64x32xf32>, vector<64x32xf32>, vector<64x32xf32>, vector<64x32xf32> -> vector<256x32xf32>
    %72 = arith.truncf %71 : vector<256x32xf32> to vector<256x32xbf16>
    %cst_72 = arith.constant dense<0.000000e+00> : vector<256x128xf32>
    %73 = tpu.matmul %72, %16, %cst_72 {dimension_numbers = #tpu.dot_dimension_numbers<[1], [0], [0], [1], [0, 0, 1, 1], [], []>} : vector<256x32xbf16>, vector<32x128xbf16>, vector<256x128xf32> -> vector<256x128xf32>
    %74 = arith.addf %66, %73 : vector<256x128xf32>
    %c240_73 = arith.constant 240 : index
    %c0_74 = arith.constant 0 : index
    %75 = vector.load %arg6[%c240_73, %c0_74] : memref<320x128xf32, #tpu.memory_space<vmem>>, vector<64x32xf32>
    %c161_75 = arith.constant 161 : index
    %c0_76 = arith.constant 0 : index
    %76 = vector.load %arg6[%c161_75, %c0_76] : memref<320x128xf32, #tpu.memory_space<vmem>>, vector<64x32xf32>
    %c88_77 = arith.constant 88 : index
    %c0_78 = arith.constant 0 : index
    %77 = vector.load %arg6[%c88_77, %c0_78] : memref<320x128xf32, #tpu.memory_space<vmem>>, vector<64x32xf32>
    %c9 = arith.constant 9 : index
    %c0_79 = arith.constant 0 : index
    %78 = vector.load %arg6[%c9, %c0_79] : memref<320x128xf32, #tpu.memory_space<vmem>>, vector<64x32xf32>
    %79 = tpu.concatenate %75, %76, %77, %78 in 0 : vector<64x32xf32>, vector<64x32xf32>, vector<64x32xf32>, vector<64x32xf32> -> vector<256x32xf32>
    %80 = arith.truncf %79 : vector<256x32xf32> to vector<256x32xbf16>
    %cst_80 = arith.constant dense<0.000000e+00> : vector<256x128xf32>
    %81 = tpu.matmul %80, %18, %cst_80 {dimension_numbers = #tpu.dot_dimension_numbers<[1], [0], [0], [1], [0, 0, 1, 1], [], []>} : vector<256x32xbf16>, vector<32x128xbf16>, vector<256x128xf32> -> vector<256x128xf32>
    %82 = arith.addf %74, %81 : vector<256x128xf32>
    %c161_81 = arith.constant 161 : index
    %c0_82 = arith.constant 0 : index
    %83 = vector.load %arg6[%c161_81, %c0_82] : memref<320x128xf32, #tpu.memory_space<vmem>>, vector<64x32xf32>
    %c241_83 = arith.constant 241 : index
    %c0_84 = arith.constant 0 : index
    %84 = vector.load %arg6[%c241_83, %c0_84] : memref<320x128xf32, #tpu.memory_space<vmem>>, vector<64x32xf32>
    %c9_85 = arith.constant 9 : index
    %c0_86 = arith.constant 0 : index
    %85 = vector.load %arg6[%c9_85, %c0_86] : memref<320x128xf32, #tpu.memory_space<vmem>>, vector<64x32xf32>
    %c89 = arith.constant 89 : index
    %c0_87 = arith.constant 0 : index
    %86 = vector.load %arg6[%c89, %c0_87] : memref<320x128xf32, #tpu.memory_space<vmem>>, vector<64x32xf32>
    %87 = tpu.concatenate %83, %84, %85, %86 in 0 : vector<64x32xf32>, vector<64x32xf32>, vector<64x32xf32>, vector<64x32xf32> -> vector<256x32xf32>
    %88 = arith.truncf %87 : vector<256x32xf32> to vector<256x32xbf16>
    %cst_88 = arith.constant dense<0.000000e+00> : vector<256x128xf32>
    %89 = tpu.matmul %88, %20, %cst_88 {dimension_numbers = #tpu.dot_dimension_numbers<[1], [0], [0], [1], [0, 0, 1, 1], [], []>} : vector<256x32xbf16>, vector<32x128xbf16>, vector<256x128xf32> -> vector<256x128xf32>
    %90 = arith.addf %82, %89 : vector<256x128xf32>
    %c8_89 = arith.constant 8 : index
    %c0_90 = arith.constant 0 : index
    %91 = vector.load %arg6[%c8_89, %c0_90] : memref<320x128xf32, #tpu.memory_space<vmem>>, vector<64x32xf32>
    %c88_91 = arith.constant 88 : index
    %c0_92 = arith.constant 0 : index
    %92 = vector.load %arg6[%c88_91, %c0_92] : memref<320x128xf32, #tpu.memory_space<vmem>>, vector<64x32xf32>
    %c168 = arith.constant 168 : index
    %c0_93 = arith.constant 0 : index
    %93 = vector.load %arg6[%c168, %c0_93] : memref<320x128xf32, #tpu.memory_space<vmem>>, vector<64x32xf32>
    %c248 = arith.constant 248 : index
    %c0_94 = arith.constant 0 : index
    %94 = vector.load %arg6[%c248, %c0_94] : memref<320x128xf32, #tpu.memory_space<vmem>>, vector<64x32xf32>
    %95 = tpu.concatenate %91, %92, %93, %94 in 0 : vector<64x32xf32>, vector<64x32xf32>, vector<64x32xf32>, vector<64x32xf32> -> vector<256x32xf32>
    %96 = arith.truncf %95 : vector<256x32xf32> to vector<256x32xbf16>
    %cst_95 = arith.constant dense<0.000000e+00> : vector<256x128xf32>
    %97 = tpu.matmul %96, %22, %cst_95 {dimension_numbers = #tpu.dot_dimension_numbers<[1], [0], [0], [1], [0, 0, 1, 1], [], []>} : vector<256x32xbf16>, vector<32x128xbf16>, vector<256x128xf32> -> vector<256x128xf32>
    %98 = arith.addf %90, %97 : vector<256x128xf32>
    %c88_96 = arith.constant 88 : index
    %c0_97 = arith.constant 0 : index
    %99 = vector.load %arg6[%c88_96, %c0_97] : memref<320x128xf32, #tpu.memory_space<vmem>>, vector<64x32xf32>
    %c9_98 = arith.constant 9 : index
    %c0_99 = arith.constant 0 : index
    %100 = vector.load %arg6[%c9_98, %c0_99] : memref<320x128xf32, #tpu.memory_space<vmem>>, vector<64x32xf32>
    %c248_100 = arith.constant 248 : index
    %c0_101 = arith.constant 0 : index
    %101 = vector.load %arg6[%c248_100, %c0_101] : memref<320x128xf32, #tpu.memory_space<vmem>>, vector<64x32xf32>
    %c169 = arith.constant 169 : index
    %c0_102 = arith.constant 0 : index
    %102 = vector.load %arg6[%c169, %c0_102] : memref<320x128xf32, #tpu.memory_space<vmem>>, vector<64x32xf32>
    %103 = tpu.concatenate %99, %100, %101, %102 in 0 : vector<64x32xf32>, vector<64x32xf32>, vector<64x32xf32>, vector<64x32xf32> -> vector<256x32xf32>
    %104 = arith.truncf %103 : vector<256x32xf32> to vector<256x32xbf16>
    %cst_103 = arith.constant dense<0.000000e+00> : vector<256x128xf32>
    %105 = tpu.matmul %104, %24, %cst_103 {dimension_numbers = #tpu.dot_dimension_numbers<[1], [0], [0], [1], [0, 0, 1, 1], [], []>} : vector<256x32xbf16>, vector<32x128xbf16>, vector<256x128xf32> -> vector<256x128xf32>
    %106 = arith.addf %98, %105 : vector<256x128xf32>
    %c9_104 = arith.constant 9 : index
    %c0_105 = arith.constant 0 : index
    %107 = vector.load %arg6[%c9_104, %c0_105] : memref<320x128xf32, #tpu.memory_space<vmem>>, vector<64x32xf32>
    %c89_106 = arith.constant 89 : index
    %c0_107 = arith.constant 0 : index
    %108 = vector.load %arg6[%c89_106, %c0_107] : memref<320x128xf32, #tpu.memory_space<vmem>>, vector<64x32xf32>
    %c169_108 = arith.constant 169 : index
    %c0_109 = arith.constant 0 : index
    %109 = vector.load %arg6[%c169_108, %c0_109] : memref<320x128xf32, #tpu.memory_space<vmem>>, vector<64x32xf32>
    %c249 = arith.constant 249 : index
    %c0_110 = arith.constant 0 : index
    %110 = vector.load %arg6[%c249, %c0_110] : memref<320x128xf32, #tpu.memory_space<vmem>>, vector<64x32xf32>
    %111 = tpu.concatenate %107, %108, %109, %110 in 0 : vector<64x32xf32>, vector<64x32xf32>, vector<64x32xf32>, vector<64x32xf32> -> vector<256x32xf32>
    %112 = arith.truncf %111 : vector<256x32xf32> to vector<256x32xbf16>
    %cst_111 = arith.constant dense<0.000000e+00> : vector<256x128xf32>
    %113 = tpu.matmul %112, %26, %cst_111 {dimension_numbers = #tpu.dot_dimension_numbers<[1], [0], [0], [1], [0, 0, 1, 1], [], []>} : vector<256x32xbf16>, vector<32x128xbf16>, vector<256x128xf32> -> vector<256x128xf32>
    %114 = arith.addf %106, %113 : vector<256x128xf32>
    %115 = vector.extract_strided_slice %114 {offsets = [0, 0], sizes = [64, 128], strides = [1, 1]} : vector<256x128xf32> to vector<64x128xf32>
    %116 = vector.extract_strided_slice %114 {offsets = [64, 0], sizes = [64, 128], strides = [1, 1]} : vector<256x128xf32> to vector<64x128xf32>
    %117 = arith.maximumf %115, %116 : vector<64x128xf32>
    %118 = vector.extract_strided_slice %114 {offsets = [128, 0], sizes = [64, 128], strides = [1, 1]} : vector<256x128xf32> to vector<64x128xf32>
    %119 = vector.extract_strided_slice %114 {offsets = [192, 0], sizes = [64, 128], strides = [1, 1]} : vector<256x128xf32> to vector<64x128xf32>
    %120 = arith.maximumf %118, %119 : vector<64x128xf32>
    %121 = arith.maximumf %117, %120 : vector<64x128xf32>
    %122 = vector.broadcast %0 : vector<1x128xf32> to vector<64x128xf32>
    %123 = arith.cmpf oge, %121, %122 : vector<64x128xf32>
    %cst_112 = arith.constant 1.000000e+00 : f32
    %cst_113 = arith.constant 0.000000e+00 : f32
    %124 = vector.broadcast %cst_112 : f32 to vector<64x128xf32>
    %125 = vector.broadcast %cst_113 : f32 to vector<64x128xf32>
    %126 = arith.select %123, %124, %125 : vector<64x128xi1>, vector<64x128xf32>
    %127 = arith.truncf %126 : vector<64x128xf32> to vector<64x128xbf16>
    %c0_114 = arith.constant 0 : index
    %c0_115 = arith.constant 0 : index
    %c0_116 = arith.constant 0 : index
    %128 = vector.load %arg5[%c0_114, %c0_115, %c0_116] : memref<1x64x128xbf16, #tpu.memory_space<vmem>>, vector<1x64x128xbf16>
    %129 = vector.shape_cast %128 : vector<1x64x128xbf16> to vector<64x128xbf16>
    %130 = vector.shape_cast %127 : vector<64x128xbf16> to vector<1x64x128xbf16>
    tpu.vector_store %arg5[%c0_114, %c0_115, %c0_116], %130 {strides = array<i32>} : memref<1x64x128xbf16, #tpu.memory_space<vmem>>, vector<1x64x128xbf16>,
    return
  }
  func.func @transform_0(%arg0: i32) -> (i32, i32, i32) {
    %c0_i32 = arith.constant 0 : i32
    %c0_i32_0 = arith.constant 0 : i32
    %c0_i32_1 = arith.constant 0 : i32
    return %arg0, %c0_i32, %c0_i32_0 : i32, i32, i32
  }
  func.func @transform_1(%arg0: i32) -> (i32, i32, i32) {
    %c0_i32 = arith.constant 0 : i32
    %c0_i32_0 = arith.constant 0 : i32
    %c0_i32_1 = arith.constant 0 : i32
    %c0_i32_2 = arith.constant 0 : i32
    return %c0_i32, %c0_i32_0, %c0_i32_1 : i32, i32, i32
  }
  func.func @transform_2(%arg0: i32) -> (i32, i32, i32) {
    %c0_i32 = arith.constant 0 : i32
    %c0_i32_0 = arith.constant 0 : i32
    %c0_i32_1 = arith.constant 0 : i32
    %c0_i32_2 = arith.constant 0 : i32
    return %c0_i32, %c0_i32_0, %c0_i32_1 : i32, i32, i32
  }
  func.func @transform_3(%arg0: i32) -> (i32, i32) {
    %c0_i32 = arith.constant 0 : i32
    %c0_i32_0 = arith.constant 0 : i32
    %c0_i32_1 = arith.constant 0 : i32
    return %c0_i32, %c0_i32_0 : i32, i32
  }
  func.func @transform_4(%arg0: i32) -> (i32, i32, i32) {
    %c0_i32 = arith.constant 0 : i32
    %c0_i32_0 = arith.constant 0 : i32
    %c0_i32_1 = arith.constant 0 : i32
    return %arg0, %c0_i32, %c0_i32_0 : i32, i32, i32
  }
}

module attributes {stable_mosaic.version = 11 : i64} {
  func.func @linear_kernel(%arg0: memref<2x3136xbf16, #tpu.memory_space<vmem>>, %arg1: memref<3136x10xbf16, #tpu.memory_space<vmem>>, %arg2: memref<2x10xf32, #tpu.memory_space<vmem>>) attributes {dimension_semantics = [], scalar_prefetch = 0 : i64, scratch_operands = 0 : i64, tpu.core_type = #tpu.core_type<tc>} {
    %c0 = arith.constant 0 : index
    %c0_0 = arith.constant 0 : index
    %0 = vector.load %arg0[%c0, %c0_0] : memref<2x3136xbf16, #tpu.memory_space<vmem>>, vector<2x3136xbf16>
    %c0_1 = arith.constant 0 : index
    %c0_2 = arith.constant 0 : index
    %1 = vector.load %arg1[%c0_1, %c0_2] : memref<3136x10xbf16, #tpu.memory_space<vmem>>, vector<3136x10xbf16>
    %cst = arith.constant dense<0.000000e+00> : vector<2x10xf32>
    %2 = tpu.matmul %0, %1, %cst {dimension_numbers = #tpu.dot_dimension_numbers<[1], [0], [0], [1], [0, 0, 1, 1], [], []>} : vector<2x3136xbf16>, vector<3136x10xbf16>, vector<2x10xf32> -> vector<2x10xf32>
    %c0_3 = arith.constant 0 : index
    %c0_4 = arith.constant 0 : index
    %3 = vector.load %arg2[%c0_3, %c0_4] : memref<2x10xf32, #tpu.memory_space<vmem>>, vector<2x10xf32>
    tpu.vector_store %arg2[%c0_3, %c0_4], %2 {strides = array<i32>} : memref<2x10xf32, #tpu.memory_space<vmem>>, vector<2x10xf32>,
    return
  }
}

</mosaic_0001>

<bundles_post_ra>
// kernel: snn_stdp_forward.3
= control target key start
LH: loop header
LB: loop body
LE: loop exit
PB: predicated region body
PF: predicated region fallthrough
CT: control target
= control target key end

     0   :  { %v417_v29 = vlaneseq  ;;  %v3020_v35 = vmov 1966171168   ;;  %s3687_s0 = inlined_call_operand.vmem [shape: bf16[2,3136], index: 0, kind: input, shape index: {}]   ;;  %s3688_s1 = inlined_call_operand.vmem [shape: bf16[3136,10], index: 1, kind: input, shape index: {}]   ;;  %s3689_s2 = inlined_call_operand.hbm [shape: f32[2,10], index: 2, kind: output, shape index: {}]  }
   0x1   :  { %v2797_v0 = vld [vmem:[%s3688_s1 + $0x40] sm:$0xff]   ;;  %v2801_v4 = vld [vmem:[%s3688_s1 + $0x48] sm:$0xff]   ;;  %v2805_v8 = vld [vmem:[%s3688_s1 + $0x50] sm:$0xff]   ;;  %v415_v36 = vunpack.c.l.s4 %v3020_v35 }
   0x2   :  { %v2798_v1 = vld [vmem:[%s3688_s1 + $0xc0] sm:$0xff]   ;;  %2512 = vmatprep.subr.bf16.mxu0 %v2797_v0  ;;  %v2802_v5 = vld [vmem:[%s3688_s1 + $0xc8] sm:$0xff]   ;;  %v2806_v9 = vld [vmem:[%s3688_s1 + $0xd0] sm:$0xff]   ;;  %v418_v33 = vshrl.u32 %v417_v29, 7 }
   0x3   :  { %v2799_v2 = vld [vmem:[%s3688_s1] sm:$0xff]   ;;  %2534 = vmatprep.subr.bf16.mxu1 %v2798_v1  ;;  %v2803_v6 = vld [vmem:[%s3688_s1 + $0x8] sm:$0xff]   ;;  %v2807_v10 = vld [vmem:[%s3688_s1 + $0x10] sm:$0xff]   ;;  %v416_v39 = vunpack.c.0.s8 %v415_v36 }
   0x4   :  { %v2800_v3 = vld [vmem:[%s3688_s1 + $0x80] sm:$0xff]   ;;  %2513 = vmatpush3.bf16.msra.mxu0 %v2799_v2  ;;  %v2804_v7 = vld [vmem:[%s3688_s1 + $0x88] sm:$0xff]   ;;  %v2808_v11 = vld [vmem:[%s3688_s1 + $0x90] sm:$0xff]  }
   0x5   :  { %2535 = vmatpush3.bf16.msra.mxu1 %v2800_v3  ;;  %2514 = vmatprep.subr.bf16.mxu0 %v2801_v4  ;;  %v2809_v12 = vld [vmem:[%s3688_s1 + $0x58] sm:$0xff]   ;;  %v2813_v16 = vld [vmem:[%s3688_s1 + $0x60] sm:$0xff]   ;;  %v2817_v20 = vld [vmem:[%s3688_s1 + $0x68] sm:$0xff]   ;;  %v3144_v41 = vsub.s32 %v416_v39, %v418_v33 }
   0x6   :  { %2536 = vmatprep.subr.bf16.mxu1 %v2802_v5  ;;  %v2810_v13 = vld [vmem:[%s3688_s1 + $0xd8] sm:$0xff]   ;;  %v2814_v17 = vld [vmem:[%s3688_s1 + $0xe0] sm:$0xff]   ;;  %v2818_v21 = vld [vmem:[%s3688_s1 + $0xe8] sm:$0xff]  }
   0x7   :  { %v2811_v14 = vld [vmem:[%s3688_s1 + $0x18] sm:$0xff]   ;;  %v2815_v18 = vld [vmem:[%s3688_s1 + $0x20] sm:$0xff]   ;;  %v2819_v22 = vld [vmem:[%s3688_s1 + $0x28] sm:$0xff]  }
   0x8   :  { %2515 = vmatpush3.bf16.msra.mxu0 %v2803_v6  ;;  %v2812_v15 = vld [vmem:[%s3688_s1 + $0x98] sm:$0xff]   ;;  %v2816_v19 = vld [vmem:[%s3688_s1 + $0xa0] sm:$0xff]   ;;  %v2820_v23 = vld [vmem:[%s3688_s1 + $0xa8] sm:$0xff]  }
   0x9   :  { %2537 = vmatpush3.bf16.msra.mxu1 %v2804_v7  ;;  %2516 = vmatprep.subr.bf16.mxu0 %v2805_v8  ;;  %v2821_v24 = vld [vmem:[%s3688_s1 + $0x70] sm:$0xff]   ;;  %v2825_v28 = vld [vmem:[%s3688_s1 + $0x78] sm:$0xff]   ;;  %v2830_v34 = vld [vmem:[%s3688_s1 + $0x140] sm:$0xff]  }
   0xa   :  { %2538 = vmatprep.subr.bf16.mxu1 %v2806_v9  ;;  %v2822_v25 = vld [vmem:[%s3688_s1 + $0xf0] sm:$0xff]   ;;  %v2826_v30 = vld [vmem:[%s3688_s1 + $0xf8] sm:$0xff]   ;;  %v13_v37 = vld [vmem:[%s3687_s0] sm:$0xff] }
   0xb   :  { %v2823_v26 = vld [vmem:[%s3688_s1 + $0x30] sm:$0xff]   ;;  %v2827_v31 = vld [vmem:[%s3688_s1 + $0x38] sm:$0xff]   ;;  %v413_v38 = vcombine.high %v13_v37, %v13_v37  ;;  %v2832_v40 = vld [vmem:[%s3688_s1 + $0x1c0] sm:$0xff]   ;;  %v420_v42 = vrot.slane %v13_v37, %v3144_v41 }
   0xc   :  { %2517 = vmatpush3.bf16.msra.mxu0 %v2807_v10  ;;  %v2824_v27 = vld [vmem:[%s3688_s1 + $0xb0] sm:$0xff]   ;;  %v2828_v32 = vld [vmem:[%s3688_s1 + $0xb8] sm:$0xff]   ;;  %v2831_v48 = vld [vmem:[%s3688_s1 + $0x100] sm:$0xff]  }
   0xd   :  { %2539 = vmatpush3.bf16.msra.mxu1 %v2808_v11  ;;  %2518 = vmatprep.subr.bf16.mxu0 %v2809_v12  ;;  %v3148_v43 = vrot.slane %v413_v38, %v3144_v41  ;;  %v428_v44 = vcombine.high %v420_v42, %v420_v42  ;;  %v436_v45 = vrot.slane %v420_v42, %v3144_v41  ;;  %v2834_v51 = vld [vmem:[%s3688_s1 + $0x148] sm:$0xff]   ;;  %v2833_v53 = vld [vmem:[%s3688_s1 + $0x180] sm:$0xff]   ;;  %v2838_v57 = vld [vmem:[%s3688_s1 + $0x150] sm:$0xff]  }
   0xe   :  { %2540 = vmatprep.subr.bf16.mxu1 %v2810_v13  ;;  %v2836_v54 = vld [vmem:[%s3688_s1 + $0x1c8] sm:$0xff]   ;;  %v2840_v59 = vld [vmem:[%s3688_s1 + $0x1d0] sm:$0xff]   ;;  %v2842_v61 = vld [vmem:[%s3688_s1 + $0x158] sm:$0xff]  }
   0xf   :  { %v429_v46 = vcombine.high %v3148_v43, %v3148_v43  ;;  %v450_v47 = vrot.slane %v428_v44, %v3144_v41  ;;  %v458_v50 = vcombine.high %v436_v45, %v436_v45  ;;  %v2835_v56 = vld [vmem:[%s3688_s1 + $0x108] sm:$0xff]   ;;  %v2839_v60 = vld [vmem:[%s3688_s1 + $0x110] sm:$0xff]   ;;  %v2844_v63 = vld [vmem:[%s3688_s1 + $0x1d8] sm:$0xff]  }
  0x10   :  { %2519 = vmatpush3.bf16.msra.mxu0 %v2811_v14  ;;  %v2837_v58 = vld [vmem:[%s3688_s1 + $0x188] sm:$0xff]   ;;  %v2841_v62 = vld [vmem:[%s3688_s1 + $0x190] sm:$0xff]   ;;  %v2843_v0 = vld [vmem:[%s3688_s1 + $0x118] sm:$0xff]  }
  0x11   :  { %2541 = vmatpush3.bf16.msra.mxu1 %v2812_v15  ;;  %2520 = vmatprep.subr.bf16.mxu0 %v2813_v16  ;;  %v457_v49 = vrot.slane %v429_v46, %v3144_v41  ;;  %v460_v52 = vcombine.high %v450_v47, %v450_v47  ;;  %v2846_v1 = vld [vmem:[%s3688_s1 + $0x160] sm:$0xff]   ;;  %v2845_v2 = vld [vmem:[%s3688_s1 + $0x198] sm:$0xff]   ;;  %v2850_v5 = vld [vmem:[%s3688_s1 + $0x168] sm:$0xff]  }
  0x12   :  { %2542 = vmatprep.subr.bf16.mxu1 %v2814_v17  ;;  %1810 = vmatprep.mubr.bf16.mxu0 %v450_v47  ;;  %v2848_v3 = vld [vmem:[%s3688_s1 + $0x1e0] sm:$0xff]   ;;  %v2852_v7 = vld [vmem:[%s3688_s1 + $0x1e8] sm:$0xff]   ;;  %v2854_v9 = vld [vmem:[%s3688_s1 + $0x170] sm:$0xff]   ;;  %v443_v17 = vrot.slane %v3148_v43, %v3144_v41 }
  0x13   :  { %v461_v55 = vcombine.high %v457_v49, %v457_v49  ;;  %1850 = vmatprep.mubr.bf16.mxu1 %v460_v52  ;;  %v2847_v4 = vld [vmem:[%s3688_s1 + $0x120] sm:$0xff]   ;;  %v2851_v8 = vld [vmem:[%s3688_s1 + $0x128] sm:$0xff]   ;;  %v2856_v11 = vld [vmem:[%s3688_s1 + $0x1f0] sm:$0xff]  }
  0x14   :  { %2521 = vmatpush3.bf16.msra.mxu0 %v2815_v18  ;;  %v2849_v6 = vld [vmem:[%s3688_s1 + $0x1a0] sm:$0xff]   ;;  %v2853_v10 = vld [vmem:[%s3688_s1 + $0x1a8] sm:$0xff]   ;;  %v2855_v12 = vld [vmem:[%s3688_s1 + $0x130] sm:$0xff]  }
  0x15   :  { %2543 = vmatpush3.bf16.msra.mxu1 %v2816_v19  ;;  %2522 = vmatprep.subr.bf16.mxu0 %v2817_v20  ;;  %v2858_v13 = vld [vmem:[%s3688_s1 + $0x178] sm:$0xff]   ;;  %v2857_v14 = vld [vmem:[%s3688_s1 + $0x1b0] sm:$0xff]   ;;  %v2862_v18 = vld [vmem:[%s3688_s1 + $0x240] sm:$0xff]  }
  0x16   :  { %2544 = vmatprep.subr.bf16.mxu1 %v2818_v21  ;;  %v2860_v15 = vld [vmem:[%s3688_s1 + $0x1f8] sm:$0xff]   ;;  %v2864_v20 = vld [vmem:[%s3688_s1 + $0x2c0] sm:$0xff]   ;;  %v2872_v29 = vld [vmem:[%s3688_s1 + $0x2d0] sm:$0xff]  }
  0x17   :  { %v2859_v16 = vld [vmem:[%s3688_s1 + $0x138] sm:$0xff]   ;;  %v2863_v21 = vld [vmem:[%s3688_s1 + $0x200] sm:$0xff]   ;;  %v2882_v39 = vld [vmem:[%s3688_s1 + $0x268] sm:$0xff]  }
  0x18   :  { %2523 = vmatpush3.bf16.msra.mxu0 %v2819_v22  ;;  %v2861_v19 = vld [vmem:[%s3688_s1 + $0x1b8] sm:$0xff]   ;;  %v459_v22 = vcombine.high %v443_v17, %v443_v17  ;;  %v2878_v35 = vld [vmem:[%s3688_s1 + $0x260] sm:$0xff]   ;;  %v2884_v42 = vld [vmem:[%s3688_s1 + $0x2e8] sm:$0xff]  }
  0x19   :  { %2545 = vmatpush3.bf16.msra.mxu1 %v2820_v23  ;;  %2524 = vmatprep.subr.bf16.mxu0 %v2821_v24  ;;  %v2866_v23 = vld [vmem:[%s3688_s1 + $0x248] sm:$0xff]   ;;  %v2865_v24 = vld [vmem:[%s3688_s1 + $0x280] sm:$0xff]   ;;  %v2876_v33 = vld [vmem:[%s3688_s1 + $0x2d8] sm:$0xff]  }
  0x1a   :  { %2546 = vmatprep.subr.bf16.mxu1 %v2822_v25  ;;  %v2868_v25 = vld [vmem:[%s3688_s1 + $0x2c8] sm:$0xff]   ;;  %v2877_v36 = vld [vmem:[%s3688_s1 + $0x298] sm:$0xff]   ;;  %v2880_v37 = vld [vmem:[%s3688_s1 + $0x2e0] sm:$0xff]  }
  0x1b   :  { %v2879_v38 = vld [vmem:[%s3688_s1 + $0x220] sm:$0xff]   ;;  %v2883_v43 = vld [vmem:[%s3688_s1 + $0x228] sm:$0xff]   ;;  %v2887_v52 = vld [vmem:[%s3688_s1 + $0x230] sm:$0xff]  }
  0x1c   :  { %2525 = vmatpush3.bf16.msra.mxu0 %v2823_v26  ;;  %v2867_v26 = vld [vmem:[%s3688_s1 + $0x208] sm:$0xff]  }
  0x1d   :  { %2547 = vmatpush3.bf16.msra.mxu1 %v2824_v27  ;;  %2526 = vmatprep.subr.bf16.mxu0 %v2825_v28  ;;  %v2870_v27 = vld [vmem:[%s3688_s1 + $0x250] sm:$0xff]   ;;  %v2869_v28 = vld [vmem:[%s3688_s1 + $0x288] sm:$0xff]  }
  0x1e   :  { %2548 = vmatprep.subr.bf16.mxu1 %v2826_v30  ;;  %v2871_v30 = vld [vmem:[%s3688_s1 + $0x210] sm:$0xff]   ;;  %v14_v44 = vld [vmem:[%s3687_s0 + $0x8] sm:$0xff] }
  0x1f   :  { %v469_v46 = vrot.slane %v14_v44, %v3144_v41  ;;  %v462_v47 = vcombine.high %v14_v44, %v14_v44  ;;  %v2934_v44 = vld [vmem:[%s3688_s1 + $0x488] sm:$0xff]  }
  0x20   :  { %2527 = vmatpush3.bf16.msra.mxu0 %v2827_v31  ;;  %v2874_v31 = vld [vmem:[%s3688_s1 + $0x258] sm:$0xff]  }
  0x21   :  { %2549 = vmatpush3.bf16.msra.mxu1 %v2828_v32  ;;  %2556 = vmatprep.subr.bf16.mxu0 %v2830_v34  ;;  %v2873_v32 = vld [vmem:[%s3688_s1 + $0x290] sm:$0xff]   ;;  %v2875_v34 = vld [vmem:[%s3688_s1 + $0x218] sm:$0xff]  }
  0x22   :  { %2578 = vmatprep.subr.bf16.mxu1 %v2832_v40  ;;  %v2881_v40 = vld [vmem:[%s3688_s1 + $0x2a0] sm:$0xff]  }
  0x23   :  { %1811 = vmatmul.mubr.bf16.vlgmr.msra.gmra.mrb[0].mxu0 %v436_v45  ;;  %v2886_v45 = vld [vmem:[%s3688_s1 + $0x270] sm:$0xff]  }
  0x24   :  { %2557 = vmatpush3.bf16.msra.mxu0 %v2831_v48  ;;  %1851 = vmatmul.mubr.bf16.vlgmr.msra.gmra.mrb[0].mxu1 %v458_v50  ;;  %v2885_v48 = vld [vmem:[%s3688_s1 + $0x2a8] sm:$0xff]   ;;  %v477_v50 = vcombine.high %v469_v46, %v469_v46 }
  0x25   :  { %2558 = vmatprep.subr.bf16.mxu0 %v2834_v51  ;;  %2579 = vmatpush3.bf16.msra.mxu1 %v2833_v53  ;;  %v3330_v51 = vrot.slane %v462_v47, %v3144_v41  ;;  %v2890_v53 = vld [vmem:[%s3688_s1 + $0x278] sm:$0xff]  }
  0x26   :  { %1890 = vmatprep.mubr.bf16.mxu0 %v457_v49  ;;  %2580 = vmatprep.subr.bf16.mxu1 %v2836_v54  ;;  %v2888_v49 = vld [vmem:[%s3688_s1 + $0x2f0] sm:$0xff]   ;;  %v499_v54 = vrot.slane %v477_v50, %v3144_v41  ;;  %v2939_v47 = vld [vmem:[%s3688_s1 + $0x458] sm:$0xff]  }
  0x27   :  { %1930 = vmatprep.mubr.bf16.mxu1 %v461_v55  ;;  %v2889_v55 = vld [vmem:[%s3688_s1 + $0x2b0] sm:$0xff]   ;;  %v2940_v50 = vld [vmem:[%s3688_s1 + $0x418] sm:$0xff]  }
  0x28   :  { %2559 = vmatpush3.bf16.msra.mxu0 %v2835_v56  ;;  %v478_v56 = vcombine.high %v3330_v51, %v3330_v51 }
  0x29   :  { %2560 = vmatprep.subr.bf16.mxu0 %v2838_v57  ;;  %2581 = vmatpush3.bf16.msra.mxu1 %v2837_v58  ;;  %v2892_v57 = vld [vmem:[%s3688_s1 + $0x2f8] sm:$0xff]   ;;  %v509_v58 = vcombine.high %v499_v54, %v499_v54 }
  0x2a   :  { %2582 = vmatprep.subr.bf16.mxu1 %v2840_v59  ;;  %v2891_v59 = vld [vmem:[%s3688_s1 + $0x238] sm:$0xff]  }
  0x2c   :  { %2561 = vmatpush3.bf16.msra.mxu0 %v2839_v60  ;;  %v485_v60 = vrot.slane %v469_v46, %v3144_v41  ;;  %v2936_v46 = vld [vmem:[%s3688_s1 + $0x410] sm:$0xff]  }
  0x2d   :  { %2562 = vmatprep.subr.bf16.mxu0 %v2842_v61  ;;  %2583 = vmatpush3.bf16.msra.mxu1 %v2841_v62  ;;  %v2894_v61 = vld [vmem:[%s3688_s1 + $0x340] sm:$0xff]   ;;  %v2893_v62 = vld [vmem:[%s3688_s1 + $0x2b8] sm:$0xff]  }
  0x2e   :  { %2584 = vmatprep.subr.bf16.mxu1 %v2844_v63  ;;  %v506_v63 = vrot.slane %v478_v56, %v3144_v41  ;;  %v2946_v56 = vld [vmem:[%s3688_s1 + $0x4a0] sm:$0xff]  }
  0x30   :  { %2563 = vmatpush3.bf16.msra.mxu0 %v2843_v0  ;;  %v2896_v0 = vld [vmem:[%s3688_s1 + $0x3c0] sm:$0xff]  }
  0x31   :  { %2564 = vmatprep.subr.bf16.mxu0 %v2846_v1  ;;  %2585 = vmatpush3.bf16.msra.mxu1 %v2845_v2  ;;  %v2895_v1 = vld [vmem:[%s3688_s1 + $0x300] sm:$0xff]   ;;  %v507_v2 = vcombine.high %v485_v60, %v485_v60 }
  0x32   :  { %2586 = vmatprep.subr.bf16.mxu1 %v2848_v3  ;;  %v2898_v3 = vld [vmem:[%s3688_s1 + $0x348] sm:$0xff]  }
  0x34   :  { %2565 = vmatpush3.bf16.msra.mxu0 %v2847_v4  ;;  %v2897_v4 = vld [vmem:[%s3688_s1 + $0x380] sm:$0xff]  }
  0x35   :  { %2566 = vmatprep.subr.bf16.mxu0 %v2850_v5  ;;  %2587 = vmatpush3.bf16.msra.mxu1 %v2849_v6  ;;  %v510_v5 = vcombine.high %v506_v63, %v506_v63  ;;  %v2900_v6 = vld [vmem:[%s3688_s1 + $0x3c8] sm:$0xff]  }
  0x36   :  { %2588 = vmatprep.subr.bf16.mxu1 %v2852_v7  ;;  %v2899_v7 = vld [vmem:[%s3688_s1 + $0x308] sm:$0xff]  }
  0x38   :  { %2567 = vmatpush3.bf16.msra.mxu0 %v2851_v8  ;;  %v2902_v8 = vld [vmem:[%s3688_s1 + $0x350] sm:$0xff]  }
  0x39   :  { %2568 = vmatprep.subr.bf16.mxu0 %v2854_v9  ;;  %2589 = vmatpush3.bf16.msra.mxu1 %v2853_v10  ;;  %v2901_v9 = vld [vmem:[%s3688_s1 + $0x388] sm:$0xff]   ;;  %v2904_v10 = vld [vmem:[%s3688_s1 + $0x3d0] sm:$0xff]  }
  0x3a   :  { %2590 = vmatprep.subr.bf16.mxu1 %v2856_v11  ;;  %v2903_v11 = vld [vmem:[%s3688_s1 + $0x310] sm:$0xff]  }
  0x3c   :  { %2569 = vmatpush3.bf16.msra.mxu0 %v2855_v12  ;;  %v2906_v12 = vld [vmem:[%s3688_s1 + $0x358] sm:$0xff]  }
  0x3d   :  { %2570 = vmatprep.subr.bf16.mxu0 %v2858_v13  ;;  %2591 = vmatpush3.bf16.msra.mxu1 %v2857_v14  ;;  %v2905_v13 = vld [vmem:[%s3688_s1 + $0x390] sm:$0xff]   ;;  %v2908_v14 = vld [vmem:[%s3688_s1 + $0x3d8] sm:$0xff]  }
  0x3e   :  { %2592 = vmatprep.subr.bf16.mxu1 %v2860_v15  ;;  %v2907_v15 = vld [vmem:[%s3688_s1 + $0x318] sm:$0xff]  }
  0x40   :  { %2571 = vmatpush3.bf16.msra.mxu0 %v2859_v16  ;;  %v2910_v16 = vld [vmem:[%s3688_s1 + $0x360] sm:$0xff]  }
  0x41   :  { %2600 = vmatprep.subr.bf16.mxu0 %v2862_v18  ;;  %2593 = vmatpush3.bf16.msra.mxu1 %v2861_v19  ;;  %v2912_v18 = vld [vmem:[%s3688_s1 + $0x3e0] sm:$0xff]  }
  0x42   :  { %2622 = vmatprep.subr.bf16.mxu1 %v2864_v20  ;;  %v2911_v19 = vld [vmem:[%s3688_s1 + $0x320] sm:$0xff]   ;;  %v2914_v20 = vld [vmem:[%s3688_s1 + $0x368] sm:$0xff]  }
  0x43   :  { %1891 = vmatmul.mubr.bf16.vlgmr.msra.gmra.mrb[4].mxu0 %v443_v17  ;;  %v2909_v17 = vld [vmem:[%s3688_s1 + $0x398] sm:$0xff]  }
  0x44   :  { %2601 = vmatpush3.bf16.msra.mxu0 %v2863_v21  ;;  %1931 = vmatmul.mubr.bf16.vlgmr.msra.gmra.mrb[4].mxu1 %v459_v22  ;;  %v2913_v21 = vld [vmem:[%s3688_s1 + $0x3a0] sm:$0xff]   ;;  %v2916_v22 = vld [vmem:[%s3688_s1 + $0x3e8] sm:$0xff]  }
  0x45   :  { %2602 = vmatprep.subr.bf16.mxu0 %v2866_v23  ;;  %2623 = vmatpush3.bf16.msra.mxu1 %v2865_v24  ;;  %v2915_v23 = vld [vmem:[%s3688_s1 + $0x328] sm:$0xff]   ;;  %v2918_v24 = vld [vmem:[%s3688_s1 + $0x370] sm:$0xff]  }
  0x46   :  { %2624 = vmatprep.subr.bf16.mxu1 %v2868_v25  ;;  %1970 = vmatprep.mubr.bf16.mxu0 %v499_v54  ;;  %v2917_v25 = vld [vmem:[%s3688_s1 + $0x3a8] sm:$0xff]   ;;  %v2944_v54 = vld [vmem:[%s3688_s1 + $0x420] sm:$0xff]  }
  0x47   :  { %2010 = vmatprep.mubr.bf16.mxu1 %v509_v58  ;;  %v2948_v58 = vld [vmem:[%s3688_s1 + $0x428] sm:$0xff]  }
  0x48   :  { %2603 = vmatpush3.bf16.msra.mxu0 %v2867_v26  ;;  %v2920_v26 = vld [vmem:[%s3688_s1 + $0x3f0] sm:$0xff]  }
  0x49   :  { %2604 = vmatprep.subr.bf16.mxu0 %v2870_v27  ;;  %2625 = vmatpush3.bf16.msra.mxu1 %v2869_v28  ;;  %v2919_v27 = vld [vmem:[%s3688_s1 + $0x330] sm:$0xff]   ;;  %v2922_v28 = vld [vmem:[%s3688_s1 + $0x378] sm:$0xff]  }
  0x4a   :  { %2626 = vmatprep.subr.bf16.mxu1 %v2872_v29  ;;  %v2921_v29 = vld [vmem:[%s3688_s1 + $0x3b0] sm:$0xff]  }
  0x4c   :  { %2605 = vmatpush3.bf16.msra.mxu0 %v2871_v30  ;;  %v2924_v30 = vld [vmem:[%s3688_s1 + $0x3f8] sm:$0xff]  }
  0x4d   :  { %2606 = vmatprep.subr.bf16.mxu0 %v2874_v31  ;;  %2627 = vmatpush3.bf16.msra.mxu1 %v2873_v32  ;;  %v2923_v31 = vld [vmem:[%s3688_s1 + $0x338] sm:$0xff]   ;;  %v492_v32 = vrot.slane %v3330_v51, %v3144_v41  ;;  %v2943_v51 = vld [vmem:[%s3688_s1 + $0x460] sm:$0xff]  }
  0x4e   :  { %2628 = vmatprep.subr.bf16.mxu1 %v2876_v33  ;;  %v2927_v33 = vld [vmem:[%s3688_s1 + $0x440] sm:$0xff]  }
  0x50   :  { %2607 = vmatpush3.bf16.msra.mxu0 %v2875_v34  ;;  %v2926_v34 = vld [vmem:[%s3688_s1 + $0x3b8] sm:$0xff]  }
  0x51   :  { %2608 = vmatprep.subr.bf16.mxu0 %v2878_v35  ;;  %2629 = vmatpush3.bf16.msra.mxu1 %v2877_v36  ;;  %v2929_v35 = vld [vmem:[%s3688_s1 + $0x4c0] sm:$0xff]  }
  0x52   :  { %2630 = vmatprep.subr.bf16.mxu1 %v2880_v37  ;;  %v2928_v36 = vld [vmem:[%s3688_s1 + $0x400] sm:$0xff]   ;;  %v508_v37 = vcombine.high %v492_v32, %v492_v32 }
  0x54   :  { %2609 = vmatpush3.bf16.msra.mxu0 %v2879_v38  ;;  %v2931_v38 = vld [vmem:[%s3688_s1 + $0x448] sm:$0xff]  }
  0x55   :  { %2610 = vmatprep.subr.bf16.mxu0 %v2882_v39  ;;  %2631 = vmatpush3.bf16.msra.mxu1 %v2881_v40  ;;  %v2930_v39 = vld [vmem:[%s3688_s1 + $0x480] sm:$0xff]   ;;  %v2933_v40 = vld [vmem:[%s3688_s1 + $0x4c8] sm:$0xff]  }
  0x56   :  { %2632 = vmatprep.subr.bf16.mxu1 %v2884_v42  ;;  %v2932_v42 = vld [vmem:[%s3688_s1 + $0x408] sm:$0xff]  }
  0x58   :  { %2611 = vmatpush3.bf16.msra.mxu0 %v2883_v43  ;;  %v2935_v43 = vld [vmem:[%s3688_s1 + $0x450] sm:$0xff]  }
  0x59   :  { %2612 = vmatprep.subr.bf16.mxu0 %v2886_v45  ;;  %2633 = vmatpush3.bf16.msra.mxu1 %v2885_v48  ;;  %v2937_v45 = vld [vmem:[%s3688_s1 + $0x4d0] sm:$0xff]  }
  0x5a   :  { %2634 = vmatprep.subr.bf16.mxu1 %v2888_v49  ;;  %v2938_v48 = vld [vmem:[%s3688_s1 + $0x490] sm:$0xff]   ;;  %v2941_v49 = vld [vmem:[%s3688_s1 + $0x4d8] sm:$0xff]  }
  0x5c   :  { %2613 = vmatpush3.bf16.msra.mxu0 %v2887_v52  ;;  %v2942_v52 = vld [vmem:[%s3688_s1 + $0x498] sm:$0xff]  }
  0x5d   :  { %2614 = vmatprep.subr.bf16.mxu0 %v2890_v53  ;;  %2635 = vmatpush3.bf16.msra.mxu1 %v2889_v55  ;;  %v2945_v53 = vld [vmem:[%s3688_s1 + $0x4e0] sm:$0xff]   ;;  %v2947_v55 = vld [vmem:[%s3688_s1 + $0x468] sm:$0xff]  }
  0x5e   :  { %2636 = vmatprep.subr.bf16.mxu1 %v2892_v57  ;;  %v2949_v57 = vld [vmem:[%s3688_s1 + $0x4e8] sm:$0xff]  }
  0x60   :  { %2615 = vmatpush3.bf16.msra.mxu0 %v2891_v59  ;;  %v15_v59 = vld [vmem:[%s3687_s0 + $0x10] sm:$0xff] }
  0x61   :  { %2644 = vmatprep.subr.bf16.mxu0 %v2894_v61  ;;  %2637 = vmatpush3.bf16.msra.mxu1 %v2893_v62  ;;  %v518_v61 = vrot.slane %v15_v59, %v3144_v41  ;;  %v511_v62 = vcombine.high %v15_v59, %v15_v59 }
  0x62   :  { %2666 = vmatprep.subr.bf16.mxu1 %v2896_v0  ;;  %v2953_v0 = vld [vmem:[%s3688_s1 + $0x4f0] sm:$0xff]  }
  0x63   :  { %1971 = vmatmul.mubr.bf16.vlgmr.msra.gmra.mrb[8].mxu0 %v485_v60  ;;  %v2951_v60 = vld [vmem:[%s3688_s1 + $0x470] sm:$0xff]  }
  0x64   :  { %2645 = vmatpush3.bf16.msra.mxu0 %v2895_v1  ;;  %2050 = vmatprep.mubr.bf16.mxu0 %v506_v63  ;;  %v2950_v63 = vld [vmem:[%s3688_s1 + $0x4a8] sm:$0xff]   ;;  %v526_v1 = vcombine.high %v518_v61, %v518_v61 }
  0x65   :  { %2011 = vmatmul.mubr.bf16.vlgmr.msra.gmra.mrb[8].mxu1 %v507_v2  ;;  %2646 = vmatprep.subr.bf16.mxu0 %v2898_v3  ;;  %v3536_v2 = vrot.slane %v511_v62, %v3144_v41  ;;  %v2952_v3 = vld [vmem:[%s3688_s1 + $0x430] sm:$0xff]  }
  0x66   :  { %2667 = vmatpush3.bf16.msra.mxu1 %v2897_v4  ;;  %2090 = vmatprep.mubr.bf16.mxu1 %v510_v5  ;;  %v2955_v4 = vld [vmem:[%s3688_s1 + $0x478] sm:$0xff]   ;;  %v548_v5 = vrot.slane %v526_v1, %v3144_v41 }
  0x67   :  { %2668 = vmatprep.subr.bf16.mxu1 %v2900_v6  ;;  %v2954_v6 = vld [vmem:[%s3688_s1 + $0x4b0] sm:$0xff]  }
  0x68   :  { %2647 = vmatpush3.bf16.msra.mxu0 %v2899_v7  ;;  %v527_v7 = vcombine.high %v3536_v2, %v3536_v2 }
  0x69   :  { %2648 = vmatprep.subr.bf16.mxu0 %v2902_v8  ;;  %v2957_v8 = vld [vmem:[%s3688_s1 + $0x4f8] sm:$0xff]  }
  0x6a   :  { %2669 = vmatpush3.bf16.msra.mxu1 %v2901_v9  ;;  %v558_v9 = vcombine.high %v548_v5, %v548_v5 }
  0x6b   :  { %2670 = vmatprep.subr.bf16.mxu1 %v2904_v10  ;;  %v2956_v10 = vld [vmem:[%s3688_s1 + $0x438] sm:$0xff]  }
  0x6c   :  { %2649 = vmatpush3.bf16.msra.mxu0 %v2903_v11  ;;  %v534_v11 = vrot.slane %v518_v61, %v3144_v41 }
  0x6d   :  { %2650 = vmatprep.subr.bf16.mxu0 %v2906_v12  ;;  %v2959_v12 = vld [vmem:[%s3688_s1 + $0x540] sm:$0xff]  }
  0x6e   :  { %2671 = vmatpush3.bf16.msra.mxu1 %v2905_v13  ;;  %v2958_v13 = vld [vmem:[%s3688_s1 + $0x4b8] sm:$0xff]  }
  0x6f   :  { %2672 = vmatprep.subr.bf16.mxu1 %v2908_v14  ;;  %v555_v14 = vrot.slane %v527_v7, %v3144_v41 }
  0x70   :  { %2651 = vmatpush3.bf16.msra.mxu0 %v2907_v15  ;;  %v2961_v15 = vld [vmem:[%s3688_s1 + $0x5c0] sm:$0xff]  }
  0x71   :  { %2652 = vmatprep.subr.bf16.mxu0 %v2910_v16  ;;  %v2960_v16 = vld [vmem:[%s3688_s1 + $0x500] sm:$0xff]  }
  0x72   :  { %2673 = vmatpush3.bf16.msra.mxu1 %v2909_v17  ;;  %v556_v17 = vcombine.high %v534_v11, %v534_v11 }
  0x73   :  { %2674 = vmatprep.subr.bf16.mxu1 %v2912_v18  ;;  %v2963_v18 = vld [vmem:[%s3688_s1 + $0x548] sm:$0xff]  }
  0x74   :  { %2653 = vmatpush3.bf16.msra.mxu0 %v2911_v19  ;;  %v2962_v19 = vld [vmem:[%s3688_s1 + $0x580] sm:$0xff]  }
  0x75   :  { %2654 = vmatprep.subr.bf16.mxu0 %v2914_v20  ;;  %v559_v20 = vcombine.high %v555_v14, %v555_v14 }
  0x76   :  { %2675 = vmatpush3.bf16.msra.mxu1 %v2913_v21  ;;  %v2965_v21 = vld [vmem:[%s3688_s1 + $0x5c8] sm:$0xff]  }
  0x77   :  { %2676 = vmatprep.subr.bf16.mxu1 %v2916_v22  ;;  %v2964_v22 = vld [vmem:[%s3688_s1 + $0x508] sm:$0xff]  }
  0x78   :  { %2655 = vmatpush3.bf16.msra.mxu0 %v2915_v23  ;;  %v2967_v23 = vld [vmem:[%s3688_s1 + $0x550] sm:$0xff]  }
  0x79   :  { %2656 = vmatprep.subr.bf16.mxu0 %v2918_v24  ;;  %v2966_v24 = vld [vmem:[%s3688_s1 + $0x588] sm:$0xff]  }
  0x7a   :  { %2677 = vmatpush3.bf16.msra.mxu1 %v2917_v25  ;;  %v2969_v25 = vld [vmem:[%s3688_s1 + $0x5d0] sm:$0xff]  }
  0x7b   :  { %2678 = vmatprep.subr.bf16.mxu1 %v2920_v26  ;;  %v2968_v26 = vld [vmem:[%s3688_s1 + $0x510] sm:$0xff]  }
  0x7c   :  { %2657 = vmatpush3.bf16.msra.mxu0 %v2919_v27  ;;  %v2971_v27 = vld [vmem:[%s3688_s1 + $0x558] sm:$0xff]  }
  0x7d   :  { %2658 = vmatprep.subr.bf16.mxu0 %v2922_v28  ;;  %v2970_v28 = vld [vmem:[%s3688_s1 + $0x590] sm:$0xff]  }
  0x7e   :  { %2679 = vmatpush3.bf16.msra.mxu1 %v2921_v29  ;;  %v2973_v29 = vld [vmem:[%s3688_s1 + $0x5d8] sm:$0xff]  }
  0x7f   :  { %2680 = vmatprep.subr.bf16.mxu1 %v2924_v30  ;;  %v2972_v30 = vld [vmem:[%s3688_s1 + $0x518] sm:$0xff]  }
  0x80   :  { %2659 = vmatpush3.bf16.msra.mxu0 %v2923_v31  ;;  %v2975_v31 = vld [vmem:[%s3688_s1 + $0x560] sm:$0xff]  }
  0x81   :  { %2688 = vmatprep.subr.bf16.mxu0 %v2927_v33  ;;  %v2977_v33 = vld [vmem:[%s3688_s1 + $0x5e0] sm:$0xff]  }
  0x82   :  { %2681 = vmatpush3.bf16.msra.mxu1 %v2926_v34  ;;  %v2976_v34 = vld [vmem:[%s3688_s1 + $0x520] sm:$0xff]  }
  0x83   :  { %2051 = vmatmul.mubr.bf16.vlgmr.msra.gmra.mrb[12].mxu0 %v492_v32  ;;  %2710 = vmatprep.subr.bf16.mxu1 %v2929_v35  ;;  %v2974_v32 = vld [vmem:[%s3688_s1 + $0x598] sm:$0xff]   ;;  %v2979_v35 = vld [vmem:[%s3688_s1 + $0x568] sm:$0xff]  }
  0x84   :  { %2689 = vmatpush3.bf16.msra.mxu0 %v2928_v36  ;;  %2130 = vmatprep.mubr.bf16.mxu0 %v548_v5  ;;  %v2978_v36 = vld [vmem:[%s3688_s1 + $0x5a0] sm:$0xff]  }
  0x85   :  { %2091 = vmatmul.mubr.bf16.vlgmr.msra.gmra.mrb[12].mxu1 %v508_v37  ;;  %2690 = vmatprep.subr.bf16.mxu0 %v2931_v38  ;;  %v2981_v37 = vld [vmem:[%s3688_s1 + $0x5e8] sm:$0xff]  }
  0x86   :  { %2711 = vmatpush3.bf16.msra.mxu1 %v2930_v39  ;;  %2170 = vmatprep.mubr.bf16.mxu1 %v558_v9  ;;  %v2980_v38 = vld [vmem:[%s3688_s1 + $0x528] sm:$0xff]   ;;  %v2983_v39 = vld [vmem:[%s3688_s1 + $0x570] sm:$0xff]  }
  0x87   :  { %2712 = vmatprep.subr.bf16.mxu1 %v2933_v40  ;;  %v2982_v40 = vld [vmem:[%s3688_s1 + $0x5a8] sm:$0xff]  }
  0x88   :  { %2691 = vmatpush3.bf16.msra.mxu0 %v2932_v42  ;;  %v2985_v42 = vld [vmem:[%s3688_s1 + $0x5f0] sm:$0xff]  }
  0x89   :  { %2692 = vmatprep.subr.bf16.mxu0 %v2935_v43  ;;  %v2984_v43 = vld [vmem:[%s3688_s1 + $0x530] sm:$0xff]  }
  0x8a   :  { %2713 = vmatpush3.bf16.msra.mxu1 %v2934_v44  ;;  %v2987_v44 = vld [vmem:[%s3688_s1 + $0x578] sm:$0xff]  }
  0x8b   :  { %2714 = vmatprep.subr.bf16.mxu1 %v2937_v45  ;;  %v2986_v45 = vld [vmem:[%s3688_s1 + $0x5b0] sm:$0xff]  }
  0x8c   :  { %2693 = vmatpush3.bf16.msra.mxu0 %v2936_v46 }
  0x8d   :  { %2694 = vmatprep.subr.bf16.mxu0 %v2939_v47 }
  0x8e   :  { %2715 = vmatpush3.bf16.msra.mxu1 %v2938_v48 }
  0x8f   :  { %2716 = vmatprep.subr.bf16.mxu1 %v2941_v49 }
  0x90   :  { %2695 = vmatpush3.bf16.msra.mxu0 %v2940_v50 }
  0x91   :  { %2696 = vmatprep.subr.bf16.mxu0 %v2943_v51 }
  0x92   :  { %2717 = vmatpush3.bf16.msra.mxu1 %v2942_v52 }
  0x93   :  { %2718 = vmatprep.subr.bf16.mxu1 %v2945_v53 }
  0x94   :  { %2697 = vmatpush3.bf16.msra.mxu0 %v2944_v54 }
  0x95   :  { %2698 = vmatprep.subr.bf16.mxu0 %v2947_v55 }
  0x96   :  { %2719 = vmatpush3.bf16.msra.mxu1 %v2946_v56 }
  0x97   :  { %2720 = vmatprep.subr.bf16.mxu1 %v2949_v57 }
  0x98   :  { %2699 = vmatpush3.bf16.msra.mxu0 %v2948_v58 }
  0x99   :  { %2700 = vmatprep.subr.bf16.mxu0 %v2951_v60 }
  0x9a   :  { %2721 = vmatpush3.bf16.msra.mxu1 %v2950_v63 }
  0x9b   :  { %2722 = vmatprep.subr.bf16.mxu1 %v2953_v0 }
  0x9c   :  { %2701 = vmatpush3.bf16.msra.mxu0 %v2952_v3 }
  0x9d   :  { %2702 = vmatprep.subr.bf16.mxu0 %v2955_v4 }
  0x9e   :  { %2723 = vmatpush3.bf16.msra.mxu1 %v2954_v6 }
  0x9f   :  { %2724 = vmatprep.subr.bf16.mxu1 %v2957_v8 }
  0xa0   :  { %2703 = vmatpush3.bf16.msra.mxu0 %v2956_v10 }
  0xa1   :  { %2732 = vmatprep.subr.bf16.mxu0 %v2959_v12 }
  0xa2   :  { %2725 = vmatpush3.bf16.msra.mxu1 %v2958_v13 }
  0xa3   :  { %2131 = vmatmul.mubr.bf16.vlgmr.msra.gmra.mrb[16].mxu0 %v534_v11  ;;  %2754 = vmatprep.subr.bf16.mxu1 %v2961_v15 }
  0xa4   :  { %2733 = vmatpush3.bf16.msra.mxu0 %v2960_v16  ;;  %2210 = vmatprep.mubr.bf16.mxu0 %v555_v14 }
  0xa5   :  { %2171 = vmatmul.mubr.bf16.vlgmr.msra.gmra.mrb[16].mxu1 %v556_v17  ;;  %2734 = vmatprep.subr.bf16.mxu0 %v2963_v18 }
  0xa6   :  { %2755 = vmatpush3.bf16.msra.mxu1 %v2962_v19  ;;  %2250 = vmatprep.mubr.bf16.mxu1 %v559_v20 }
  0xa7   :  { %2756 = vmatprep.subr.bf16.mxu1 %v2965_v21 }
  0xa8   :  { %2735 = vmatpush3.bf16.msra.mxu0 %v2964_v22 }
  0xa9   :  { %2736 = vmatprep.subr.bf16.mxu0 %v2967_v23 }
  0xaa   :  { %2757 = vmatpush3.bf16.msra.mxu1 %v2966_v24 }
  0xab   :  { %2758 = vmatprep.subr.bf16.mxu1 %v2969_v25 }
  0xac   :  { %2737 = vmatpush3.bf16.msra.mxu0 %v2968_v26 }
  0xad   :  { %2738 = vmatprep.subr.bf16.mxu0 %v2971_v27 }
  0xae   :  { %2759 = vmatpush3.bf16.msra.mxu1 %v2970_v28 }
  0xaf   :  { %2760 = vmatprep.subr.bf16.mxu1 %v2973_v29 }
  0xb0   :  { %2739 = vmatpush3.bf16.msra.mxu0 %v2972_v30 }
  0xb1   :  { %2740 = vmatprep.subr.bf16.mxu0 %v2975_v31 }
  0xb2   :  { %2761 = vmatpush3.bf16.msra.mxu1 %v2974_v32 }
  0xb3   :  { %2762 = vmatprep.subr.bf16.mxu1 %v2977_v33 }
  0xb4   :  { %2741 = vmatpush3.bf16.msra.mxu0 %v2976_v34 }
  0xb5   :  { %2742 = vmatprep.subr.bf16.mxu0 %v2979_v35 }
  0xb6   :  { %2763 = vmatpush3.bf16.msra.mxu1 %v2978_v36 }
  0xb7   :  { %2764 = vmatprep.subr.bf16.mxu1 %v2981_v37 }
  0xb8   :  { %2743 = vmatpush3.bf16.msra.mxu0 %v2980_v38 }
  0xb9   :  { %2744 = vmatprep.subr.bf16.mxu0 %v2983_v39 }
  0xba   :  { %2765 = vmatpush3.bf16.msra.mxu1 %v2982_v40 }
  0xbb   :  { %7 = vsyncpa [#allocation3], 0  ;;  %2766 = vmatprep.subr.bf16.mxu1 %v2985_v42  ;;  %v2989_v46 = vld [vmem:[%s3688_s1 + $0x5f8] sm:$0xff]   ;;  %v541_v48 = vrot.slane %v3536_v2, %v3144_v41  ;;  %v2992_v50 = vld [vmem:[%s3688_s1 + $0x600] sm:$0xff]   ;;  %v3021_v51 = vmov 0.0   ;;  %vm3022_vm0 = vmmov 0  }
  0xbc   :  { %2745 = vmatpush3.bf16.msra.mxu0 %v2984_v43  ;;  %v2988_v47 = vld [vmem:[%s3688_s1 + $0x538] sm:$0xff]   ;;  %v2993_v53 = vld [vmem:[%s3688_s1 + $0x608] sm:$0xff]   ;;  %v2994_v54 = vld [vmem:[%s3688_s1 + $0x610] sm:$0xff]   ;;  %vm1774_vm1 = vcmask 523264   ;;  %vm2298_vm2 = vcmask 74752  }
  0xbd   :  { %2746 = vmatprep.subr.bf16.mxu0 %v2987_v44  ;;  %v2991_v49 = vld [vmem:[%s3688_s1 + $0x5b8] sm:$0xff]   ;;  %v557_v52 = vcombine.high %v541_v48, %v541_v48 }
  0xbe   :  { %2767 = vmatpush3.bf16.msra.mxu1 %v2986_v45  ;;  %v2995_v55 = vld [vmem:[%s3688_s1 + $0x618] sm:$0xff]  }
  0xbf   :  { %2768 = vmatprep.subr.bf16.mxu1 %v2989_v46  ;;  %v2314_v56 = vld.sshfl [vmem:[%s3687_s0 + $0x18] sm:$0x1 pattern:$0x75316420]  ;;  %s3023_s0 = smov [#allocation2]  }
  0xc0   :  { %2747 = vmatpush3.bf16.msra.mxu0 %v2988_v47  ;;  %v573_v57 = vrot.slane %v2314_v56, %v3144_v41  ;;  %s2306_s1 = sshll.u32 %s3023_s0, 4  ;;  %s2307_s1 = int_to_ptr.vmem [resolvable:$true] %s2306_s1 }
  0xc1   :  { %2781 = vmatprep.subr.bf16.mxu0 %v3021_v51  ;;  %s2996_s17 = scalar_lea.vmem %s2307_s1, 32  ;;  %p3001_p1 = scmp.lt.s32.totalorder %s2307_s1, %s2307_s1 }
  0xc2   :  { %2769 = vmatpush3.bf16.msra.mxu1 %v2991_v49  ;;  %p2997_p0 = scmp.ne.s32.totalorder %s2307_s1, %s2996_s17  ;;  %p3002_p2 = scmp.lt.s32.totalorder %s2996_s17, %s2996_s17 }
  0xc3   :  { %2211 = vmatmul.mubr.bf16.vlgmr.msra.gmra.mrb[20].mxu0 %v541_v48 }
  0xc4   :  { %2782 = vmatpush3.bf16.msra.mxu0 %v2992_v50  ;;  %2789 = vmatprep.mubr.msk.bf16.mxu0 %vm3022_vm0, %v3021_v51  ;;  %p3003_p3 = por %p3002_p2, %p3001_p1 }
  0xc5   :  { %2251 = vmatmul.mubr.bf16.vlgmr.msra.gmra.mrb[20].mxu1 %v557_v52  ;;  %2783 = vmatprep.subr.bf16.mxu0 %v3021_v51 }
  0xc6   :  { %p3004_p4 = pnand %p3003_p3, %p2997_p0 }
  0xc8   :  { %2784 = vmatpush3.bf16.msra.mxu0 %v2993_v53 }
  0xc9   :  { %2785 = vmatprep.subr.bf16.mxu0 %v3021_v51 }
  0xcc   :  { %2786 = vmatpush3.bf16.msra.mxu0 %v2994_v54 }
  0xcd   :  { %2787 = vmatprep.subr.bf16.mxu0 %v3021_v51 }
  0xd0   :  { %2788 = vmatpush3.bf16.msra.mxu0 %v2995_v55 }
  0xd3   :  { %2790 = vmatmul.mubr.msk.bf16.vlgmr.msra.gmra.mrb[24].mxu0 %vm1774_vm1, %v573_v57 }
  0xf6   :  { %v2528_v58 = vpop.f32.mrb[0].mxu0 }
  0xf7   :  { %v2529_v59 = vpop.f32.mrb[1].mxu0  ;;  %v2550_v60 = vpop.f32.mrb[0].mxu1 }
  0xf8   :  { %v2530_v61 = vadd.f32 %v2529_v59, %v2528_v58  ;;  %v2531_v62 = vpop.f32.mrb[2].mxu0  ;;  %v2551_v63 = vpop.f32.mrb[1].mxu1 }
  0xf9   :  { %v2532_v0 = vpop.f32.mrb[3].mxu0  ;;  %v2552_v1 = vadd.f32 %v2551_v63, %v2550_v60  ;;  %v2553_v2 = vpop.f32.mrb[2].mxu1 }
  0xfa   :  { %v2554_v3 = vpop.f32.mrb[3].mxu1 }
  0xfb   :  { %v1853_v4 = vadd.f32 %v2552_v1, %v2530_v61 }
 0x116   :  { %v2572_v5 = vpop.f32.mrb[4].mxu0 }
 0x117   :  { %v2573_v6 = vpop.f32.mrb[5].mxu0  ;;  %v2594_v9 = vpop.f32.mrb[4].mxu1 }
 0x118   :  { %v2574_v7 = vadd.f32 %v2573_v6, %v2572_v5  ;;  %v2575_v8 = vpop.f32.mrb[6].mxu0  ;;  %v2595_v10 = vpop.f32.mrb[5].mxu1 }
 0x119   :  { %v2576_v41 = vpop.f32.mrb[7].mxu0  ;;  %v2596_v12 = vadd.f32 %v2595_v10, %v2594_v9  ;;  %v2597_v13 = vpop.f32.mrb[6].mxu1 }
 0x11a   :  { %v1893_v11 = vadd.f32 %v2574_v7, %v1853_v4  ;;  %v2598_v14 = vpop.f32.mrb[7].mxu1 }
 0x11c   :  { %v1933_v15 = vadd.f32 %v2596_v12, %v1893_v11 }
 0x136   :  { %v2616_v16 = vpop.f32.mrb[8].mxu0 }
 0x137   :  { %v2617_v17 = vpop.f32.mrb[9].mxu0 }
 0x138   :  { %v2618_v18 = vadd.f32 %v2617_v17, %v2616_v16  ;;  %v2619_v19 = vpop.f32.mrb[10].mxu0  ;;  %v2638_v20 = vpop.f32.mrb[8].mxu1 }
 0x139   :  { %v2620_v21 = vpop.f32.mrb[11].mxu0  ;;  %v2639_v22 = vpop.f32.mrb[9].mxu1 }
 0x13a   :  { %v1973_v23 = vadd.f32 %v2618_v18, %v1933_v15  ;;  %v2640_v24 = vadd.f32 %v2639_v22, %v2638_v20  ;;  %v2641_v25 = vpop.f32.mrb[10].mxu1 }
 0x13b   :  { %v2642_v26 = vpop.f32.mrb[11].mxu1 }
 0x13c   :  { %v2013_v27 = vadd.f32 %v2640_v24, %v1973_v23 }
 0x156   :  { %v2660_v28 = vpop.f32.mrb[12].mxu0 }
 0x157   :  { %v2661_v29 = vpop.f32.mrb[13].mxu0 }
 0x158   :  { %v2662_v30 = vadd.f32 %v2661_v29, %v2660_v28  ;;  %v2663_v31 = vpop.f32.mrb[14].mxu0  ;;  %v2682_v32 = vpop.f32.mrb[12].mxu1 }
 0x159   :  { %v2664_v33 = vpop.f32.mrb[15].mxu0  ;;  %v2683_v34 = vpop.f32.mrb[13].mxu1 }
 0x15a   :  { %v2053_v35 = vadd.f32 %v2662_v30, %v2013_v27  ;;  %v2684_v36 = vadd.f32 %v2683_v34, %v2682_v32  ;;  %v2685_v37 = vpop.f32.mrb[14].mxu1 }
 0x15b   :  { %v2686_v38 = vpop.f32.mrb[15].mxu1 }
 0x15c   :  { %v2093_v39 = vadd.f32 %v2684_v36, %v2053_v35 }
 0x176   :  { %v2704_v40 = vpop.f32.mrb[16].mxu0 }
 0x177   :  { %v2705_v42 = vpop.f32.mrb[17].mxu0 }
 0x178   :  { %v2706_v43 = vadd.f32 %v2705_v42, %v2704_v40  ;;  %v2707_v44 = vpop.f32.mrb[18].mxu0  ;;  %v2726_v45 = vpop.f32.mrb[16].mxu1 }
 0x179   :  { %v2708_v46 = vpop.f32.mrb[19].mxu0  ;;  %v2727_v47 = vpop.f32.mrb[17].mxu1 }
 0x17a   :  { %v2133_v48 = vadd.f32 %v2706_v43, %v2093_v39  ;;  %v2728_v49 = vadd.f32 %v2727_v47, %v2726_v45  ;;  %v2729_v50 = vpop.f32.mrb[18].mxu1 }
 0x17b   :  { %v2730_v51 = vpop.f32.mrb[19].mxu1 }
 0x17c   :  { %v2173_v52 = vadd.f32 %v2728_v49, %v2133_v48 }
 0x196   :  { %v2748_v53 = vpop.f32.mrb[20].mxu0 }
 0x197   :  { %v2749_v54 = vpop.f32.mrb[21].mxu0 }
 0x198   :  { %v2750_v55 = vadd.f32 %v2749_v54, %v2748_v53  ;;  %v2751_v56 = vpop.f32.mrb[22].mxu0  ;;  %v2770_v57 = vpop.f32.mrb[20].mxu1 }
 0x199   :  { %v2752_v58 = vpop.f32.mrb[23].mxu0  ;;  %v2771_v59 = vpop.f32.mrb[21].mxu1 }
 0x19a   :  { %v2213_v60 = vadd.f32 %v2750_v55, %v2173_v52  ;;  %v2772_v61 = vadd.f32 %v2771_v59, %v2770_v57  ;;  %v2773_v62 = vpop.f32.mrb[22].mxu1 }
 0x19b   :  { %v2774_v63 = vpop.f32.mrb[23].mxu1 }
 0x19c   :  { %v2253_v0 = vadd.f32 %v2772_v61, %v2213_v60 }
 0x1a6   :  { %v2292_v1 = vpop.f32.mrb[24].mxu0 }
 0x1a7   :  { %v2293_v2 = vadd.f32 %v2292_v1, %v2253_v0  ;;  %v2791_v3 = vpop.f32.mrb[25].mxu0 }
 0x1a8   :  { %v2295_v4 = vpop.f32.mrb[26].mxu0 }
 0x1a9   :  { %v2792_v5 = vpop.f32.mrb[27].mxu0  ;;  %2299 = vst.msk [vmem:[#allocation2] sm:$0x3] %vm2298_vm2, %v2293_v2 }
 0x1aa   :  { %3007 = shalt.err (!%p3004_p4)
}
 0x1ab   :  { %s3008_s20 = scalar_lea.hbm %s3689_s2, 32 }
 0x1ac   :  { %p3009_p5 = scmp.ne.s32.totalorder %s3689_s2, %s3008_s20  ;;  %p3012_p6 = scmp.lt.u32.totalorder %s3008_s20, %s3689_s2 }
 0x1ae   :  { %p3014_p7 = pnand %p3012_p6, %p3009_p5 }
 0x1b0   :  { %3017 = shalt.err (!%p3014_p7)
}
 0x1b1   :  { %2309 = dma.vmem_to_hbm [thread:$0]  %s2307_s1, 32, %s3689_s2, [#allocation3]  }
 0x1b2   :  { %3018 = dma.done.wait [#allocation3], 32  }
 0x1b3   :  { %3019 = vsyncadd [#allocation3], 4294967264 }
 0x1b4   :  { %2313 = vsyncpa [#allocation3], 1 }

// kernel: snn_stdp_forward.2
= control target key start
LH: loop header
LB: loop body
LE: loop exit
PB: predicated region body
PF: predicated region fallthrough
CT: control target
= control target key end

     0   :  { %s5706_s15 = smov 0   ;;  %s7479_s0 = inlined_call_operand.vmem [shape: f32[2,320,17], index: 0, kind: input, shape index: {}]   ;;  %s7480_s1 = inlined_call_operand.vmem [shape: f32[4,17,128], index: 1, kind: input, shape index: {}]   ;;  %s7481_s2 = inlined_call_operand.vmem [shape: bf16[9,32,128], index: 2, kind: input, shape index: {}]   ;;  %s7482_s3 = inlined_call_operand.vmem [shape: f32[1,128], index: 3, kind: input, shape index: {}]   ;;  %s7483_s4 = inlined_call_operand.vmem [shape: bf16[2,64,128], index: 4, kind: output, shape index: {}]  }
   0x1 LB: > { %s4040_s16 = sadd.s32 4294967295, %s5678_s15   ;;  %p4044_p0 = scmp.ge.s32.totalorder %s5678_s15, 1  ;;  %s5678_s15 = sphi %s5706_s15, %s14_s15  }
   0x2   : > { %p162_p1 = scmp.lt.s32.totalorder %s5678_s15, 3 }
   0x4   : > { %p163_p2 = pnand %p4044_p0, %p162_p1 }
   0x6   : > { %166 = sbr.rel (%p163_p2) target bundleno = 1175 (0x497), region = 36 }
   0xd   : > { %v200_v0 = vld [vmem:[%s7480_s1] sm:$0xff]  ;;  %v201_v1 = vld [vmem:[%s7480_s1 + $0x8] sm:$0xff]  ;;  %p188_p3 = scmp.lt.s32.totalorder %s4040_s16, 1  ;;  %v202_v3 = vld [vmem:[%s7480_s1 + $0x10] sm:$0x1]  ;;  %vm420_vm0 = vcmask 1040384  }
   0xe   : > { %v5372_v2 = vpack.c.bf16 %v201_v1, %v200_v0  ;;  %v4048_v4 = vld [vmem:[%s7480_s1 + $0x18] sm:$0xff]  ;;  %v4049_v5 = vld [vmem:[%s7480_s1 + $0x20] sm:$0xff]  ;;  %vm299_vm1 = vcmask 138240   ;;  %v4050_v10 = vld [vmem:[%s7480_s1 + $0x28] sm:$0x1]  ;;  %vm1817_vm10 = vcmask 261120  }
   0xf   : > { %s7647_s16 = smov (!%p188_p3, %s4040_s16), 1  ;;  %v5376_v6 = vpack.c.bf16 %v4049_v5, %v4048_v4  ;;  %v4051_v11 = vld [vmem:[%s7480_s1 + $0x30] sm:$0xff]  ;;  %v4052_v12 = vld [vmem:[%s7480_s1 + $0x38] sm:$0xff]  ;;  %v4053_v51 = vld [vmem:[%s7480_s1 + $0x40] sm:$0x1] }
  0x10   : > { %5373 = vmatprep.subr.bf16.mxu1 %v5372_v2  ;;  %s5644_s27 = smul.u32 320, %s7647_s16  ;;  %v5770_v15 = vpack.c.bf16 %v4052_v12, %v4051_v11  ;;  %v4054_v52 = vld [vmem:[%s7480_s1 + $0x48] sm:$0xff]  ;;  %v4055_v53 = vld [vmem:[%s7480_s1 + $0x50] sm:$0xff]  ;;  %v4056_v55 = vld [vmem:[%s7480_s1 + $0x58] sm:$0x1]  ;;  %s4426_s9 = sshll.u32 %s7647_s16, 5 }
  0x11   : > { %5375 = vmatpush3.bf16.msra.mxu1 %v5372_v2  ;;  %v5384_v54 = vpack.c.bf16 %v4055_v53, %v4054_v52  ;;  %s7449_s12 = scalar_lea.vmem %s7483_s4, %s4426_s9 }
  0x12   : > { %4788 = vmatprep.subr.msk.mxu1 %vm420_vm0, %v202_v3  ;;  %s5736_s30 = scalar_lea.vmem %s7479_s0, %s5644_s27 }
  0x13   : > { %v5739_v7 = vld [vmem:[%s5736_s30] sm:$0xff]  ;;  %v5742_v8 = vld [vmem:[%s5736_s30 + $0x8] sm:$0xff]  ;;  %v5745_v9 = vld [vmem:[%s5736_s30 + $0x10] sm:$0xff] }
  0x14   : > { %4790 = vmatprep.mubr.msk.f32.mxu1 %vm299_vm1, %v5739_v7  ;;  %v5764_v13 = vld [vmem:[%s5736_s30 + $0x18] sm:$0xff]  ;;  %v5767_v14 = vld [vmem:[%s5736_s30 + $0x20] sm:$0xff]  ;;  %v5777_v16 = vld [vmem:[%s5736_s30 + $0x28] sm:$0xff] }
  0x15   : > { %4789 = vmatpush3.msk.msra.mxu1 %vm420_vm0, %v202_v3  ;;  %v5781_v17 = vld [vmem:[%s5736_s30 + $0x30] sm:$0xff]  ;;  %v5789_v18 = vld [vmem:[%s5736_s30 + $0x38] sm:$0xff]  ;;  %v5792_v19 = vld [vmem:[%s5736_s30 + $0x40] sm:$0xff] }
  0x16   : > { %4791 = vmatmul.mubr.msk.f32.vlgmr.msra.gmra.mrb[0].mxu1 %vm299_vm1, %v5742_v8  ;;  %5377 = vmatprep.subr.bf16.mxu1 %v5376_v6  ;;  %v5795_v20 = vld [vmem:[%s5736_s30 + $0x48] sm:$0xff]  ;;  %v5800_v21 = vld [vmem:[%s5736_s30 + $0x50] sm:$0xff]  ;;  %v5805_v22 = vld [vmem:[%s5736_s30 + $0x58] sm:$0xff] }
  0x17   : > { %5379 = vmatpush3.bf16.msra.mxu1 %v5376_v6  ;;  %4793 = vmatprep.mubr.msk.f32.mxu1 %vm299_vm1, %v5745_v9  ;;  %v5810_v23 = vld [vmem:[%s5736_s30 + $0x60] sm:$0xff]  ;;  %v5819_v24 = vld [vmem:[%s5736_s30 + $0x68] sm:$0xff]  ;;  %v5822_v25 = vld [vmem:[%s5736_s30 + $0x70] sm:$0xff] }
  0x18   : > { %4854 = vmatprep.subr.msk.mxu1 %vm420_vm0, %v4050_v10  ;;  %v5829_v26 = vld [vmem:[%s5736_s30 + $0x78] sm:$0xff]  ;;  %v5832_v27 = vld [vmem:[%s5736_s30 + $0x80] sm:$0xff]  ;;  %v5839_v28 = vld [vmem:[%s5736_s30 + $0x88] sm:$0xff] }
  0x19   : > { %v5842_v29 = vld [vmem:[%s5736_s30 + $0x90] sm:$0xff]  ;;  %v5849_v30 = vld [vmem:[%s5736_s30 + $0x98] sm:$0xff]  ;;  %v5852_v31 = vld [vmem:[%s5736_s30 + $0xa0] sm:$0xff] }
  0x1a   : > { %4794 = vmatmul.mubr.msk.f32.gmra.mrb[2].mxu1 %vm299_vm1, %v5764_v13  ;;  %v5859_v32 = vld [vmem:[%s5736_s30 + $0xa8] sm:$0xff]  ;;  %v5862_v33 = vld [vmem:[%s5736_s30 + $0xb0] sm:$0xff]  ;;  %v5869_v34 = vld [vmem:[%s5736_s30 + $0xb8] sm:$0xff] }
  0x1b   : > { %4796 = vmatprep.mubr.msk.f32.mxu1 %vm299_vm1, %v5767_v14  ;;  %4855 = vmatpush3.msk.msra.mxu1 %vm420_vm0, %v4050_v10  ;;  %v5872_v35 = vld [vmem:[%s5736_s30 + $0xc0] sm:$0xff]  ;;  %v5879_v36 = vld [vmem:[%s5736_s30 + $0xc8] sm:$0xff]  ;;  %v5882_v37 = vld [vmem:[%s5736_s30 + $0xd0] sm:$0xff] }
  0x1c   : > { %5381 = vmatprep.subr.bf16.mxu1 %v5770_v15  ;;  %v5889_v38 = vld [vmem:[%s5736_s30 + $0xd8] sm:$0xff]  ;;  %v5892_v39 = vld [vmem:[%s5736_s30 + $0xe0] sm:$0xff]  ;;  %v5899_v40 = vld [vmem:[%s5736_s30 + $0xe8] sm:$0xff] }
  0x1d   : > { %v5902_v41 = vld [vmem:[%s5736_s30 + $0xf0] sm:$0xff]  ;;  %v5909_v42 = vld [vmem:[%s5736_s30 + $0xf8] sm:$0xff]  ;;  %v5912_v43 = vld [vmem:[%s5736_s30 + $0x100] sm:$0xff] }
  0x1e   : > { %4797 = vmatmul.mubr.msk.f32.gmra.mrb[4].mxu1 %vm299_vm1, %v5777_v16  ;;  %v5919_v44 = vld [vmem:[%s5736_s30 + $0x108] sm:$0xff]  ;;  %v5922_v45 = vld [vmem:[%s5736_s30 + $0x110] sm:$0xff]  ;;  %v5929_v46 = vld [vmem:[%s5736_s30 + $0x118] sm:$0xff] }
  0x1f   : > { %4799 = vmatprep.mubr.msk.f32.mxu1 %vm299_vm1, %v5781_v17  ;;  %v5932_v47 = vld [vmem:[%s5736_s30 + $0x120] sm:$0xff]  ;;  %v5939_v48 = vld [vmem:[%s5736_s30 + $0x128] sm:$0xff]  ;;  %v5942_v49 = vld [vmem:[%s5736_s30 + $0x130] sm:$0xff] }
  0x20   : > { %v5949_v50 = vld [vmem:[%s5736_s30 + $0x138] sm:$0xff] }
  0x22   : > { %4800 = vmatmul.mubr.msk.f32.gmra.mrb[6].mxu1 %vm299_vm1, %v5789_v18 }
  0x23   : > { %4802 = vmatprep.mubr.msk.f32.mxu1 %vm299_vm1, %v5792_v19 }
  0x26   : > { %4803 = vmatmul.mubr.msk.f32.gmra.mrb[8].mxu1 %vm299_vm1, %v5795_v20 }
  0x27   : > { %4805 = vmatprep.mubr.msk.f32.mxu1 %vm299_vm1, %v5800_v21 }
  0x2a   : > { %4806 = vmatmul.mubr.msk.f32.gmra.mrb[10].mxu1 %vm299_vm1, %v5805_v22 }
  0x2b   : > { %4808 = vmatprep.mubr.msk.f32.mxu1 %vm299_vm1, %v5810_v23 }
  0x2e   : > { %4809 = vmatmul.mubr.msk.f32.gmra.mrb[12].mxu1 %vm299_vm1, %v5819_v24 }
  0x2f   : > { %4811 = vmatprep.mubr.msk.f32.mxu1 %vm299_vm1, %v5822_v25 }
  0x32   : > { %4812 = vmatmul.mubr.msk.f32.gmra.mrb[14].mxu1 %vm299_vm1, %v5829_v26 }
  0x33   : > { %4814 = vmatprep.mubr.msk.f32.mxu1 %vm299_vm1, %v5832_v27 }
  0x36   : > { %4815 = vmatmul.mubr.msk.f32.gmra.mrb[16].mxu1 %vm299_vm1, %v5839_v28 }
  0x37   : > { %4817 = vmatprep.mubr.msk.f32.mxu1 %vm299_vm1, %v5842_v29 }
  0x3a   : > { %4818 = vmatmul.mubr.msk.f32.gmra.mrb[18].mxu1 %vm299_vm1, %v5849_v30 }
  0x3b   : > { %4820 = vmatprep.mubr.msk.f32.mxu1 %vm299_vm1, %v5852_v31 }
  0x3e   : > { %4821 = vmatmul.mubr.msk.f32.gmra.mrb[20].mxu1 %vm299_vm1, %v5859_v32 }
  0x3f   : > { %4823 = vmatprep.mubr.msk.f32.mxu1 %vm299_vm1, %v5862_v33 }
  0x42   : > { %4824 = vmatmul.mubr.msk.f32.gmra.mrb[22].mxu1 %vm299_vm1, %v5869_v34 }
  0x43   : > { %4826 = vmatprep.mubr.msk.f32.mxu1 %vm299_vm1, %v5872_v35 }
  0x46   : > { %4827 = vmatmul.mubr.msk.f32.gmra.mrb[24].mxu1 %vm299_vm1, %v5879_v36 }
  0x47   : > { %4829 = vmatprep.mubr.msk.f32.mxu1 %vm299_vm1, %v5882_v37 }
  0x4a   : > { %4830 = vmatmul.mubr.msk.f32.gmra.mrb[26].mxu1 %vm299_vm1, %v5889_v38 }
  0x4b   : > { %4832 = vmatprep.mubr.msk.f32.mxu1 %vm299_vm1, %v5892_v39 }
  0x4e   : > { %4833 = vmatmul.mubr.msk.f32.gmra.mrb[28].mxu1 %vm299_vm1, %v5899_v40 }
  0x4f   : > { %4835 = vmatprep.mubr.msk.f32.mxu1 %vm299_vm1, %v5902_v41 }
  0x52   : > { %4836 = vmatmul.mubr.msk.f32.gmra.mrb[30].mxu1 %vm299_vm1, %v5909_v42 }
  0x53   : > { %4838 = vmatprep.mubr.msk.f32.mxu1 %vm299_vm1, %v5912_v43 }
  0x56   : > { %4839 = vmatmul.mubr.msk.f32.gmra.mrb[32].mxu1 %vm299_vm1, %v5919_v44 }
  0x57   : > { %4841 = vmatprep.mubr.msk.f32.mxu1 %vm299_vm1, %v5922_v45 }
  0x5a   : > { %4842 = vmatmul.mubr.msk.f32.gmra.mrb[34].mxu1 %vm299_vm1, %v5929_v46 }
  0x5b   : > { %4844 = vmatprep.mubr.msk.f32.mxu1 %vm299_vm1, %v5932_v47 }
  0x5e   : > { %4845 = vmatmul.mubr.msk.f32.gmra.mrb[36].mxu1 %vm299_vm1, %v5939_v48 }
  0x5f   : > { %4847 = vmatprep.mubr.msk.f32.mxu1 %vm299_vm1, %v5942_v49 }
  0x62   : > { %4848 = vmatmul.mubr.msk.f32.gmra.mrb[38].mxu1 %vm299_vm1, %v5949_v50 }
  0x63   : > { %4856 = vmatprep.mubr.msk.f32.mxu1 %vm299_vm1, %v5739_v7 }
  0x66   : > { %4857 = vmatmul.mubr.msk.f32.vlgmr.msra.gmra.mrb[40].mxu1 %vm299_vm1, %v5742_v8 }
  0x67   : > { %5383 = vmatpush3.bf16.msra.mxu1 %v5770_v15  ;;  %4859 = vmatprep.mubr.msk.f32.mxu1 %vm299_vm1, %v5745_v9 }
  0x68   : > { %4920 = vmatprep.subr.msk.mxu1 %vm420_vm0, %v4053_v51 }
  0x6a   : > { %4860 = vmatmul.mubr.msk.f32.gmra.mrb[42].mxu1 %vm299_vm1, %v5764_v13 }
  0x6b   : > { %4862 = vmatprep.mubr.msk.f32.mxu1 %vm299_vm1, %v5767_v14  ;;  %4921 = vmatpush3.msk.msra.mxu1 %vm420_vm0, %v4053_v51 }
  0x6c   : > { %5385 = vmatprep.subr.bf16.mxu1 %v5384_v54 }
  0x6e   : > { %4863 = vmatmul.mubr.msk.f32.gmra.mrb[44].mxu1 %vm299_vm1, %v5777_v16 }
  0x6f   : > { %4865 = vmatprep.mubr.msk.f32.mxu1 %vm299_vm1, %v5781_v17 }
  0x72   : > { %4866 = vmatmul.mubr.msk.f32.gmra.mrb[46].mxu1 %vm299_vm1, %v5789_v18 }
  0x73   : > { %4868 = vmatprep.mubr.msk.f32.mxu1 %vm299_vm1, %v5792_v19 }
  0x76   : > { %4869 = vmatmul.mubr.msk.f32.gmra.mrb[48].mxu1 %vm299_vm1, %v5795_v20 }
  0x77   : > { %4871 = vmatprep.mubr.msk.f32.mxu1 %vm299_vm1, %v5800_v21 }
  0x7a   : > { %4872 = vmatmul.mubr.msk.f32.gmra.mrb[50].mxu1 %vm299_vm1, %v5805_v22 }
  0x7b   : > { %4874 = vmatprep.mubr.msk.f32.mxu1 %vm299_vm1, %v5810_v23 }
  0x7e   : > { %4875 = vmatmul.mubr.msk.f32.gmra.mrb[52].mxu1 %vm299_vm1, %v5819_v24 }
  0x7f   : > { %4877 = vmatprep.mubr.msk.f32.mxu1 %vm299_vm1, %v5822_v25 }
  0x82   : > { %4878 = vmatmul.mubr.msk.f32.gmra.mrb[54].mxu1 %vm299_vm1, %v5829_v26 }
  0x83   : > { %4880 = vmatprep.mubr.msk.f32.mxu1 %vm299_vm1, %v5832_v27 }
  0x86   : > { %4881 = vmatmul.mubr.msk.f32.gmra.mrb[56].mxu1 %vm299_vm1, %v5839_v28 }
  0x87   : > { %4883 = vmatprep.mubr.msk.f32.mxu1 %vm299_vm1, %v5842_v29 }
  0x8a   : > { %4884 = vmatmul.mubr.msk.f32.gmra.mrb[58].mxu1 %vm299_vm1, %v5849_v30 }
  0x8b   : > { %4886 = vmatprep.mubr.msk.f32.mxu1 %vm299_vm1, %v5852_v31 }
  0x8e   : > { %4887 = vmatmul.mubr.msk.f32.gmra.mrb[60].mxu1 %vm299_vm1, %v5859_v32 }
  0x8f   : > { %4889 = vmatprep.mubr.msk.f32.mxu1 %vm299_vm1, %v5862_v33 }
  0x92   : > { %4890 = vmatmul.mubr.msk.f32.gmra.mrb[62].mxu1 %vm299_vm1, %v5869_v34 }
  0x93   : > { %4892 = vmatprep.mubr.msk.f32.mxu1 %vm299_vm1, %v5872_v35 }
  0x96   : > { %4893 = vmatmul.mubr.msk.f32.gmra.mrb[64].mxu1 %vm299_vm1, %v5879_v36 }
  0x97   : > { %4895 = vmatprep.mubr.msk.f32.mxu1 %vm299_vm1, %v5882_v37 }
  0x9a   : > { %4896 = vmatmul.mubr.msk.f32.gmra.mrb[66].mxu1 %vm299_vm1, %v5889_v38 }
  0x9b   : > { %4898 = vmatprep.mubr.msk.f32.mxu1 %vm299_vm1, %v5892_v39 }
  0x9e   : > { %4899 = vmatmul.mubr.msk.f32.gmra.mrb[68].mxu1 %vm299_vm1, %v5899_v40 }
  0x9f   : > { %4901 = vmatprep.mubr.msk.f32.mxu1 %vm299_vm1, %v5902_v41 }
  0xa2   : > { %4902 = vmatmul.mubr.msk.f32.gmra.mrb[70].mxu1 %vm299_vm1, %v5909_v42 }
  0xa3   : > { %4904 = vmatprep.mubr.msk.f32.mxu1 %vm299_vm1, %v5912_v43 }
  0xa6   : > { %4905 = vmatmul.mubr.msk.f32.gmra.mrb[72].mxu1 %vm299_vm1, %v5919_v44 }
  0xa7   : > { %4907 = vmatprep.mubr.msk.f32.mxu1 %vm299_vm1, %v5922_v45 }
  0xaa   : > { %4908 = vmatmul.mubr.msk.f32.gmra.mrb[74].mxu1 %vm299_vm1, %v5929_v46 }
  0xab   : > { %4910 = vmatprep.mubr.msk.f32.mxu1 %vm299_vm1, %v5932_v47 }
  0xae   : > { %4911 = vmatmul.mubr.msk.f32.gmra.mrb[76].mxu1 %vm299_vm1, %v5939_v48 }
  0xaf   : > { %4913 = vmatprep.mubr.msk.f32.mxu1 %vm299_vm1, %v5942_v49 }
  0xb2   : > { %4914 = vmatmul.mubr.msk.f32.gmra.mrb[78].mxu1 %vm299_vm1, %v5949_v50 }
  0xb3   : > { %4922 = vmatprep.mubr.msk.f32.mxu1 %vm299_vm1, %v5739_v7 }
  0xb6   : > { %4923 = vmatmul.mubr.msk.f32.vlgmr.msra.gmra.mrb[80].mxu1 %vm299_vm1, %v5742_v8 }
  0xb7   : > { %5387 = vmatpush3.bf16.msra.mxu1 %v5384_v54  ;;  %4925 = vmatprep.mubr.msk.f32.mxu1 %vm299_vm1, %v5745_v9 }
  0xb8   : > { %4986 = vmatprep.subr.msk.mxu1 %vm420_vm0, %v4056_v55 }
  0xba   : > { %4926 = vmatmul.mubr.msk.f32.gmra.mrb[82].mxu1 %vm299_vm1, %v5764_v13 }
  0xbb   : > { %4928 = vmatprep.mubr.msk.f32.mxu1 %vm299_vm1, %v5767_v14  ;;  %4987 = vmatpush3.msk.msra.mxu1 %vm420_vm0, %v4056_v55 }
  0xbe   : > { %4929 = vmatmul.mubr.msk.f32.gmra.mrb[84].mxu1 %vm299_vm1, %v5777_v16 }
  0xbf   : > { %4931 = vmatprep.mubr.msk.f32.mxu1 %vm299_vm1, %v5781_v17 }
  0xc2   : > { %4932 = vmatmul.mubr.msk.f32.gmra.mrb[86].mxu1 %vm299_vm1, %v5789_v18 }
  0xc3   : > { %4934 = vmatprep.mubr.msk.f32.mxu1 %vm299_vm1, %v5792_v19 }
  0xc6   : > { %4935 = vmatmul.mubr.msk.f32.gmra.mrb[88].mxu1 %vm299_vm1, %v5795_v20 }
  0xc7   : > { %4937 = vmatprep.mubr.msk.f32.mxu1 %vm299_vm1, %v5800_v21 }
  0xca   : > { %4938 = vmatmul.mubr.msk.f32.gmra.mrb[90].mxu1 %vm299_vm1, %v5805_v22 }
  0xcb   : > { %4940 = vmatprep.mubr.msk.f32.mxu1 %vm299_vm1, %v5810_v23 }
  0xce   : > { %4941 = vmatmul.mubr.msk.f32.gmra.mrb[92].mxu1 %vm299_vm1, %v5819_v24 }
  0xcf   : > { %4943 = vmatprep.mubr.msk.f32.mxu1 %vm299_vm1, %v5822_v25 }
  0xd2   : > { %4944 = vmatmul.mubr.msk.f32.gmra.mrb[94].mxu1 %vm299_vm1, %v5829_v26 }
  0xd3   : > { %4946 = vmatprep.mubr.msk.f32.mxu1 %vm299_vm1, %v5832_v27 }
  0xd6   : > { %4947 = vmatmul.mubr.msk.f32.gmra.mrb[96].mxu1 %vm299_vm1, %v5839_v28 }
  0xd7   : > { %4949 = vmatprep.mubr.msk.f32.mxu1 %vm299_vm1, %v5842_v29 }
  0xda   : > { %4950 = vmatmul.mubr.msk.f32.gmra.mrb[98].mxu1 %vm299_vm1, %v5849_v30 }
  0xdb   : > { %4952 = vmatprep.mubr.msk.f32.mxu1 %vm299_vm1, %v5852_v31 }
  0xde   : > { %4953 = vmatmul.mubr.msk.f32.gmra.mrb[100].mxu1 %vm299_vm1, %v5859_v32 }
  0xdf   : > { %4955 = vmatprep.mubr.msk.f32.mxu1 %vm299_vm1, %v5862_v33 }
  0xe2   : > { %4956 = vmatmul.mubr.msk.f32.gmra.mrb[102].mxu1 %vm299_vm1, %v5869_v34 }
  0xe3   : > { %4958 = vmatprep.mubr.msk.f32.mxu1 %vm299_vm1, %v5872_v35 }
  0xe6   : > { %4959 = vmatmul.mubr.msk.f32.gmra.mrb[104].mxu1 %vm299_vm1, %v5879_v36 }
  0xe7   : > { %4961 = vmatprep.mubr.msk.f32.mxu1 %vm299_vm1, %v5882_v37 }
  0xe9   : > { %v6104_v56 = vpop.f32.mrb[0].mxu1 }
  0xea   : > { %v6106_v57 = vpop.f32.mrb[1].mxu1  ;;  %4962 = vmatmul.mubr.msk.f32.gmra.mrb[106].mxu1 %vm299_vm1, %v5889_v38 }
  0xeb   : > { %4964 = vmatprep.mubr.msk.f32.mxu1 %vm299_vm1, %v5892_v39 }
  0xed   : > { %v6112_v58 = vpop.f32.mrb[2].mxu1 }
  0xee   : > { %v6114_v59 = vpop.f32.mrb[3].mxu1  ;;  %4965 = vmatmul.mubr.msk.f32.gmra.mrb[108].mxu1 %vm299_vm1, %v5899_v40 }
  0xef   : > { %4967 = vmatprep.mubr.msk.f32.mxu1 %vm299_vm1, %v5902_v41 }
  0xf1   : > { %v6120_v60 = vpop.f32.mrb[4].mxu1 }
  0xf2   : > { %v6122_v61 = vpop.f32.mrb[5].mxu1  ;;  %4968 = vmatmul.mubr.msk.f32.gmra.mrb[110].mxu1 %vm299_vm1, %v5909_v42 }
  0xf3   : > { %4970 = vmatprep.mubr.msk.f32.mxu1 %vm299_vm1, %v5912_v43 }
  0xf5   : > { %v6128_v62 = vpop.f32.mrb[6].mxu1 }
  0xf6   : > { %v6130_v63 = vpop.f32.mrb[7].mxu1  ;;  %4971 = vmatmul.mubr.msk.f32.gmra.mrb[112].mxu1 %vm299_vm1, %v5919_v44 }
  0xf7   : > { %4973 = vmatprep.mubr.msk.f32.mxu1 %vm299_vm1, %v5922_v45 }
  0xf9   : > { %v6136_v0 = vpop.f32.mrb[8].mxu1 }
  0xfa   : > { %v6138_v1 = vpop.f32.mrb[9].mxu1  ;;  %4974 = vmatmul.mubr.msk.f32.gmra.mrb[114].mxu1 %vm299_vm1, %v5929_v46 }
  0xfb   : > { %4976 = vmatprep.mubr.msk.f32.mxu1 %vm299_vm1, %v5932_v47 }
  0xfd   : > { %v6144_v2 = vpop.f32.mrb[10].mxu1 }
  0xfe   : > { %v6146_v3 = vpop.f32.mrb[11].mxu1  ;;  %4977 = vmatmul.mubr.msk.f32.gmra.mrb[116].mxu1 %vm299_vm1, %v5939_v48 }
  0xff   : > { %4979 = vmatprep.mubr.msk.f32.mxu1 %vm299_vm1, %v5942_v49 }
 0x101   : > { %v6152_v4 = vpop.f32.mrb[12].mxu1 }
 0x102   : > { %v6154_v5 = vpop.f32.mrb[13].mxu1  ;;  %4980 = vmatmul.mubr.msk.f32.gmra.mrb[118].mxu1 %vm299_vm1, %v5949_v50 }
 0x103   : > { %4988 = vmatprep.mubr.msk.f32.mxu1 %vm299_vm1, %v5739_v7 }
 0x105   : > { %v6160_v6 = vpop.f32.mrb[14].mxu1 }
 0x106   : > { %v6162_v10 = vpop.f32.mrb[15].mxu1  ;;  %4989 = vmatmul.mubr.msk.f32.vlgmr.msra.gmra.mrb[120].mxu1 %vm299_vm1, %v5742_v8 }
 0x107   : > { %4991 = vmatprep.mubr.msk.f32.mxu1 %vm299_vm1, %v5745_v9 }
 0x109   : > { %v6168_v11 = vpop.f32.mrb[16].mxu1 }
 0x10a   : > { %v6170_v12 = vpop.f32.mrb[17].mxu1  ;;  %4992 = vmatmul.mubr.msk.f32.gmra.mrb[122].mxu1 %vm299_vm1, %v5764_v13 }
 0x10b   : > { %4994 = vmatprep.mubr.msk.f32.mxu1 %vm299_vm1, %v5767_v14 }
 0x10d   : > { %v6176_v7 = vpop.f32.mrb[18].mxu1 }
 0x10e   : > { %v6178_v15 = vpop.f32.mrb[19].mxu1  ;;  %4995 = vmatmul.mubr.msk.f32.gmra.mrb[124].mxu1 %vm299_vm1, %v5777_v16 }
 0x10f   : > { %4997 = vmatprep.mubr.msk.f32.mxu1 %vm299_vm1, %v5781_v17 }
 0x111   : > { %v6184_v8 = vpop.f32.mrb[20].mxu1 }
 0x112   : > { %v6186_v9 = vpop.f32.mrb[21].mxu1  ;;  %4998 = vmatmul.mubr.msk.f32.gmra.mrb[126].mxu1 %vm299_vm1, %v5789_v18 }
 0x113   : > { %5000 = vmatprep.mubr.msk.f32.mxu1 %vm299_vm1, %v5792_v19 }
 0x115   : > { %v6192_v13 = vpop.f32.mrb[22].mxu1 }
 0x116   : > { %v6194_v14 = vpop.f32.mrb[23].mxu1  ;;  %5001 = vmatmul.mubr.msk.f32.gmra.mrb[128].mxu1 %vm299_vm1, %v5795_v20 }
 0x117   : > { %7522 = vst [vmem:[#allocation3_spill] sm:$0xff] %v6194_v14  ;;  %5003 = vmatprep.mubr.msk.f32.mxu1 %vm299_vm1, %v5800_v21 }
 0x119   : > { %v6200_v16 = vpop.f32.mrb[24].mxu1 }
 0x11a   : > { %v6202_v17 = vpop.f32.mrb[25].mxu1  ;;  %5004 = vmatmul.mubr.msk.f32.gmra.mrb[130].mxu1 %vm299_vm1, %v5805_v22 }
 0x11b   : > { %7523 = vst [vmem:[#allocation4_spill] sm:$0xff] %v6202_v17  ;;  %5006 = vmatprep.mubr.msk.f32.mxu1 %vm299_vm1, %v5810_v23 }
 0x11d   : > { %v6208_v18 = vpop.f32.mrb[26].mxu1 }
 0x11e   : > { %v6210_v19 = vpop.f32.mrb[27].mxu1  ;;  %5007 = vmatmul.mubr.msk.f32.gmra.mrb[132].mxu1 %vm299_vm1, %v5819_v24 }
 0x11f   : > { %7524 = vst [vmem:[#allocation5_spill] sm:$0xff] %v6210_v19  ;;  %5009 = vmatprep.mubr.msk.f32.mxu1 %vm299_vm1, %v5822_v25 }
 0x121   : > { %v6216_v20 = vpop.f32.mrb[28].mxu1 }
 0x122   : > { %v6218_v21 = vpop.f32.mrb[29].mxu1  ;;  %5010 = vmatmul.mubr.msk.f32.gmra.mrb[134].mxu1 %vm299_vm1, %v5829_v26 }
 0x123   : > { %7525 = vst [vmem:[#allocation6_spill] sm:$0xff] %v6218_v21  ;;  %5012 = vmatprep.mubr.msk.f32.mxu1 %vm299_vm1, %v5832_v27  ;;  %v6455_v21 = vld [vmem:[%s7481_s2 + $0x30] sm:$0xff]  }
 0x124   : > { %7548 = vst [vmem:[#allocation29_spill] sm:$0xff] %v6455_v21 }
 0x125   : > { %v6224_v22 = vpop.f32.mrb[30].mxu1 }
 0x126   : > { %v6226_v23 = vpop.f32.mrb[31].mxu1  ;;  %5013 = vmatmul.mubr.msk.f32.gmra.mrb[136].mxu1 %vm299_vm1, %v5839_v28 }
 0x127   : > { %5015 = vmatprep.mubr.msk.f32.mxu1 %vm299_vm1, %v5842_v29 }
 0x129   : > { %v6232_v24 = vpop.f32.mrb[32].mxu1 }
 0x12a   : > { %v6234_v25 = vpop.f32.mrb[33].mxu1  ;;  %5016 = vmatmul.mubr.msk.f32.gmra.mrb[138].mxu1 %vm299_vm1, %v5849_v30 }
 0x12b   : > { %5018 = vmatprep.mubr.msk.f32.mxu1 %vm299_vm1, %v5852_v31 }
 0x12d   : > { %v6240_v26 = vpop.f32.mrb[34].mxu1 }
 0x12e   : > { %7526 = vst [vmem:[#allocation7_spill] sm:$0xff] %v6240_v26  ;;  %v6242_v27 = vpop.f32.mrb[35].mxu1  ;;  %5019 = vmatmul.mubr.msk.f32.gmra.mrb[140].mxu1 %vm299_vm1, %v5859_v32 }
 0x12f   : > { %7527 = vst [vmem:[#allocation8_spill] sm:$0xff] %v6242_v27  ;;  %5021 = vmatprep.mubr.msk.f32.mxu1 %vm299_vm1, %v5862_v33 }
 0x131   : > { %v6248_v28 = vpop.f32.mrb[36].mxu1 }
 0x132   : > { %7528 = vst [vmem:[#allocation9_spill] sm:$0xff] %v6248_v28  ;;  %v6250_v29 = vpop.f32.mrb[37].mxu1  ;;  %5022 = vmatmul.mubr.msk.f32.gmra.mrb[142].mxu1 %vm299_vm1, %v5869_v34 }
 0x133   : > { %5024 = vmatprep.mubr.msk.f32.mxu1 %vm299_vm1, %v5872_v35 }
 0x135   : > { %v6256_v30 = vpop.f32.mrb[38].mxu1 }
 0x136   : > { %7529 = vst [vmem:[#allocation10_spill] sm:$0xff] %v6256_v30  ;;  %v6258_v31 = vpop.f32.mrb[39].mxu1  ;;  %5025 = vmatmul.mubr.msk.f32.gmra.mrb[144].mxu1 %vm299_vm1, %v5879_v36 }
 0x137   : > { %5027 = vmatprep.mubr.msk.f32.mxu1 %vm299_vm1, %v5882_v37 }
 0x139   : > { %v6264_v32 = vpop.f32.mrb[40].mxu1 }
 0x13a   : > { %v6268_v51 = vpop.f32.mrb[41].mxu1  ;;  %5028 = vmatmul.mubr.msk.f32.gmra.mrb[146].mxu1 %vm299_vm1, %v5889_v38  ;;  %v7551_v28 = vmax.f32 %v6104_v56, %v6264_v32 }
 0x13b   : > { %5030 = vmatprep.mubr.msk.f32.mxu1 %vm299_vm1, %v5892_v39 }
 0x13d   : > { %v6276_v35 = vpop.f32.mrb[42].mxu1 }
 0x13e   : > { %v6280_v37 = vpop.f32.mrb[43].mxu1  ;;  %5031 = vmatmul.mubr.msk.f32.gmra.mrb[148].mxu1 %vm299_vm1, %v5899_v40 }
 0x13f   : > { %5033 = vmatprep.mubr.msk.f32.mxu1 %vm299_vm1, %v5902_v41  ;;  %v7554_v14 = vmax.f32 %v6114_v59, %v6280_v37 }
 0x141   : > { %v6288_v38 = vpop.f32.mrb[44].mxu1 }
 0x142   : > { %v6292_v53 = vpop.f32.mrb[45].mxu1  ;;  %5034 = vmatmul.mubr.msk.f32.gmra.mrb[150].mxu1 %vm299_vm1, %v5909_v42 }
 0x143   : > { %5036 = vmatprep.mubr.msk.f32.mxu1 %vm299_vm1, %v5912_v43 }
 0x145   : > { %v6300_v40 = vpop.f32.mrb[46].mxu1 }
 0x146   : > { %v6304_v55 = vpop.f32.mrb[47].mxu1  ;;  %5037 = vmatmul.mubr.msk.f32.gmra.mrb[152].mxu1 %vm299_vm1, %v5919_v44 }
 0x147   : > { %5039 = vmatprep.mubr.msk.f32.mxu1 %vm299_vm1, %v5922_v45 }
 0x149   : > { %v6312_v42 = vpop.f32.mrb[48].mxu1 }
 0x14a   : > { %v6316_v54 = vpop.f32.mrb[49].mxu1  ;;  %5040 = vmatmul.mubr.msk.f32.gmra.mrb[154].mxu1 %vm299_vm1, %v5929_v46 }
 0x14b   : > { %5042 = vmatprep.mubr.msk.f32.mxu1 %vm299_vm1, %v5932_v47 }
 0x14d   : > { %v6324_v44 = vpop.f32.mrb[50].mxu1 }
 0x14e   : > { %v6328_v39 = vpop.f32.mrb[51].mxu1  ;;  %5043 = vmatmul.mubr.msk.f32.gmra.mrb[156].mxu1 %vm299_vm1, %v5939_v48 }
 0x14f   : > { %5045 = vmatprep.mubr.msk.f32.mxu1 %vm299_vm1, %v5942_v49  ;;  %v5655_v49 = vld [vmem:[%s7481_s2 + $0x28] sm:$0xff]  }
 0x151   : > { %v6336_v46 = vpop.f32.mrb[52].mxu1 }
 0x152   : > { %v6340_v41 = vpop.f32.mrb[53].mxu1  ;;  %5046 = vmatmul.mubr.msk.f32.gmra.mrb[158].mxu1 %vm299_vm1, %v5949_v50 }
 0x155   : > { %v6346_v48 = vpop.f32.mrb[54].mxu1 }
 0x156   : > { %v6350_v52 = vpop.f32.mrb[55].mxu1 }
 0x157   : > { %7530 = vst [vmem:[#allocation11_spill] sm:$0xff] %v6350_v52 }
 0x159   : > { %v6354_v36 = vpop.f32.mrb[56].mxu1 }
 0x15a   : > { %7531 = vst [vmem:[#allocation12_spill] sm:$0xff] %v6354_v36  ;;  %v6358_v34 = vpop.f32.mrb[57].mxu1 }
 0x15b   : > { %7532 = vst [vmem:[#allocation13_spill] sm:$0xff] %v6358_v34 }
 0x15d   : > { %v6362_v45 = vpop.f32.mrb[58].mxu1 }
 0x15e   : > { %7533 = vst [vmem:[#allocation14_spill] sm:$0xff] %v6362_v45  ;;  %v6366_v33 = vpop.f32.mrb[59].mxu1 }
 0x15f   : > { %7534 = vst [vmem:[#allocation15_spill] sm:$0xff] %v6366_v33  ;;  %v5654_v33 = vld [vmem:[%s7481_s2 + $0x20] sm:$0xff]  }
 0x160   : > { %5120 = vmatprep.subr.bf16.mxu0 %v5654_v33 }
 0x161   : > { %v6370_v52 = vpop.f32.mrb[60].mxu1  ;;  %5121 = vmatpush3.bf16.msra.mxu0 %v5654_v33  ;;  %v5656_v33 = vld [vmem:[%s7481_s2 + $0x10] sm:$0xff]  }
 0x162   : > { %v6374_v36 = vpop.f32.mrb[61].mxu1  ;;  %5122 = vmatprep.subr.bf16.mxu0 %v5655_v49  ;;  %5048 = vmatprep.subr.bf16.mxu1 %v5656_v33 }
 0x163   : > { %7535 = vst [vmem:[#allocation16_spill] sm:$0xff] %v6374_v36  ;;  %5049 = vmatpush3.bf16.msra.mxu1 %v5656_v33 }
 0x165   : > { %v6378_v34 = vpop.f32.mrb[62].mxu1  ;;  %5123 = vmatpush3.bf16.msra.mxu0 %v5655_v49  ;;  %v5657_v49 = vld [vmem:[%s7481_s2 + $0x18] sm:$0xff]  }
 0x166   : > { %7536 = vst [vmem:[#allocation17_spill] sm:$0xff] %v6378_v34  ;;  %v6382_v45 = vpop.f32.mrb[63].mxu1  ;;  %5050 = vmatprep.subr.bf16.mxu1 %v5657_v49  ;;  %5156 = vmatprep.subr.bf16.mxu0 %v6455_v21 }
 0x167   : > { %7537 = vst [vmem:[#allocation18_spill] sm:$0xff] %v6382_v45  ;;  %5051 = vmatpush3.bf16.msra.mxu1 %v5657_v49  ;;  %v7553_v49 = vmax.f32 %v6112_v58, %v6276_v35 }
 0x169   : > { %v6389_v47 = vpop.f32.mrb[64].mxu1 }
 0x16a   : > { %v6393_v36 = vpop.f32.mrb[65].mxu1 }
 0x16b   : > { %7538 = vst [vmem:[#allocation19_spill] sm:$0xff] %v6393_v36 }
 0x16d   : > { %v6400_v45 = vpop.f32.mrb[66].mxu1 }
 0x16e   : > { %v6404_v34 = vpop.f32.mrb[67].mxu1 }
 0x16f   : > { %7539 = vst [vmem:[#allocation20_spill] sm:$0xff] %v6404_v34  ;;  %v7552_v34 = vmax.f32 %v6106_v57, %v6268_v51 }
 0x171   : > { %v6411_v43 = vpop.f32.mrb[68].mxu1 }
 0x172   : > { %7540 = vst [vmem:[#allocation21_spill] sm:$0xff] %v6411_v43  ;;  %v6415_v17 = vpop.f32.mrb[69].mxu1 }
 0x173   : > { %7541 = vst [vmem:[#allocation22_spill] sm:$0xff] %v6415_v17 }
 0x175   : > { %v6422_v50 = vpop.f32.mrb[70].mxu1 }
 0x176   : > { %7542 = vst [vmem:[#allocation23_spill] sm:$0xff] %v6422_v50  ;;  %v6426_v19 = vpop.f32.mrb[71].mxu1 }
 0x179   : > { %v6430_v33 = vpop.f32.mrb[72].mxu1 }
 0x17a   : > { %7543 = vst [vmem:[#allocation24_spill] sm:$0xff] %v6430_v33  ;;  %v6434_v17 = vpop.f32.mrb[73].mxu1 }
 0x17d   : > { %v6438_v43 = vpop.f32.mrb[74].mxu1 }
 0x17e   : > { %7544 = vst [vmem:[#allocation25_spill] sm:$0xff] %v6438_v43  ;;  %v6442_v50 = vpop.f32.mrb[75].mxu1 }
 0x17f   : > { %7545 = vst [vmem:[#allocation26_spill] sm:$0xff] %v6442_v50 }
 0x181   : > { %v6446_v36 = vpop.f32.mrb[76].mxu1 }
 0x182   : > { %7546 = vst [vmem:[#allocation27_spill] sm:$0xff] %v6446_v36  ;;  %v6450_v33 = vpop.f32.mrb[77].mxu1 }
 0x183   : > { %7547 = vst [vmem:[#allocation28_spill] sm:$0xff] %v6450_v33 }
 0x185   : > { %v6460_v43 = vpop.f32.mrb[78].mxu1 }
 0x186   : > { %7549 = vst [vmem:[#allocation30_spill] sm:$0xff] %v6460_v43  ;;  %v6464_v50 = vpop.f32.mrb[79].mxu1 }
 0x187   : > { %7550 = vst [vmem:[#allocation31_spill] sm:$0xff] %v6464_v50 }
 0x189   : > { %v4924_v36 = vpop.f32.mrb[80].mxu1 }
 0x18a   : > { %v6471_v27 = vmax.f32 %v7551_v28, %v4924_v36  ;;  %v1066_v26 = vpop.f32.mrb[81].mxu1  ;;  %v7555_v28 = vmax.f32 %v6120_v60, %v6288_v38  ;;  %v7559_v36 = vmax.f32 %v6136_v0, %v6312_v42  ;;  %v7560_v38 = vmax.f32 %v6138_v1, %v6316_v54 }
 0x18b   : > { %v6476_v21 = vmax.f32 %v7552_v34, %v1066_v26  ;;  %v7556_v26 = vmax.f32 %v6122_v61, %v6292_v53  ;;  %v7557_v34 = vmax.f32 %v6128_v62, %v6300_v40  ;;  %v7561_v40 = vmax.f32 %v6144_v2, %v6324_v44 }
 0x18c   : > { %v7563_v42 = vmax.f32 %v6152_v4, %v6336_v46  ;;  %v7564_v54 = vmax.f32 %v6154_v5, %v6340_v41  ;;  %v7565_v44 = vmax.f32 %v6160_v6, %v6346_v48  ;;  %v7568_v46 = vld [vmem:[#allocation12_spill] sm:$0xff]  ;;  %v7570_v41 = vld [vmem:[#allocation13_spill] sm:$0xff]  ;;  %v7572_v48 = vld [vmem:[#allocation14_spill] sm:$0xff] }
 0x18d   : > { %v4927_v33 = vpop.f32.mrb[82].mxu1 }
 0x18e   : > { %v6481_v43 = vmax.f32 %v7553_v49, %v4927_v33  ;;  %v1076_v30 = vpop.f32.mrb[83].mxu1 }
 0x18f   : > { %v6486_v50 = vmax.f32 %v7554_v14, %v1076_v30  ;;  %v7558_v14 = vmax.f32 %v6130_v63, %v6304_v55  ;;  %v7562_v55 = vmax.f32 %v6146_v3, %v6328_v39  ;;  %v7566_v39 = vld [vmem:[#allocation11_spill] sm:$0xff] }
 0x191   : > { %v4930_v56 = vpop.f32.mrb[84].mxu1 }
 0x192   : > { %v6491_v32 = vmax.f32 %v7555_v28, %v4930_v56  ;;  %v1086_v57 = vpop.f32.mrb[85].mxu1 }
 0x193   : > { %v6496_v51 = vmax.f32 %v7556_v26, %v1086_v57  ;;  %v7567_v26 = vmax.f32 %v6162_v10, %v7566_v39  ;;  %v7582_v39 = vld [vmem:[#allocation18_spill] sm:$0xff] }
 0x195   : > { %v4933_v58 = vpop.f32.mrb[86].mxu1 }
 0x196   : > { %v6501_v35 = vmax.f32 %v7557_v34, %v4933_v58  ;;  %v1096_v59 = vpop.f32.mrb[87].mxu1  ;;  %v7569_v34 = vmax.f32 %v6168_v11, %v7568_v46 }
 0x197   : > { %v6506_v30 = vmax.f32 %v7558_v14, %v1096_v59  ;;  %v7571_v14 = vmax.f32 %v6170_v12, %v7570_v41 }
 0x199   : > { %v4936_v60 = vpop.f32.mrb[88].mxu1 }
 0x19a   : > { %v6511_v37 = vmax.f32 %v7559_v36, %v4936_v60  ;;  %v1106_v61 = vpop.f32.mrb[89].mxu1  ;;  %v7573_v36 = vmax.f32 %v6176_v7, %v7572_v48  ;;  %v7588_v48 = vmax.f32 %v6208_v18, %v6400_v45  ;;  %v7597_v45 = vld [vmem:[#allocation23_spill] sm:$0xff] }
 0x19b   : > { %v6516_v53 = vmax.f32 %v7560_v38, %v1106_v61  ;;  %v7574_v38 = vld [vmem:[#allocation15_spill] sm:$0xff] }
 0x19d   : > { %v4939_v62 = vpop.f32.mrb[90].mxu1 }
 0x19e   : > { %v6521_v33 = vmax.f32 %v7561_v40, %v4939_v62  ;;  %v1116_v63 = vpop.f32.mrb[91].mxu1  ;;  %v7575_v62 = vmax.f32 %v6178_v15, %v7574_v38  ;;  %v7589_v38 = vld [vmem:[#allocation5_spill] sm:$0xff] }
 0x19f   : > { %v6526_v49 = vmax.f32 %v7562_v55, %v1116_v63  ;;  %v7576_v63 = vmax.f32 %v6184_v8, %v6370_v52  ;;  %v6591_v8 = vld [vmem:[%s7481_s2] sm:$0xff]   ;;  %v7584_v52 = vmax.f32 %v6200_v16, %v6389_v47  ;;  %v7592_v47 = vld [vmem:[#allocation21_spill] sm:$0xff] }
 0x1a0   : > { %5084 = vmatprep.subr.bf16.mxu1 %v6591_v8 }
 0x1a1   : > { %v4942_v0 = vpop.f32.mrb[92].mxu1 }
 0x1a2   : > { %v6531_v56 = vmax.f32 %v7563_v42, %v4942_v0  ;;  %v1126_v1 = vpop.f32.mrb[93].mxu1  ;;  %v7577_v0 = vld [vmem:[#allocation16_spill] sm:$0xff] }
 0x1a3   : > { %v6536_v28 = vmax.f32 %v7564_v54, %v1126_v1  ;;  %v7578_v42 = vmax.f32 %v6186_v9, %v7577_v0  ;;  %v7579_v54 = vld [vmem:[#allocation17_spill] sm:$0xff] }
 0x1a5   : > { %v4945_v2 = vpop.f32.mrb[94].mxu1 }
 0x1a6   : > { %v6541_v57 = vmax.f32 %v7565_v44, %v4945_v2  ;;  %v1136_v3 = vpop.f32.mrb[95].mxu1  ;;  %v7580_v2 = vmax.f32 %v6192_v13, %v7579_v54  ;;  %v7595_v54 = vld [vmem:[#allocation22_spill] sm:$0xff] }
 0x1a7   : > { %v6546_v58 = vmax.f32 %v7567_v26, %v1136_v3  ;;  %v7581_v3 = vld [vmem:[#allocation3_spill] sm:$0xff] }
 0x1a8   : > { %v7583_v26 = vmax.f32 %v7581_v3, %v7582_v39  ;;  %v7598_v3 = vmax.f32 %v6224_v22, %v7597_v45 }
 0x1a9   : > { %v4948_v4 = vpop.f32.mrb[96].mxu1 }
 0x1aa   : > { %v6551_v59 = vmax.f32 %v7569_v34, %v4948_v4  ;;  %v1146_v5 = vpop.f32.mrb[97].mxu1  ;;  %v7585_v34 = vld [vmem:[#allocation4_spill] sm:$0xff] }
 0x1ab   : > { %v6556_v60 = vmax.f32 %v7571_v14, %v1146_v5  ;;  %v7586_v5 = vld [vmem:[#allocation19_spill] sm:$0xff] }
 0x1ac   : > { %v7587_v41 = vmax.f32 %v7585_v34, %v7586_v5 }
 0x1ad   : > { %v4951_v6 = vpop.f32.mrb[98].mxu1 }
 0x1ae   : > { %v6561_v61 = vmax.f32 %v7573_v36, %v4951_v6  ;;  %v1156_v10 = vpop.f32.mrb[99].mxu1 }
 0x1af   : > { %v6566_v40 = vmax.f32 %v7575_v62, %v1156_v10  ;;  %v7590_v62 = vld [vmem:[#allocation20_spill] sm:$0xff] }
 0x1b1   : > { %v4954_v11 = vpop.f32.mrb[100].mxu1 }
 0x1b2   : > { %v6571_v55 = vmax.f32 %v7576_v63, %v4954_v11  ;;  %v1166_v12 = vpop.f32.mrb[101].mxu1  ;;  %v7591_v11 = vmax.f32 %v7589_v38, %v7590_v62  ;;  %v7604_v38 = vld [vmem:[#allocation25_spill] sm:$0xff] }
 0x1b3   : > { %v6576_v1 = vmax.f32 %v7578_v42, %v1166_v12  ;;  %v7593_v12 = vmax.f32 %v6216_v20, %v7592_v47 }
 0x1b5   : > { %v4957_v7 = vpop.f32.mrb[102].mxu1 }
 0x1b6   : > { %v6581_v44 = vmax.f32 %v7580_v2, %v4957_v7  ;;  %v1176_v15 = vpop.f32.mrb[103].mxu1  ;;  %v7594_v7 = vld [vmem:[#allocation6_spill] sm:$0xff] }
 0x1b7   : > { %v6586_v4 = vmax.f32 %v7583_v26, %v1176_v15  ;;  %v7596_v2 = vmax.f32 %v7594_v7, %v7595_v54  ;;  %v7610_v7 = vld [vmem:[#allocation27_spill] sm:$0xff] }
 0x1b9   : > { %v4960_v9 = vpop.f32.mrb[104].mxu1 }
 0x1ba   : > { %v6597_v13 = vmax.f32 %v7584_v52, %v4960_v9  ;;  %v1186_v46 = vpop.f32.mrb[105].mxu1  ;;  %v7599_v9 = vmax.f32 %v6226_v23, %v6426_v19  ;;  %v7606_v23 = vld [vmem:[#allocation8_spill] sm:$0xff] }
 0x1bb   : > { %v6602_v14 = vmax.f32 %v7587_v41, %v1186_v46  ;;  %v7600_v46 = vld [vmem:[#allocation24_spill] sm:$0xff] }
 0x1bc   : > { %v7601_v34 = vmax.f32 %v6232_v24, %v7600_v46 }
 0x1bd   : > { %v4963_v6 = vpop.f32.mrb[106].mxu1 }
 0x1be   : > { %v6607_v36 = vmax.f32 %v7588_v48, %v4963_v6  ;;  %v1196_v10 = vpop.f32.mrb[107].mxu1  ;;  %v7602_v6 = vmax.f32 %v6234_v25, %v6434_v17  ;;  %v7612_v25 = vld [vmem:[#allocation28_spill] sm:$0xff] }
 0x1bf   : > { %v6612_v63 = vmax.f32 %v7591_v11, %v1196_v10  ;;  %v7603_v10 = vld [vmem:[#allocation7_spill] sm:$0xff] }
 0x1c0   : > { %v7605_v62 = vmax.f32 %v7603_v10, %v7604_v38 }
 0x1c1   : > { %v4966_v16 = vpop.f32.mrb[108].mxu1 }
 0x1c2   : > { %v6617_v0 = vmax.f32 %v7593_v12, %v4966_v16  ;;  %v1206_v42 = vpop.f32.mrb[109].mxu1  ;;  %v7607_v16 = vld [vmem:[#allocation26_spill] sm:$0xff] }
 0x1c3   : > { %v6622_v15 = vmax.f32 %v7596_v2, %v1206_v42  ;;  %v7608_v47 = vmax.f32 %v7606_v23, %v7607_v16  ;;  %v7609_v42 = vld [vmem:[#allocation9_spill] sm:$0xff] }
 0x1c4   : > { %v7611_v54 = vmax.f32 %v7609_v42, %v7610_v7 }
 0x1c5   : > { %v4969_v18 = vpop.f32.mrb[110].mxu1 }
 0x1c6   : > { %v6627_v39 = vmax.f32 %v7598_v3, %v4969_v18  ;;  %v1216_v26 = vpop.f32.mrb[111].mxu1  ;;  %v7613_v18 = vmax.f32 %v6250_v29, %v7612_v25 }
 0x1c7   : > { %v6632_v52 = vmax.f32 %v7599_v9, %v1216_v26  ;;  %v7614_v26 = vld [vmem:[#allocation10_spill] sm:$0xff] }
 0x1c8   : > { %v7615_v9 = vld [vmem:[#allocation30_spill] sm:$0xff] }
 0x1c9   : > { %v4972_v20 = vpop.f32.mrb[112].mxu1 }
 0x1ca   : > { %v6637_v5 = vmax.f32 %v7601_v34, %v4972_v20  ;;  %v1226_v41 = vpop.f32.mrb[113].mxu1  ;;  %v7616_v20 = vmax.f32 %v7614_v26, %v7615_v9 }
 0x1cb   : > { %v6642_v48 = vmax.f32 %v7602_v6, %v1226_v41  ;;  %v7617_v41 = vld [vmem:[#allocation31_spill] sm:$0xff] }
 0x1cc   : > { %v7618_v6 = vmax.f32 %v6258_v31, %v7617_v41 }
 0x1cd   : > { %v4975_v22 = vpop.f32.mrb[114].mxu1 }
 0x1ce   : > { %v6647_v11 = vmax.f32 %v7605_v62, %v4975_v22  ;;  %v1236_v19 = vpop.f32.mrb[115].mxu1 }
 0x1cf   : > { %v6652_v12 = vmax.f32 %v7608_v47, %v1236_v19  ;;  %v7519_v19 = vmov 0.0  }
 0x1d1   : > { %v4978_v24 = vpop.f32.mrb[116].mxu1 }
 0x1d2   : > { %v6657_v2 = vmax.f32 %v7611_v54, %v4978_v24  ;;  %v1246_v17 = vpop.f32.mrb[117].mxu1 }
 0x1d3   : > { %v6662_v45 = vmax.f32 %v7613_v18, %v1246_v17 }
 0x1d5   : > { %v4981_v3 = vpop.f32.mrb[118].mxu1 }
 0x1d6   : > { %v6667_v46 = vmax.f32 %v7616_v20, %v4981_v3  ;;  %v1256_v34 = vpop.f32.mrb[119].mxu1 }
 0x1d7   : > { %v6672_v22 = vmax.f32 %v7618_v6, %v1256_v34 }
 0x1d9   : > { %v4990_v10 = vpop.f32.mrb[120].mxu1 }
 0x1da   : > { %v1574_v38 = vmax.f32 %v6471_v27, %v4990_v10  ;;  %v1374_v62 = vpop.f32.mrb[121].mxu1 }
 0x1db   : > { %v1573_v29 = vmax.f32 %v6476_v21, %v1374_v62 }
 0x1dc   : > { %vm1614_vm2 = vcmp.ge.f32.partialorder %v1574_v38, 1.0 }
 0x1dd   : > { %v6677_v23 = vsel %vm1614_vm2, 1.0, %v7519_v19  ;;  %vm1613_vm3 = vcmp.ge.f32.partialorder %v1573_v29, 1.0  ;;  %v4993_v16 = vpop.f32.mrb[122].mxu1 }
 0x1de   : > { %1694 = vst [vmem:[#allocation2 + $0x8] sm:$0xff] %v6677_v23  ;;  %v6681_v47 = vsel %vm1613_vm3, 1.0, %v7519_v19  ;;  %v1576_v31 = vmax.f32 %v6481_v43, %v4993_v16  ;;  %v1384_v24 = vpop.f32.mrb[123].mxu1 }
 0x1df   : > { %1693 = vst [vmem:[#allocation2] sm:$0xff] %v6681_v47  ;;  %v1575_v27 = vmax.f32 %v6486_v50, %v1384_v24 }
 0x1e0   : > { %vm1616_vm4 = vcmp.ge.f32.partialorder %v1576_v31, 1.0 }
 0x1e1   : > { %v6689_v42 = vsel %vm1616_vm4, 1.0, %v7519_v19  ;;  %vm1615_vm5 = vcmp.ge.f32.partialorder %v1575_v27, 1.0  ;;  %v4996_v7 = vpop.f32.mrb[124].mxu1 }
 0x1e2   : > { %1696 = vst [vmem:[#allocation2 + $0x18] sm:$0xff] %v6689_v42  ;;  %v6693_v54 = vsel %vm1615_vm5, 1.0, %v7519_v19  ;;  %v1578_v43 = vmax.f32 %v6491_v32, %v4996_v7  ;;  %v1394_v17 = vpop.f32.mrb[125].mxu1 }
 0x1e3   : > { %1695 = vst [vmem:[#allocation2 + $0x10] sm:$0xff] %v6693_v54  ;;  %v1577_v50 = vmax.f32 %v6496_v51, %v1394_v17  ;;  %v6702_v18 = vpack.c.bf16 %v6693_v54, %v6677_v23 }
 0x1e4   : > { %vm1618_vm6 = vcmp.ge.f32.partialorder %v1578_v43, 1.0 }
 0x1e5   : > { %v6705_v3 = vsel %vm1618_vm6, 1.0, %v7519_v19  ;;  %vm1617_vm7 = vcmp.ge.f32.partialorder %v1577_v50, 1.0  ;;  %v4999_v26 = vpop.f32.mrb[126].mxu1 }
 0x1e6   : > { %1698 = vst [vmem:[#allocation2 + $0x28] sm:$0xff] %v6705_v3  ;;  %v6709_v32 = vsel %vm1617_vm7, 1.0, %v7519_v19  ;;  %v1580_v51 = vmax.f32 %v6501_v35, %v4999_v26  ;;  %v1404_v9 = vpop.f32.mrb[127].mxu1  ;;  %v1781_v62 = vld [vmem:[#allocation2 + $0x1] sm:$0xff] }
 0x1e7   : > { %1697 = vst [vmem:[#allocation2 + $0x20] sm:$0xff] %v6709_v32  ;;  %v1579_v20 = vmax.f32 %v6506_v30, %v1404_v9  ;;  %v6718_v41 = vpack.c.bf16 %v6709_v32, %v6689_v42 }
 0x1e8   : > { %vm1620_vm8 = vcmp.ge.f32.partialorder %v1580_v51, 1.0 }
 0x1e9   : > { %v6721_v6 = vsel %vm1620_vm8, 1.0, %v7519_v19  ;;  %vm1619_vm9 = vcmp.ge.f32.partialorder %v1579_v20, 1.0  ;;  %v5002_v10 = vpop.f32.mrb[128].mxu1 }
 0x1ea   : > { %1700 = vst [vmem:[#allocation2 + $0x38] sm:$0xff] %v6721_v6  ;;  %v6725_v35 = vsel %vm1619_vm9, 1.0, %v7519_v19  ;;  %v1582_v30 = vmax.f32 %v6511_v37, %v5002_v10  ;;  %v1414_v38 = vpop.f32.mrb[129].mxu1  ;;  %v1782_v29 = vld [vmem:[#allocation2 + $0x9] sm:$0xff]  ;;  %v1783_v16 = vld [vmem:[#allocation2 + $0x11] sm:$0xff] }
 0x1eb   : > { %1699 = vst [vmem:[#allocation2 + $0x30] sm:$0xff] %v6725_v35  ;;  %v1581_v31 = vmax.f32 %v6516_v53, %v1414_v38  ;;  %v6730_v24 = vpack.c.bf16 %v1782_v29, %v1781_v62  ;;  %v6736_v7 = vpack.c.bf16 %v6725_v35, %v6705_v3  ;;  %v6738_v37 = vpack.c.bf16 %v1783_v16, %v1782_v29 }
 0x1ec   : > { %vm1622_vm11 = vcmp.ge.f32.partialorder %v1582_v30, 1.0  ;;  %v5659_v30 = vld [vmem:[%s7481_s2 + $0x38] sm:$0xff]  }
 0x1ed   : > { %v1662_v43 = vsel %vm1622_vm11, 1.0, %v7519_v19  ;;  %vm1621_vm12 = vcmp.ge.f32.partialorder %v1581_v31, 1.0  ;;  %v5005_v17 = vpop.f32.mrb[130].mxu1  ;;  %5124 = vmatprep.mubr.msk.bf16.mxu0 %vm1817_vm10, %v6730_v24 }
 0x1ee   : > { %1702 = vst [vmem:[#allocation2 + $0x48] sm:$0xff] %v1662_v43  ;;  %v1661_v53 = vsel %vm1621_vm12, 1.0, %v7519_v19  ;;  %v1584_v50 = vmax.f32 %v6521_v33, %v5005_v17  ;;  %v1424_v26 = vpop.f32.mrb[131].mxu1  ;;  %v1784_v51 = vld [vmem:[#allocation2 + $0x19] sm:$0xff]  ;;  %v1785_v9 = vld [vmem:[#allocation2 + $0x21] sm:$0xff] }
 0x1ef   : > { %1701 = vst [vmem:[#allocation2 + $0x40] sm:$0xff] %v1661_v53  ;;  %v1583_v20 = vmax.f32 %v6526_v49, %v1424_v26  ;;  %v6746_v10 = vpack.c.bf16 %v1784_v51, %v1783_v16  ;;  %v6752_v38 = vpack.c.bf16 %v1661_v53, %v6721_v6  ;;  %v6754_v62 = vpack.c.bf16 %v1785_v9, %v1784_v51  ;;  %v7619_v53 = vld [vmem:[#allocation29_spill] sm:$0xff] }
 0x1f0   : > { %vm1624_vm13 = vcmp.ge.f32.partialorder %v1584_v50, 1.0 }
 0x1f1   : > { %v1664_v33 = vsel %vm1624_vm13, 1.0, %v7519_v19  ;;  %vm1623_vm14 = vcmp.ge.f32.partialorder %v1583_v20, 1.0  ;;  %v5008_v29 = vpop.f32.mrb[132].mxu1  ;;  %5125 = vmatmul.mubr.msk.bf16.vlgmr.msra.gmra.mrb[0].mxu0 %vm1817_vm10, %v6746_v10  ;;  %v6770_v20 = vld [vmem:[%s7481_s2 + $0x40] sm:$0xff]  }
 0x1f2   : > { %1704 = vst [vmem:[#allocation2 + $0x58] sm:$0xff] %v1664_v33  ;;  %v1663_v49 = vsel %vm1623_vm14, 1.0, %v7519_v19  ;;  %v1586_v16 = vmax.f32 %v6531_v56, %v5008_v29  ;;  %v1434_v31 = vpop.f32.mrb[133].mxu1  ;;  %v1786_v43 = vld [vmem:[#allocation2 + $0x29] sm:$0xff]  ;;  %v1787_v17 = vld [vmem:[#allocation2 + $0x31] sm:$0xff]  ;;  %5157 = vmatpush3.bf16.msra.mxu0 %v7619_v53 }
 0x1f3   : > { %1703 = vst [vmem:[#allocation2 + $0x50] sm:$0xff] %v1663_v49  ;;  %v1585_v50 = vmax.f32 %v6536_v28, %v1434_v31  ;;  %v6763_v26 = vpack.c.bf16 %v1786_v43, %v1785_v9  ;;  %v6765_v51 = vpack.c.bf16 %v1664_v33, %v1663_v49  ;;  %5158 = vmatprep.subr.bf16.mxu0 %v5659_v30 }
 0x1f4   : > { %v6772_v27 = vpack.c.bf16 %v1787_v17, %v1786_v43  ;;  %vm1626_vm15 = vcmp.ge.f32.partialorder %v1586_v16, 1.0 }
 0x1f5   : > { %v1666_v56 = vsel %vm1626_vm15, 1.0, %v7519_v19  ;;  %vm1625_vm0 = vcmp.ge.f32.partialorder %v1585_v50, 1.0  ;;  %v5011_v29 = vpop.f32.mrb[134].mxu1  ;;  %5128 = vmatprep.mubr.msk.bf16.mxu0 %vm1817_vm10, %v6763_v26  ;;  %5052 = vmatprep.mubr.msk.bf16.mxu1 %vm1817_vm10, %v6765_v51  ;;  %v5662_v50 = vld [vmem:[%s7481_s2 + $0x8] sm:$0xff]  }
 0x1f6   : > { %1706 = vst [vmem:[#allocation2 + $0x68] sm:$0xff] %v1666_v56  ;;  %v1665_v28 = vsel %vm1625_vm0, 1.0, %v7519_v19  ;;  %v1588_v9 = vmax.f32 %v6541_v57, %v5011_v29  ;;  %v1444_v49 = vpop.f32.mrb[135].mxu1  ;;  %v6781_v31 = vld [vmem:[#allocation2 + $0x39] sm:$0xff]  ;;  %5159 = vmatpush3.bf16.msra.mxu0 %v5659_v30 }
 0x1f7   : > { %7620 = vst [vmem:[#allocation11_spill] sm:$0xff] %v6781_v31  ;;  %1705 = vst [vmem:[#allocation2 + $0x60] sm:$0xff] %v1665_v28  ;;  %v1587_v16 = vmax.f32 %v6546_v58, %v1444_v49  ;;  %v6785_v43 = vpack.c.bf16 %v6781_v31, %v1787_v17  ;;  %v6787_v53 = vpack.c.bf16 %v1666_v56, %v1665_v28  ;;  %5192 = vmatprep.subr.bf16.mxu0 %v6770_v20 }
 0x1f8   : > { %v6793_v34 = vpack.c.bf16 %v1665_v28, %v1664_v33  ;;  %vm1628_vm1 = vcmp.ge.f32.partialorder %v1588_v9, 1.0 }
 0x1f9   : > { %v1668_v57 = vsel %vm1628_vm1, 1.0, %v7519_v19  ;;  %vm1627_vm2 = vcmp.ge.f32.partialorder %v1587_v16, 1.0  ;;  %v5014_v30 = vpop.f32.mrb[136].mxu1  ;;  %5129 = vmatmul.mubr.msk.bf16.gmra.mrb[4].mxu0 %vm1817_vm10, %v6785_v43  ;;  %5053 = vmatmul.mubr.msk.bf16.vlgmr.msra.gmra.mrb[160].mxu1 %vm1817_vm10, %v6787_v53 }
 0x1fa   : > { %1708 = vst [vmem:[#allocation2 + $0x78] sm:$0xff] %v1668_v57  ;;  %v1667_v58 = vsel %vm1627_vm2, 1.0, %v7519_v19  ;;  %v1590_v17 = vmax.f32 %v6551_v59, %v5014_v30  ;;  %v1454_v29 = vpop.f32.mrb[137].mxu1  ;;  %5085 = vmatpush3.bf16.msra.mxu1 %v6591_v8 }
 0x1fb   : > { %1707 = vst [vmem:[#allocation2 + $0x70] sm:$0xff] %v1667_v58  ;;  %v1589_v33 = vmax.f32 %v6556_v60, %v1454_v29  ;;  %v6804_v28 = vpack.c.bf16 %v1668_v57, %v1667_v58  ;;  %5086 = vmatprep.subr.bf16.mxu1 %v5662_v50  ;;  %v6806_v9 = vpack.c.bf16 %v1667_v58, %v1666_v56  ;;  %v2224_v60 = vld [vmem:[#allocation2 + $0x51] sm:$0xff] }
 0x1fc   : > { %vm1630_vm3 = vcmp.ge.f32.partialorder %v1590_v17, 1.0 }
 0x1fd   : > { %v1670_v49 = vsel %vm1630_vm3, 1.0, %v7519_v19  ;;  %vm1629_vm4 = vcmp.ge.f32.partialorder %v1589_v33, 1.0  ;;  %v5017_v16 = vpop.f32.mrb[138].mxu1  ;;  %5056 = vmatprep.mubr.msk.bf16.mxu1 %vm1817_vm10, %v6804_v28 }
 0x1fe   : > { %1710 = vst [vmem:[#allocation2 + $0x88] sm:$0xff] %v1670_v49  ;;  %v1669_v59 = vsel %vm1629_vm4, 1.0, %v7519_v19  ;;  %v1592_v8 = vmax.f32 %v6561_v61, %v5017_v16  ;;  %v1464_v30 = vpop.f32.mrb[139].mxu1  ;;  %v2225_v29 = vld [vmem:[#allocation2 + $0x59] sm:$0xff]  ;;  %v2226_v25 = vld [vmem:[#allocation2 + $0x61] sm:$0xff]  ;;  %5087 = vmatpush3.bf16.msra.mxu1 %v5662_v50 }
 0x1ff   : > { %1709 = vst [vmem:[#allocation2 + $0x80] sm:$0xff] %v1669_v59  ;;  %v1591_v56 = vmax.f32 %v6566_v40, %v1464_v30  ;;  %v2240_v58 = vpack.c.bf16 %v2225_v29, %v2224_v60  ;;  %v6814_v17 = vpack.c.bf16 %v1670_v49, %v1669_v59  ;;  %v6816_v33 = vpack.c.bf16 %v1669_v59, %v1668_v57 }
 0x200   : > { %vm1632_vm5 = vcmp.ge.f32.partialorder %v1592_v8, 1.0  ;;  %v6818_v21 = vpack.c.bf16 %v2226_v25, %v2225_v29 }
 0x201   : > { %v1672_v31 = vsel %vm1632_vm5, 1.0, %v7519_v19  ;;  %vm1631_vm6 = vcmp.ge.f32.partialorder %v1591_v56, 1.0  ;;  %v5020_v61 = vpop.f32.mrb[140].mxu1  ;;  %5132 = vmatprep.mubr.msk.bf16.mxu0 %vm1817_vm10, %v2240_v58  ;;  %5057 = vmatmul.mubr.msk.bf16.gmra.mrb[164].mxu1 %vm1817_vm10, %v6814_v17 }
 0x202   : > { %1712 = vst [vmem:[#allocation2 + $0x98] sm:$0xff] %v1672_v31  ;;  %v1671_v40 = vsel %vm1631_vm6, 1.0, %v7519_v19  ;;  %v1594_v50 = vmax.f32 %v6571_v55, %v5020_v61  ;;  %v1474_v16 = vpop.f32.mrb[141].mxu1  ;;  %v2227_v57 = vld [vmem:[#allocation2 + $0x69] sm:$0xff]  ;;  %v2228_v59 = vld [vmem:[#allocation2 + $0x71] sm:$0xff]  ;;  %5060 = vmatprep.mubr.msk.bf16.mxu1 %vm1817_vm10, %v6730_v24 }
 0x203   : > { %1711 = vst [vmem:[#allocation2 + $0x90] sm:$0xff] %v1671_v40  ;;  %v1593_v8 = vmax.f32 %v6576_v1, %v1474_v16  ;;  %v2241_v30 = vpack.c.bf16 %v2227_v57, %v2226_v25  ;;  %v6829_v60 = vpack.c.bf16 %v1671_v40, %v1670_v49  ;;  %v6831_v29 = vpack.c.bf16 %v2228_v59, %v2227_v57 }
 0x204   : > { %vm1634_vm7 = vcmp.ge.f32.partialorder %v1594_v50, 1.0 }
 0x205   : > { %v6834_v31 = vsel %vm1634_vm7, 1.0, %v7519_v19  ;;  %vm1633_vm8 = vcmp.ge.f32.partialorder %v1593_v8, 1.0  ;;  %v5023_v55 = vpop.f32.mrb[142].mxu1  ;;  %5133 = vmatmul.mubr.msk.bf16.gmra.mrb[8].mxu0 %vm1817_vm10, %v2241_v30 }
 0x206   : > { %1714 = vst [vmem:[#allocation2 + $0xa8] sm:$0xff] %v6834_v31  ;;  %v1673_v24 = vsel %vm1633_vm8, 1.0, %v7519_v19  ;;  %v1596_v56 = vmax.f32 %v6581_v44, %v5023_v55  ;;  %v1484_v1 = vpop.f32.mrb[143].mxu1  ;;  %v2229_v25 = vld [vmem:[#allocation2 + $0x79] sm:$0xff]  ;;  %v2230_v49 = vld [vmem:[#allocation2 + $0x81] sm:$0xff] }
 0x207   : > { %1713 = vst [vmem:[#allocation2 + $0xa0] sm:$0xff] %v1673_v24  ;;  %v1595_v58 = vmax.f32 %v6586_v4, %v1484_v1  ;;  %v2242_v61 = vpack.c.bf16 %v2229_v25, %v2228_v59  ;;  %v6842_v40 = vpack.c.bf16 %v6834_v31, %v1673_v24  ;;  %v6844_v50 = vpack.c.bf16 %v2230_v49, %v2229_v25 }
 0x208   : > { %vm1636_vm9 = vcmp.ge.f32.partialorder %v1596_v56, 1.0 }
 0x209   : > { %v6847_v16 = vsel %vm1636_vm9, 1.0, %v7519_v19  ;;  %vm1635_vm11 = vcmp.ge.f32.partialorder %v1595_v58, 1.0  ;;  %v5026_v57 = vpop.f32.mrb[144].mxu1  ;;  %5136 = vmatprep.mubr.msk.bf16.mxu0 %vm1817_vm10, %v2242_v61  ;;  %5061 = vmatmul.mubr.msk.bf16.gmra.mrb[168].mxu1 %vm1817_vm10, %v6746_v10 }
 0x20a   : > { %1716 = vst [vmem:[#allocation2 + $0xb8] sm:$0xff] %v6847_v16  ;;  %v6854_v44 = vsel %vm1635_vm11, 1.0, %v7519_v19  ;;  %v1598_v4 = vmax.f32 %v6597_v13, %v5026_v57  ;;  %v1494_v59 = vpop.f32.mrb[145].mxu1  ;;  %v6857_v8 = vld [vmem:[#allocation2 + $0x89] sm:$0xff]  ;;  %5064 = vmatprep.mubr.msk.bf16.mxu1 %vm1817_vm10, %v6763_v26 }
 0x20b   : > { %1715 = vst [vmem:[#allocation2 + $0xb0] sm:$0xff] %v6854_v44  ;;  %v1597_v30 = vmax.f32 %v6602_v14, %v1494_v59  ;;  %v2243_v55 = vpack.c.bf16 %v6857_v8, %v2230_v49  ;;  %v6866_v10 = vpack.c.bf16 %v6847_v16, %v6854_v44 }
 0x20c   : > { %vm1638_vm12 = vcmp.ge.f32.partialorder %v1598_v4, 1.0 }
 0x20d   : > { %v6871_v24 = vsel %vm1638_vm12, 1.0, %v7519_v19  ;;  %vm1637_vm13 = vcmp.ge.f32.partialorder %v1597_v30, 1.0  ;;  %v5029_v56 = vpop.f32.mrb[146].mxu1  ;;  %5137 = vmatmul.mubr.msk.bf16.gmra.mrb[12].mxu0 %vm1817_vm10, %v2243_v55 }
 0x20e   : > { %1718 = vst [vmem:[#allocation2 + $0xc8] sm:$0xff] %v6871_v24  ;;  %v6876_v14 = vsel %vm1637_vm13, 1.0, %v7519_v19  ;;  %v1600_v26 = vmax.f32 %v6607_v36, %v5029_v56  ;;  %v1504_v1 = vpop.f32.mrb[147].mxu1  ;;  %v1789_v59 = vld [vmem:[#allocation2 + $0xa1] sm:$0xff] }
 0x20f   : > { %1717 = vst [vmem:[#allocation2 + $0xc0] sm:$0xff] %v6876_v14  ;;  %v1599_v25 = vmax.f32 %v6612_v63, %v1504_v1  ;;  %v6883_v49 = vpack.c.bf16 %v6871_v24, %v6876_v14 }
 0x210   : > { %vm1640_vm14 = vcmp.ge.f32.partialorder %v1600_v26, 1.0 }
 0x211   : > { %v6888_v61 = vsel %vm1640_vm14, 1.0, %v7519_v19  ;;  %vm1639_vm15 = vcmp.ge.f32.partialorder %v1599_v25, 1.0  ;;  %v5032_v57 = vpop.f32.mrb[148].mxu1  ;;  %5065 = vmatmul.mubr.msk.bf16.gmra.mrb[172].mxu1 %vm1817_vm10, %v6785_v43 }
 0x212   : > { %7621 = vst [vmem:[#allocation12_spill] sm:$0xff] %v6888_v61  ;;  %1720 = vst [vmem:[#allocation2 + $0xd8] sm:$0xff] %v6888_v61  ;;  %v6894_v36 = vsel %vm1639_vm15, 1.0, %v7519_v19  ;;  %v1602_v63 = vmax.f32 %v6617_v0, %v5032_v57  ;;  %v1514_v4 = vpop.f32.mrb[149].mxu1  ;;  %v1790_v30 = vld [vmem:[#allocation2 + $0xa9] sm:$0xff]  ;;  %v1791_v55 = vld [vmem:[#allocation2 + $0xb1] sm:$0xff] }
 0x213   : > { %1719 = vst [vmem:[#allocation2 + $0xd0] sm:$0xff] %v6894_v36  ;;  %v1601_v56 = vmax.f32 %v6622_v15, %v1514_v4  ;;  %v6899_v26 = vpack.c.bf16 %v1790_v30, %v1789_v59  ;;  %v6903_v43 = vpack.c.bf16 %v6888_v61, %v6894_v36  ;;  %v6907_v25 = vpack.c.bf16 %v1791_v55, %v1790_v30 }
 0x214   : > { %vm1642_vm0 = vcmp.ge.f32.partialorder %v1602_v63, 1.0 }
 0x215   : > { %7622 = vst [vmem:[#allocation13_spill] sm:$0xff] %v6907_v25  ;;  %v1682_v0 = vsel %vm1642_vm0, 1.0, %v7519_v19  ;;  %vm1641_vm1 = vcmp.ge.f32.partialorder %v1601_v56, 1.0  ;;  %v5035_v57 = vpop.f32.mrb[150].mxu1  ;;  %5140 = vmatprep.mubr.msk.bf16.mxu0 %vm1817_vm10, %v6899_v26 }
 0x216   : > { %1722 = vst [vmem:[#allocation2 + $0xe8] sm:$0xff] %v1682_v0  ;;  %v6913_v15 = vsel %vm1641_vm1, 1.0, %v7519_v19  ;;  %v1604_v4 = vmax.f32 %v6627_v39, %v5035_v57  ;;  %v1524_v59 = vpop.f32.mrb[151].mxu1  ;;  %v1792_v58 = vld [vmem:[#allocation2 + $0xb9] sm:$0xff]  ;;  %v1793_v13 = vld [vmem:[#allocation2 + $0xc1] sm:$0xff] }
 0x217   : > { %1721 = vst [vmem:[#allocation2 + $0xe0] sm:$0xff] %v6913_v15  ;;  %v1603_v63 = vmax.f32 %v6632_v52, %v1524_v59  ;;  %v6918_v30 = vpack.c.bf16 %v1792_v58, %v1791_v55  ;;  %v6922_v1 = vpack.c.bf16 %v1793_v13, %v1792_v58 }
 0x218   : > { %vm1644_vm2 = vcmp.ge.f32.partialorder %v1604_v4, 1.0 }
 0x219   : > { %7623 = vst [vmem:[#allocation14_spill] sm:$0xff] %v6922_v1  ;;  %v1684_v0 = vsel %vm1644_vm2, 1.0, %v7519_v19  ;;  %vm1643_vm3 = vcmp.ge.f32.partialorder %v1603_v63, 1.0  ;;  %v5038_v25 = vpop.f32.mrb[152].mxu1  ;;  %5141 = vmatmul.mubr.msk.bf16.gmra.mrb[16].mxu0 %vm1817_vm10, %v6918_v30 }
 0x21a   : > { %1724 = vst [vmem:[#allocation2 + $0xf8] sm:$0xff] %v1684_v0  ;;  %v1683_v39 = vsel %vm1643_vm3, 1.0, %v7519_v19  ;;  %v1606_v52 = vmax.f32 %v6637_v5, %v5038_v25  ;;  %v1534_v55 = vpop.f32.mrb[153].mxu1  ;;  %v1794_v57 = vld [vmem:[#allocation2 + $0xc9] sm:$0xff]  ;;  %v1795_v59 = vld [vmem:[#allocation2 + $0xd1] sm:$0xff] }
 0x21b   : > { %1723 = vst [vmem:[#allocation2 + $0xf0] sm:$0xff] %v1683_v39  ;;  %v1605_v58 = vmax.f32 %v6642_v48, %v1534_v55  ;;  %v6930_v56 = vpack.c.bf16 %v1794_v57, %v1793_v13  ;;  %v6932_v4 = vpack.c.bf16 %v1684_v0, %v1683_v39  ;;  %v6934_v63 = vpack.c.bf16 %v1795_v59, %v1794_v57 }
 0x21c   : > { %vm1646_vm4 = vcmp.ge.f32.partialorder %v1606_v52, 1.0 }
 0x21d   : > { %7624 = vst [vmem:[#allocation15_spill] sm:$0xff] %v6934_v63  ;;  %v1686_v1 = vsel %vm1646_vm4, 1.0, %v7519_v19  ;;  %vm1645_vm5 = vcmp.ge.f32.partialorder %v1605_v58, 1.0  ;;  %v5041_v61 = vpop.f32.mrb[154].mxu1  ;;  %5144 = vmatprep.mubr.msk.bf16.mxu0 %vm1817_vm10, %v6930_v56  ;;  %5068 = vmatprep.mubr.msk.bf16.mxu1 %vm1817_vm10, %v6932_v4 }
 0x21e   : > { %1726 = vst [vmem:[#allocation2 + $0x108] sm:$0xff] %v1686_v1  ;;  %v1685_v5 = vsel %vm1645_vm5, 1.0, %v7519_v19  ;;  %v1608_v48 = vmax.f32 %v6647_v11, %v5041_v61  ;;  %v1544_v13 = vpop.f32.mrb[155].mxu1  ;;  %v6943_v25 = vld [vmem:[#allocation2 + $0xd9] sm:$0xff] }
 0x21f   : > { %7625 = vst [vmem:[#allocation16_spill] sm:$0xff] %v6943_v25  ;;  %1725 = vst [vmem:[#allocation2 + $0x100] sm:$0xff] %v1685_v5  ;;  %v1607_v39 = vmax.f32 %v6652_v12, %v1544_v13  ;;  %v6947_v52 = vpack.c.bf16 %v6943_v25, %v1795_v59  ;;  %v6949_v55 = vpack.c.bf16 %v1686_v1, %v1685_v5 }
 0x220   : > { %v6951_v57 = vpack.c.bf16 %v1685_v5, %v1684_v0  ;;  %vm1648_vm6 = vcmp.ge.f32.partialorder %v1608_v48, 1.0 }
 0x221   : > { %v1688_v58 = vsel %vm1648_vm6, 1.0, %v7519_v19  ;;  %vm1647_vm7 = vcmp.ge.f32.partialorder %v1607_v39, 1.0  ;;  %v5044_v63 = vpop.f32.mrb[156].mxu1  ;;  %5145 = vmatmul.mubr.msk.bf16.gmra.mrb[20].mxu0 %vm1817_vm10, %v6947_v52  ;;  %5069 = vmatmul.mubr.msk.bf16.gmra.mrb[176].mxu1 %vm1817_vm10, %v6949_v55 }
 0x222   : > { %1728 = vst [vmem:[#allocation2 + $0x118] sm:$0xff] %v1688_v58  ;;  %v1687_v11 = vsel %vm1647_vm7, 1.0, %v7519_v19  ;;  %v1610_v12 = vmax.f32 %v6657_v2, %v5044_v63  ;;  %v1554_v61 = vpop.f32.mrb[157].mxu1  ;;  %v2232_v25 = vld [vmem:[#allocation2 + $0xf1] sm:$0xff] }
 0x223   : > { %1727 = vst [vmem:[#allocation2 + $0x110] sm:$0xff] %v1687_v11  ;;  %v1609_v0 = vmax.f32 %v6662_v45, %v1554_v61  ;;  %v6961_v59 = vpack.c.bf16 %v1688_v58, %v1687_v11  ;;  %v6963_v5 = vpack.c.bf16 %v1687_v11, %v1686_v1 }
 0x224   : > { %vm1650_vm8 = vcmp.ge.f32.partialorder %v1610_v12, 1.0 }
 0x225   : > { %v1690_v48 = vsel %vm1650_vm8, 1.0, %v7519_v19  ;;  %vm1649_vm9 = vcmp.ge.f32.partialorder %v1609_v0, 1.0  ;;  %v5047_v13 = vpop.f32.mrb[158].mxu1  ;;  %5072 = vmatprep.mubr.msk.bf16.mxu1 %vm1817_vm10, %v6961_v59 }
 0x226   : > { %1730 = vst [vmem:[#allocation2 + $0x128] sm:$0xff] %v1690_v48  ;;  %v1689_v39 = vsel %vm1649_vm9, 1.0, %v7519_v19  ;;  %v1612_v2 = vmax.f32 %v6667_v46, %v5047_v13  ;;  %v1564_v63 = vpop.f32.mrb[159].mxu1  ;;  %v6970_v45 = vld [vmem:[#allocation2 + $0xf9] sm:$0xff]  ;;  %v6972_v61 = vld [vmem:[#allocation2 + $0x101] sm:$0xff]  ;;  %v7627_v46 = vpack.c.bf16 %v6677_v23, %v6681_v47  ;;  %v7628_v23 = vpack.c.bf16 %v6689_v42, %v6693_v54 }
 0x227   : > { %1729 = vst [vmem:[#allocation2 + $0x120] sm:$0xff] %v1689_v39  ;;  %v1611_v1 = vmax.f32 %v6672_v22, %v1564_v63  ;;  %v6976_v11 = vpack.c.bf16 %v6970_v45, %v2232_v25  ;;  %v6978_v12 = vpack.c.bf16 %v1690_v48, %v1689_v39  ;;  %v6980_v0 = vpack.c.bf16 %v1689_v39, %v1688_v58  ;;  %v5663_v63 = vld [vmem:[%s7481_s2 + $0x48] sm:$0xff]   ;;  %v5665_v42 = vld [vmem:[%s7481_s2 + $0x58] sm:$0xff]   ;;  %v5666_v54 = vld [vmem:[%s7481_s2 + $0x60] sm:$0xff]  }
 0x228   : > { %vm1652_vm11 = vcmp.ge.f32.partialorder %v1612_v2, 1.0  ;;  %v7629_v47 = vpack.c.bf16 %v6705_v3, %v6709_v32  ;;  %v2737_v3 = vld [vmem:[#allocation2 + $0x41] sm:$0xff] }
 0x229   : > { %v1692_v13 = vsel %vm1652_vm11, 1.0, %v7519_v19  ;;  %vm1651_vm12 = vcmp.ge.f32.partialorder %v1611_v1, 1.0  ;;  %5148 = vmatprep.mubr.msk.bf16.mxu0 %vm1817_vm10, %v6976_v11  ;;  %5073 = vmatmul.mubr.msk.bf16.gmra.mrb[180].mxu1 %vm1817_vm10, %v6978_v12  ;;  %v7631_v32 = vld [vmem:[#allocation11_spill] sm:$0xff] }
 0x22a   : > { %1732 = vst [vmem:[#allocation2 + $0x138] sm:$0xff] %v1692_v13  ;;  %v1691_v22 = vsel %vm1651_vm12, 1.0, %v7519_v19  ;;  %v6990_v25 = vld [vmem:[#allocation2 + $0x109] sm:$0xff]  ;;  %v6992_v58 = vld [vmem:[#allocation2 + $0x111] sm:$0xff]  ;;  %5076 = vmatprep.mubr.msk.bf16.mxu1 %vm1817_vm10, %v6899_v26 }
 0x22b   : > { %1731 = vst [vmem:[#allocation2 + $0x130] sm:$0xff] %v1691_v22  ;;  %v6998_v39 = vpack.c.bf16 %v6990_v25, %v6972_v61  ;;  %v7000_v2 = vpack.c.bf16 %v1691_v22, %v1690_v48 }
 0x22d   : > { %5149 = vmatmul.mubr.msk.bf16.gmra.mrb[24].mxu0 %vm1817_vm10, %v6998_v39 }
 0x22e   : > { %v7006_v1 = vld [vmem:[#allocation2 + $0x119] sm:$0xff]  ;;  %v7008_v13 = vld [vmem:[#allocation2 + $0x121] sm:$0xff] }
 0x22f   : > { %v7012_v19 = vpack.c.bf16 %v7006_v1, %v6992_v58 }
 0x231   : > { %5152 = vmatprep.mubr.msk.bf16.mxu0 %vm1817_vm10, %v7012_v19  ;;  %5077 = vmatmul.mubr.msk.bf16.gmra.mrb[184].mxu1 %vm1817_vm10, %v6918_v30 }
 0x232   : > { %v7020_v48 = vld [vmem:[#allocation2 + $0x129] sm:$0xff]  ;;  %5080 = vmatprep.mubr.msk.bf16.mxu1 %vm1817_vm10, %v6930_v56 }
 0x233   : > { %7626 = vst [vmem:[#allocation17_spill] sm:$0xff] %v7020_v48  ;;  %v7026_v22 = vpack.c.bf16 %v7020_v48, %v7008_v13  ;;  %v5664_v48 = vld [vmem:[%s7481_s2 + $0x50] sm:$0xff]  }
 0x235   : > { %5153 = vmatmul.mubr.msk.bf16.gmra.mrb[28].mxu0 %vm1817_vm10, %v7026_v22 }
 0x236   : > { %5160 = vmatprep.mubr.msk.bf16.mxu0 %vm1817_vm10, %v6842_v40 }
 0x239   : > { %5081 = vmatmul.mubr.msk.bf16.gmra.mrb[188].mxu1 %vm1817_vm10, %v6947_v52 }
 0x23a   : > { %5088 = vmatprep.mubr.msk.bf16.mxu1 %vm1817_vm10, %v7627_v46  ;;  %v5671_v46 = vld [vmem:[%s7481_s2 + $0x88] sm:$0xff]  }
 0x23d   : > { %5161 = vmatmul.mubr.msk.bf16.vlgmr.msra.gmra.mrb[0].mxu0 %vm1817_vm10, %v6866_v10 }
 0x23e   : > { %5164 = vmatprep.mubr.msk.bf16.mxu0 %vm1817_vm10, %v6883_v49  ;;  %5193 = vmatpush3.bf16.msra.mxu0 %v6770_v20  ;;  %v7630_v20 = vpack.c.bf16 %v6721_v6, %v6725_v35  ;;  %v7148_v6 = vpack.c.bf16 %v2737_v3, %v7631_v32  ;;  %v5667_v35 = vld [vmem:[%s7481_s2 + $0x68] sm:$0xff]   ;;  %v7638_v3 = vld [vmem:[#allocation14_spill] sm:$0xff]  ;;  %v7639_v32 = vld [vmem:[#allocation15_spill] sm:$0xff] }
 0x23f   : > { %5194 = vmatprep.subr.bf16.mxu0 %v5663_v63 }
 0x241   : > { %5089 = vmatmul.mubr.msk.bf16.vlgmr.msra.gmra.mrb[160].mxu1 %vm1817_vm10, %v7628_v23 }
 0x242   : > { %5092 = vmatprep.mubr.msk.bf16.mxu1 %vm1817_vm10, %v7629_v47  ;;  %5195 = vmatpush3.bf16.msra.mxu0 %v5663_v63 }
 0x243   : > { %5228 = vmatprep.subr.bf16.mxu0 %v5664_v48 }
 0x245   : > { %5165 = vmatmul.mubr.msk.bf16.gmra.mrb[4].mxu0 %vm1817_vm10, %v6903_v43 }
 0x246   : > { %5168 = vmatprep.mubr.msk.bf16.mxu0 %vm1817_vm10, %v6932_v4 }
 0x249   : > { %5093 = vmatmul.mubr.msk.bf16.gmra.mrb[164].mxu1 %vm1817_vm10, %v7630_v20 }
 0x24a   : > { %5096 = vmatprep.mubr.msk.bf16.mxu1 %vm1817_vm10, %v6765_v51  ;;  %v5668_v51 = vld [vmem:[%s7481_s2 + $0x70] sm:$0xff]  }
 0x24d   : > { %5169 = vmatmul.mubr.msk.bf16.gmra.mrb[8].mxu0 %vm1817_vm10, %v6949_v55 }
 0x24e   : > { %5172 = vmatprep.mubr.msk.bf16.mxu0 %vm1817_vm10, %v6961_v59 }
 0x251   : > { %5097 = vmatmul.mubr.msk.bf16.gmra.mrb[168].mxu1 %vm1817_vm10, %v6787_v53 }
 0x252   : > { %5100 = vmatprep.mubr.msk.bf16.mxu1 %vm1817_vm10, %v6804_v28  ;;  %v5669_v28 = vld [vmem:[%s7481_s2 + $0x78] sm:$0xff]  }
 0x255   : > { %5173 = vmatmul.mubr.msk.bf16.gmra.mrb[12].mxu0 %vm1817_vm10, %v6978_v12 }
 0x256   : > { %5176 = vmatprep.mubr.msk.bf16.mxu0 %vm1817_vm10, %v6702_v18 }
 0x259   : > { %5101 = vmatmul.mubr.msk.bf16.gmra.mrb[172].mxu1 %vm1817_vm10, %v6814_v17  ;;  %v5670_v17 = vld [vmem:[%s7481_s2 + $0x80] sm:$0xff]  }
 0x25a   : > { %5104 = vmatprep.mubr.msk.bf16.mxu1 %vm1817_vm10, %v6842_v40 }
 0x25d   : > { %5177 = vmatmul.mubr.msk.bf16.gmra.mrb[16].mxu0 %vm1817_vm10, %v6718_v41 }
 0x25e   : > { %5180 = vmatprep.mubr.msk.bf16.mxu0 %vm1817_vm10, %v6736_v7 }
 0x261   : > { %5105 = vmatmul.mubr.msk.bf16.gmra.mrb[176].mxu1 %vm1817_vm10, %v6866_v10  ;;  %v7633_v10 = vpack.c.bf16 %v6876_v14, %v6847_v16 }
 0x262   : > { %5108 = vmatprep.mubr.msk.bf16.mxu1 %vm1817_vm10, %v6883_v49 }
 0x265   : > { %5181 = vmatmul.mubr.msk.bf16.gmra.mrb[20].mxu0 %vm1817_vm10, %v6752_v38 }
 0x266   : > { %5184 = vmatprep.mubr.msk.bf16.mxu0 %vm1817_vm10, %v6793_v34 }
 0x269   : > { %5109 = vmatmul.mubr.msk.bf16.gmra.mrb[180].mxu1 %vm1817_vm10, %v6903_v43 }
 0x26a   : > { %5112 = vmatprep.mubr.msk.bf16.mxu1 %vm1817_vm10, %v6932_v4 }
 0x26d   : > { %5185 = vmatmul.mubr.msk.bf16.gmra.mrb[24].mxu0 %vm1817_vm10, %v6806_v9 }
 0x26e   : > { %5188 = vmatprep.mubr.msk.bf16.mxu0 %vm1817_vm10, %v6816_v33 }
 0x271   : > { %5113 = vmatmul.mubr.msk.bf16.gmra.mrb[184].mxu1 %vm1817_vm10, %v6949_v55 }
 0x272   : > { %5116 = vmatprep.mubr.msk.bf16.mxu1 %vm1817_vm10, %v6961_v59 }
 0x275   : > { %5189 = vmatmul.mubr.msk.bf16.gmra.mrb[28].mxu0 %vm1817_vm10, %v6829_v60 }
 0x276   : > { %5196 = vmatprep.mubr.msk.bf16.mxu0 %vm1817_vm10, %v6932_v4 }
 0x279   : > { %5117 = vmatmul.mubr.msk.bf16.gmra.mrb[188].mxu1 %vm1817_vm10, %v6978_v12 }
 0x27d   : > { %5197 = vmatmul.mubr.msk.bf16.vlgmr.msra.gmra.mrb[0].mxu0 %vm1817_vm10, %v6949_v55 }
 0x27e   : > { %5200 = vmatprep.mubr.msk.bf16.mxu0 %vm1817_vm10, %v6961_v59  ;;  %5229 = vmatpush3.bf16.msra.mxu0 %v5664_v48 }
 0x27f   : > { %5230 = vmatprep.subr.bf16.mxu0 %v5665_v42 }
 0x282   : > { %5231 = vmatpush3.bf16.msra.mxu0 %v5665_v42 }
 0x283   : > { %5264 = vmatprep.subr.bf16.mxu0 %v5666_v54 }
 0x285   : > { %5201 = vmatmul.mubr.msk.bf16.gmra.mrb[4].mxu0 %vm1817_vm10, %v6978_v12 }
 0x286   : > { %5204 = vmatprep.mubr.msk.bf16.mxu0 %vm1817_vm10, %v6899_v26 }
 0x28d   : > { %5205 = vmatmul.mubr.msk.bf16.gmra.mrb[8].mxu0 %vm1817_vm10, %v6918_v30 }
 0x28e   : > { %5208 = vmatprep.mubr.msk.bf16.mxu0 %vm1817_vm10, %v6930_v56 }
 0x295   : > { %5209 = vmatmul.mubr.msk.bf16.gmra.mrb[12].mxu0 %vm1817_vm10, %v6947_v52 }
 0x296   : > { %5212 = vmatprep.mubr.msk.bf16.mxu0 %vm1817_vm10, %v6793_v34 }
 0x29d   : > { %5213 = vmatmul.mubr.msk.bf16.gmra.mrb[16].mxu0 %vm1817_vm10, %v6806_v9 }
 0x29e   : > { %5216 = vmatprep.mubr.msk.bf16.mxu0 %vm1817_vm10, %v6816_v33 }
 0x2a5   : > { %5217 = vmatmul.mubr.msk.bf16.gmra.mrb[20].mxu0 %vm1817_vm10, %v6829_v60 }
 0x2a6   : > { %5220 = vmatprep.mubr.msk.bf16.mxu0 %vm1817_vm10, %v6738_v37 }
 0x2ad   : > { %5221 = vmatmul.mubr.msk.bf16.gmra.mrb[24].mxu0 %vm1817_vm10, %v6754_v62 }
 0x2ae   : > { %5224 = vmatprep.mubr.msk.bf16.mxu0 %vm1817_vm10, %v6772_v27 }
 0x2b5   : > { %5225 = vmatmul.mubr.msk.bf16.gmra.mrb[28].mxu0 %vm1817_vm10, %v7148_v6 }
 0x2b6   : > { %5232 = vmatprep.mubr.msk.bf16.mxu0 %vm1817_vm10, %v6899_v26  ;;  %v7634_v26 = vpack.c.bf16 %v6894_v36, %v6871_v24 }
 0x2bd   : > { %5233 = vmatmul.mubr.msk.bf16.vlgmr.msra.gmra.mrb[0].mxu0 %vm1817_vm10, %v6918_v30  ;;  %v7635_v30 = vld [vmem:[#allocation12_spill] sm:$0xff] }
 0x2be   : > { %5236 = vmatprep.mubr.msk.bf16.mxu0 %vm1817_vm10, %v6930_v56  ;;  %5265 = vmatpush3.bf16.msra.mxu0 %v5666_v54  ;;  %v7636_v56 = vpack.c.bf16 %v6913_v15, %v7635_v30  ;;  %v7637_v54 = vld [vmem:[#allocation13_spill] sm:$0xff] }
 0x2bf   : > { %5266 = vmatprep.subr.bf16.mxu0 %v5667_v35 }
 0x2c2   : > { %5267 = vmatpush3.bf16.msra.mxu0 %v5667_v35  ;;  %v3448_v35 = vld [vmem:[#allocation2 + $0xe1] sm:$0xff] }
 0x2c3   : > { %5300 = vmatprep.subr.bf16.mxu0 %v5668_v51 }
 0x2c5   : > { %5237 = vmatmul.mubr.msk.bf16.gmra.mrb[4].mxu0 %vm1817_vm10, %v6947_v52 }
 0x2c6   : > { %5240 = vmatprep.mubr.msk.bf16.mxu0 %vm1817_vm10, %v6976_v11 }
 0x2cd   : > { %5241 = vmatmul.mubr.msk.bf16.gmra.mrb[8].mxu0 %vm1817_vm10, %v6998_v39 }
 0x2ce   : > { %5244 = vmatprep.mubr.msk.bf16.mxu0 %vm1817_vm10, %v7012_v19  ;;  %v2966_v19 = vld [vmem:[#allocation2 + $0x91] sm:$0xff] }
 0x2cf   : > { %v7189_v53 = vpack.c.bf16 %v2966_v19, %v6857_v8 }
 0x2d5   : > { %5245 = vmatmul.mubr.msk.bf16.gmra.mrb[12].mxu0 %vm1817_vm10, %v7026_v22 }
 0x2d6   : > { %5248 = vmatprep.mubr.msk.bf16.mxu0 %vm1817_vm10, %v6738_v37 }
 0x2dd   : > { %5249 = vmatmul.mubr.msk.bf16.gmra.mrb[16].mxu0 %vm1817_vm10, %v6754_v62 }
 0x2de   : > { %5252 = vmatprep.mubr.msk.bf16.mxu0 %vm1817_vm10, %v6772_v27 }
 0x2e5   : > { %5253 = vmatmul.mubr.msk.bf16.gmra.mrb[20].mxu0 %vm1817_vm10, %v7148_v6 }
 0x2e6   : > { %5256 = vmatprep.mubr.msk.bf16.mxu0 %vm1817_vm10, %v6818_v21 }
 0x2ed   : > { %5257 = vmatmul.mubr.msk.bf16.gmra.mrb[24].mxu0 %vm1817_vm10, %v6831_v29 }
 0x2ee   : > { %5260 = vmatprep.mubr.msk.bf16.mxu0 %vm1817_vm10, %v6844_v50 }
 0x2f5   : > { %5261 = vmatmul.mubr.msk.bf16.gmra.mrb[28].mxu0 %vm1817_vm10, %v7189_v53 }
 0x2f6   : > { %5268 = vmatprep.mubr.msk.bf16.mxu0 %vm1817_vm10, %v6702_v18 }
 0x2fd   : > { %5269 = vmatmul.mubr.msk.bf16.vlgmr.msra.gmra.mrb[0].mxu0 %vm1817_vm10, %v6718_v41 }
 0x2fe   : > { %5272 = vmatprep.mubr.msk.bf16.mxu0 %vm1817_vm10, %v6736_v7  ;;  %5301 = vmatpush3.bf16.msra.mxu0 %v5668_v51  ;;  %v7632_v7 = vpack.c.bf16 %v6854_v44, %v6834_v31 }
 0x2ff   : > { %5302 = vmatprep.subr.bf16.mxu0 %v5669_v28 }
 0x302   : > { %5303 = vmatpush3.bf16.msra.mxu0 %v5669_v28 }
 0x303   : > { %5336 = vmatprep.subr.bf16.mxu0 %v5670_v17 }
 0x305   : > { %5273 = vmatmul.mubr.msk.bf16.gmra.mrb[4].mxu0 %vm1817_vm10, %v6752_v38 }
 0x306   : > { %5276 = vmatprep.mubr.msk.bf16.mxu0 %vm1817_vm10, %v6793_v34 }
 0x30d   : > { %5277 = vmatmul.mubr.msk.bf16.gmra.mrb[8].mxu0 %vm1817_vm10, %v6806_v9 }
 0x30e   : > { %5280 = vmatprep.mubr.msk.bf16.mxu0 %vm1817_vm10, %v6816_v33 }
 0x314   : > { %v7213_v18 = vpop.f32.mrb[160].mxu1 }
 0x315   : > { %5281 = vmatmul.mubr.msk.bf16.gmra.mrb[12].mxu0 %vm1817_vm10, %v6829_v60  ;;  %v7217_v41 = vpop.f32.mrb[161].mxu1 }
 0x316   : > { %5284 = vmatprep.mubr.msk.bf16.mxu0 %vm1817_vm10, %v7632_v7  ;;  %v7223_v38 = vpop.f32.mrb[162].mxu1 }
 0x317   : > { %v7225_v40 = vpop.f32.mrb[163].mxu1 }
 0x31c   : > { %v7227_v8 = vpop.f32.mrb[164].mxu1 }
 0x31d   : > { %5285 = vmatmul.mubr.msk.bf16.gmra.mrb[16].mxu0 %vm1817_vm10, %v7633_v10  ;;  %v7233_v49 = vpop.f32.mrb[165].mxu1 }
 0x31e   : > { %5288 = vmatprep.mubr.msk.bf16.mxu0 %vm1817_vm10, %v7634_v26  ;;  %v7239_v31 = vpop.f32.mrb[166].mxu1 }
 0x31f   : > { %v7241_v44 = vpop.f32.mrb[167].mxu1 }
 0x324   : > { %v7243_v43 = vpop.f32.mrb[168].mxu1 }
 0x325   : > { %5289 = vmatmul.mubr.msk.bf16.gmra.mrb[20].mxu0 %vm1817_vm10, %v7636_v56  ;;  %v7249_v16 = vpop.f32.mrb[169].mxu1 }
 0x326   : > { %5292 = vmatprep.mubr.msk.bf16.mxu0 %vm1817_vm10, %v6951_v57  ;;  %v7253_v14 = vpop.f32.mrb[170].mxu1 }
 0x327   : > { %v7255_v24 = vpop.f32.mrb[171].mxu1 }
 0x32c   : > { %v7257_v36 = vpop.f32.mrb[172].mxu1 }
 0x32d   : > { %5293 = vmatmul.mubr.msk.bf16.gmra.mrb[24].mxu0 %vm1817_vm10, %v6963_v5  ;;  %v7261_v4 = vpop.f32.mrb[173].mxu1 }
 0x32e   : > { %5296 = vmatprep.mubr.msk.bf16.mxu0 %vm1817_vm10, %v6980_v0  ;;  %v7265_v15 = vpop.f32.mrb[174].mxu1 }
 0x32f   : > { %v7267_v52 = vpop.f32.mrb[175].mxu1 }
 0x334   : > { %v7269_v55 = vpop.f32.mrb[176].mxu1 }
 0x335   : > { %5297 = vmatmul.mubr.msk.bf16.gmra.mrb[28].mxu0 %vm1817_vm10, %v7000_v2  ;;  %v7273_v59 = vpop.f32.mrb[177].mxu1 }
 0x336   : > { %5304 = vmatprep.mubr.msk.bf16.mxu0 %vm1817_vm10, %v6793_v34  ;;  %v7277_v11 = vpop.f32.mrb[178].mxu1 }
 0x337   : > { %v7279_v12 = vpop.f32.mrb[179].mxu1 }
 0x33c   : > { %v7284_v39 = vpop.f32.mrb[180].mxu1 }
 0x33d   : > { %5305 = vmatmul.mubr.msk.bf16.vlgmr.msra.gmra.mrb[0].mxu0 %vm1817_vm10, %v6806_v9  ;;  %v7288_v63 = vpop.f32.mrb[181].mxu1 }
 0x33e   : > { %5308 = vmatprep.mubr.msk.bf16.mxu0 %vm1817_vm10, %v6816_v33  ;;  %5337 = vmatpush3.bf16.msra.mxu0 %v5670_v17  ;;  %v7292_v34 = vpop.f32.mrb[182].mxu1 }
 0x33f   : > { %v7294_v48 = vpop.f32.mrb[183].mxu1  ;;  %5338 = vmatprep.subr.bf16.mxu0 %v5671_v46 }
 0x342   : > { %5339 = vmatpush3.bf16.msra.mxu0 %v5671_v46 }
 0x344   : > { %v7296_v22 = vpop.f32.mrb[184].mxu1 }
 0x345   : > { %5309 = vmatmul.mubr.msk.bf16.gmra.mrb[4].mxu0 %vm1817_vm10, %v6829_v60  ;;  %v7300_v23 = vpop.f32.mrb[185].mxu1 }
 0x346   : > { %5312 = vmatprep.mubr.msk.bf16.mxu0 %vm1817_vm10, %v6738_v37  ;;  %v7304_v9 = vpop.f32.mrb[186].mxu1 }
 0x347   : > { %v7306_v33 = vpop.f32.mrb[187].mxu1 }
 0x34c   : > { %v7308_v47 = vpop.f32.mrb[188].mxu1 }
 0x34d   : > { %5313 = vmatmul.mubr.msk.bf16.gmra.mrb[8].mxu0 %vm1817_vm10, %v6754_v62  ;;  %v7312_v20 = vpop.f32.mrb[189].mxu1 }
 0x34e   : > { %5316 = vmatprep.mubr.msk.bf16.mxu0 %vm1817_vm10, %v6772_v27  ;;  %v7316_v60 = vpop.f32.mrb[190].mxu1 }
 0x34f   : > { %v7318_v42 = vpop.f32.mrb[191].mxu1 }
 0x355   : > { %5317 = vmatmul.mubr.msk.bf16.gmra.mrb[12].mxu0 %vm1817_vm10, %v7148_v6 }
 0x356   : > { %5320 = vmatprep.mubr.msk.bf16.mxu0 %vm1817_vm10, %v6951_v57  ;;  %v7640_v57 = vld [vmem:[#allocation16_spill] sm:$0xff] }
 0x357   : > { %v3452_v51 = vpack.c.bf16 %v3448_v35, %v7640_v57 }
 0x35d   : > { %5321 = vmatmul.mubr.msk.bf16.gmra.mrb[16].mxu0 %vm1817_vm10, %v6963_v5 }
 0x35e   : > { %5324 = vmatprep.mubr.msk.bf16.mxu0 %vm1817_vm10, %v6980_v0 }
 0x365   : > { %5325 = vmatmul.mubr.msk.bf16.gmra.mrb[20].mxu0 %vm1817_vm10, %v7000_v2 }
 0x366   : > { %5328 = vmatprep.mubr.msk.bf16.mxu0 %vm1817_vm10, %v7637_v54 }
 0x36d   : > { %5329 = vmatmul.mubr.msk.bf16.gmra.mrb[24].mxu0 %vm1817_vm10, %v7638_v3 }
 0x36e   : > { %5332 = vmatprep.mubr.msk.bf16.mxu0 %vm1817_vm10, %v7639_v32 }
 0x375   : > { %5333 = vmatmul.mubr.msk.bf16.gmra.mrb[28].mxu0 %vm1817_vm10, %v3452_v51 }
 0x376   : > { %5340 = vmatprep.mubr.msk.bf16.mxu0 %vm1817_vm10, %v6738_v37  ;;  %v7643_v37 = vpack.c.bf16 %v7008_v13, %v7006_v1 }
 0x37d   : > { %5341 = vmatmul.mubr.msk.bf16.vlgmr.msra.gmra.mrb[0].mxu0 %vm1817_vm10, %v6754_v62  ;;  %v3677_v62 = vld [vmem:[#allocation2 + $0x131] sm:$0xff] }
 0x37e   : > { %5344 = vmatprep.mubr.msk.bf16.mxu0 %vm1817_vm10, %v6772_v27  ;;  %v7642_v27 = vpack.c.bf16 %v6992_v58, %v6990_v25 }
 0x385   : > { %5345 = vmatmul.mubr.msk.bf16.gmra.mrb[4].mxu0 %vm1817_vm10, %v7148_v6 }
 0x386   : > { %5348 = vmatprep.mubr.msk.bf16.mxu0 %vm1817_vm10, %v6818_v21  ;;  %v7641_v21 = vpack.c.bf16 %v6972_v61, %v6970_v45 }
 0x38d   : > { %5349 = vmatmul.mubr.msk.bf16.gmra.mrb[8].mxu0 %vm1817_vm10, %v6831_v29  ;;  %v7644_v29 = vld [vmem:[#allocation17_spill] sm:$0xff] }
 0x38e   : > { %5352 = vmatprep.mubr.msk.bf16.mxu0 %vm1817_vm10, %v6844_v50  ;;  %v3681_v50 = vpack.c.bf16 %v3677_v62, %v7644_v29 }
 0x395   : > { %5353 = vmatmul.mubr.msk.bf16.gmra.mrb[12].mxu0 %vm1817_vm10, %v7189_v53 }
 0x396   : > { %5356 = vmatprep.mubr.msk.bf16.mxu0 %vm1817_vm10, %v7637_v54 }
 0x39d   : > { %5357 = vmatmul.mubr.msk.bf16.gmra.mrb[16].mxu0 %vm1817_vm10, %v7638_v3 }
 0x39e   : > { %5360 = vmatprep.mubr.msk.bf16.mxu0 %vm1817_vm10, %v7639_v32 }
 0x3a5   : > { %5361 = vmatmul.mubr.msk.bf16.gmra.mrb[20].mxu0 %vm1817_vm10, %v3452_v51 }
 0x3a6   : > { %5364 = vmatprep.mubr.msk.bf16.mxu0 %vm1817_vm10, %v7641_v21 }
 0x3ad   : > { %5365 = vmatmul.mubr.msk.bf16.gmra.mrb[24].mxu0 %vm1817_vm10, %v7642_v27 }
 0x3ae   : > { %5368 = vmatprep.mubr.msk.bf16.mxu0 %vm1817_vm10, %v7643_v37 }
 0x3b5   : > { %5369 = vmatmul.mubr.msk.bf16.gmra.mrb[28].mxu0 %vm1817_vm10, %v3681_v50 }
 0x450   : > { %v5342_v5 = vpop.f32.mrb[0].mxu0 }
 0x451   : > { %v7376_v45 = vadd.f32 %v5342_v5, %v7213_v18  ;;  %v3740_v61 = vpop.f32.mrb[1].mxu0 }
 0x452   : > { %v7379_v0 = vadd.f32 %v3740_v61, %v7217_v41  ;;  %v5343_v25 = vpop.f32.mrb[2].mxu0 }
 0x453   : > { %v7382_v58 = vadd.f32 %v5343_v25, %v7223_v38  ;;  %v3743_v2 = vpop.f32.mrb[3].mxu0 }
 0x454   : > { %v7385_v1 = vadd.f32 %v3743_v2, %v7225_v40 }
 0x458   : > { %v5346_v13 = vpop.f32.mrb[4].mxu0 }
 0x459   : > { %v7388_v6 = vadd.f32 %v5346_v13, %v7227_v8  ;;  %v3756_v19 = vpop.f32.mrb[5].mxu0 }
 0x45a   : > { %v7391_v53 = vadd.f32 %v3756_v19, %v7233_v49  ;;  %v5347_v28 = vpop.f32.mrb[6].mxu0 }
 0x45b   : > { %v7394_v17 = vadd.f32 %v5347_v28, %v7239_v31  ;;  %v3759_v18 = vpop.f32.mrb[7].mxu0 }
 0x45c   : > { %v7397_v41 = vadd.f32 %v3759_v18, %v7241_v44 }
 0x460   : > { %v5350_v7 = vpop.f32.mrb[8].mxu0 }
 0x461   : > { %v5396_v38 = vadd.f32 %v5350_v7, %v7243_v43  ;;  %v3772_v40 = vpop.f32.mrb[9].mxu0 }
 0x462   : > { %v5397_v10 = vadd.f32 %v3772_v40, %v7249_v16  ;;  %v5351_v8 = vpop.f32.mrb[10].mxu0 }
 0x463   : > { %v3901_v26 = vmax.f32 %v7376_v45, %v5396_v38  ;;  %v5398_v49 = vadd.f32 %v5351_v8, %v7253_v14  ;;  %v3775_v30 = vpop.f32.mrb[11].mxu0  ;;  %v7645_v8 = vmov 0.0  }
 0x464   : > { %v3899_v56 = vmax.f32 %v7379_v0, %v5397_v10  ;;  %v5399_v31 = vadd.f32 %v3775_v30, %v7255_v24 }
 0x465   : > { %v3902_v46 = vmax.f32 %v7382_v58, %v5398_v49 }
 0x466   : > { %v3900_v44 = vmax.f32 %v7385_v1, %v5399_v31 }
 0x468   : > { %v5354_v54 = vpop.f32.mrb[12].mxu0 }
 0x469   : > { %v7408_v43 = vadd.f32 %v5354_v54, %v7257_v36  ;;  %v3788_v3 = vpop.f32.mrb[13].mxu0 }
 0x46a   : > { %v7411_v16 = vadd.f32 %v3788_v3, %v7261_v4  ;;  %v5355_v32 = vpop.f32.mrb[14].mxu0 }
 0x46b   : > { %v3905_v14 = vmax.f32 %v7388_v6, %v7408_v43  ;;  %v7416_v35 = vadd.f32 %v5355_v32, %v7265_v15  ;;  %v3791_v24 = vpop.f32.mrb[15].mxu0 }
 0x46c   : > { %v3903_v57 = vmax.f32 %v7391_v53, %v7411_v16  ;;  %v7421_v51 = vadd.f32 %v3791_v24, %v7267_v52 }
 0x46d   : > { %v3906_v36 = vmax.f32 %v7394_v17, %v7416_v35 }
 0x46e   : > { %v3904_v4 = vmax.f32 %v7397_v41, %v7421_v51 }
 0x470   : > { %v5358_v21 = vpop.f32.mrb[16].mxu0 }
 0x471   : > { %v5404_v27 = vadd.f32 %v5358_v21, %v7269_v55  ;;  %v3804_v37 = vpop.f32.mrb[17].mxu0 }
 0x472   : > { %v5405_v15 = vadd.f32 %v3804_v37, %v7273_v59  ;;  %v5359_v62 = vpop.f32.mrb[18].mxu0 }
 0x473   : > { %v5406_v29 = vadd.f32 %v5359_v62, %v7277_v11  ;;  %v3807_v50 = vpop.f32.mrb[19].mxu0 }
 0x474   : > { %v5407_v5 = vadd.f32 %v3807_v50, %v7279_v12 }
 0x478   : > { %v5362_v52 = vpop.f32.mrb[20].mxu0 }
 0x479   : > { %v5408_v45 = vadd.f32 %v5362_v52, %v7284_v39  ;;  %v3820_v61 = vpop.f32.mrb[21].mxu0 }
 0x47a   : > { %v5409_v0 = vadd.f32 %v3820_v61, %v7288_v63  ;;  %v5363_v25 = vpop.f32.mrb[22].mxu0  ;;  %v4415_v63 = vld [vmem:[%s7482_s3] ss:$0 sm:$0xff] }
 0x47b   : > { %v5410_v58 = vadd.f32 %v5363_v25, %v7292_v34  ;;  %v3823_v2 = vpop.f32.mrb[23].mxu0 }
 0x47c   : > { %v5411_v55 = vadd.f32 %v3823_v2, %v7294_v48 }
 0x480   : > { %v5366_v1 = vpop.f32.mrb[24].mxu0 }
 0x481   : > { %v5412_v59 = vadd.f32 %v5366_v1, %v7296_v22  ;;  %v3836_v11 = vpop.f32.mrb[25].mxu0 }
 0x482   : > { %v5413_v13 = vadd.f32 %v3836_v11, %v7300_v23  ;;  %v5367_v12 = vpop.f32.mrb[26].mxu0 }
 0x483   : > { %v3909_v19 = vmax.f32 %v5404_v27, %v5412_v59  ;;  %v5414_v39 = vadd.f32 %v5367_v12, %v7304_v9  ;;  %v3839_v28 = vpop.f32.mrb[27].mxu0 }
 0x484   : > { %v3907_v34 = vmax.f32 %v5405_v15, %v5413_v13  ;;  %v5415_v18 = vadd.f32 %v3839_v28, %v7306_v33 }
 0x485   : > { %v3917_v48 = vmax.f32 %v3901_v26, %v3909_v19  ;;  %v3910_v7 = vmax.f32 %v5406_v29, %v5414_v39 }
 0x486   : > { %v3915_v38 = vmax.f32 %v3899_v56, %v3907_v34  ;;  %v3908_v40 = vmax.f32 %v5407_v5, %v5415_v18 }
 0x487   : > { %vm3931_vm10 = vcmp.ge.f32.partialorder %v3917_v48, %v4415_v63  ;;  %v3918_v22 = vmax.f32 %v3902_v46, %v3910_v7 }
 0x488   : > { %vm3929_vm13 = vcmp.ge.f32.partialorder %v3915_v38, %v4415_v63  ;;  %v3916_v23 = vmax.f32 %v3900_v44, %v3908_v40  ;;  %v5370_v10 = vpop.f32.mrb[28].mxu0  ;;  %v3939_v9 = vsel %vm3931_vm10, 1.0, %v7645_v8 }
 0x489   : > { %vm3932_vm14 = vcmp.ge.f32.partialorder %v3918_v22, %v4415_v63  ;;  %v5416_v49 = vadd.f32 %v5370_v10, %v7308_v47  ;;  %v3852_v30 = vpop.f32.mrb[29].mxu0  ;;  %v3937_v31 = vsel %vm3929_vm13, 1.0, %v7645_v8 }
 0x48a   : > { %v3940_v33 = vsel %vm3932_vm14, 1.0, %v7645_v8  ;;  %vm3930_vm15 = vcmp.ge.f32.partialorder %v3916_v23, %v4415_v63  ;;  %v5417_v26 = vadd.f32 %v3852_v30, %v7312_v20  ;;  %v5371_v56 = vpop.f32.mrb[30].mxu0 }
 0x48b   : > { %v4439_v46 = vpack.c.bf16 %v3940_v33, %v3939_v9  ;;  %v3938_v44 = vsel %vm3930_vm15, 1.0, %v7645_v8  ;;  %v3913_v47 = vmax.f32 %v5408_v45, %v5416_v49  ;;  %v5418_v54 = vadd.f32 %v5371_v56, %v7316_v60  ;;  %v3855_v3 = vpop.f32.mrb[31].mxu0 }
 0x48c   : > { %v4436_v32 = vpack.c.bf16 %v3938_v44, %v3937_v31  ;;  %v3911_v24 = vmax.f32 %v5409_v0, %v5417_v26  ;;  %v5419_v21 = vadd.f32 %v3855_v3, %v7318_v42 }
 0x48d   : > { %4447 = vst [vmem:[%s7449_s12 + $0x8] sm:$0xff] %v4439_v46   ;;  %v3921_v27 = vmax.f32 %v3905_v14, %v3913_v47  ;;  %v3914_v37 = vmax.f32 %v5410_v58, %v5418_v54 }
 0x48e   : > { %4437 = vst [vmem:[%s7449_s12] sm:$0xff] %v4436_v32   ;;  %v3919_v20 = vmax.f32 %v3903_v57, %v3911_v24  ;;  %v3912_v15 = vmax.f32 %v5411_v55, %v5419_v21 }
 0x48f   : > { %vm3935_vm0 = vcmp.ge.f32.partialorder %v3921_v27, %v4415_v63  ;;  %v3922_v60 = vmax.f32 %v3906_v36, %v3914_v37 }
 0x490   : > { %vm3933_vm1 = vcmp.ge.f32.partialorder %v3919_v20, %v4415_v63  ;;  %v3920_v42 = vmax.f32 %v3904_v4, %v3912_v15  ;;  %v3943_v6 = vsel %vm3935_vm0, 1.0, %v7645_v8 }
 0x491   : > { %vm3936_vm2 = vcmp.ge.f32.partialorder %v3922_v60, %v4415_v63  ;;  %v3941_v53 = vsel %vm3933_vm1, 1.0, %v7645_v8 }
 0x492   : > { %v3944_v43 = vsel %vm3936_vm2, 1.0, %v7645_v8  ;;  %vm3934_vm3 = vcmp.ge.f32.partialorder %v3920_v42, %v4415_v63 }
 0x493   : > { %v4445_v16 = vpack.c.bf16 %v3944_v43, %v3943_v6  ;;  %v3942_v14 = vsel %vm3934_vm3, 1.0, %v7645_v8 }
 0x494   : > { %v4442_v57 = vpack.c.bf16 %v3942_v14, %v3941_v53 }
 0x495   : > { %4449 = vst [vmem:[%s7449_s12 + $0x18] sm:$0xff] %v4445_v16  }
 0x496   : > { %4448 = vst [vmem:[%s7449_s12 + $0x10] sm:$0xff] %v4442_v57  }
 0x497 PF: > { %s14_s15 = sadd.s32 1, %s5678_s15  }
 0x498   : > { %p11_p4 = scmp.ge.s32.totalorder %s14_s15, 4  }
 0x49a   :  { %13 = sbr.rel (!%p11_p4) target bundleno = 1 (0x1), region = 77 }

</bundles_post_ra>
